<compile_context>
chip_gen: v7x
topology: tpu7x:2x2x1
jax: 0.10.0
libtpu: 0.0.40
codegen_flags: <defaults>
</compile_context>

<pallas_src>
import functools

import jax
import jax.numpy as jnp
from jax.experimental import pallas as pl
from jax.experimental.pallas import tpu as pltpu

# ------------------------- scaled-down MedKLIP config -------------------------
CFG = dict(
    B=2, C=3, IMG=16, PATCH=4,     # images (2, 3, 16, 16); 4x4 patches -> 16 visual tokens
    NUM_FTRS=32,                   # stands in for 1024 (resnet50 fc.in_features / 2)
    D_MODEL=32,                    # stands in for 256
    TEXT_DIM=96,                   # stands in for 768 (BERT hidden size)
    NUM_QUERIES=8,                 # rows of the disease book
    NHEAD=4, NLAYERS=2, DIM_FF=64, # decoder config (1024 FF scaled down)
    ATTR=2,                        # attribute_set_size
)

_EPS = 1e-5
OUT_PAD = 128                      # lane-dense width of the merged output slab

_D = CFG['D_MODEL']
_F = CFG['DIM_FF']
_NF = CFG['NUM_FTRS']
_T = CFG['TEXT_DIM']
_CPP = CFG['C'] * CFG['PATCH'] ** 2


def _offsets(entries):
    """entries: list of (name, width) -> (dict name -> (start, end), total width)."""
    offs, cur = {}, 0
    for name, w in entries:
        offs[name] = (cur, cur + w)
        cur += w
    return offs, cur


# Per-layer matmul weights with D-wide inputs, lane-concatenated. Groups are arranged so each
# weight lives inside a single 128-lane tile: [96+32 | 64+64 | 32+32] = 320 lanes.
DEC_W_ENTRIES = [('sa_qkv', 3 * _D), ('sa_out', _D),
                 ('ca_kv', 2 * _D), ('ff1', _F),
                 ('ca_q', _D), ('ca_out', _D)]
DEC_W_OFF, DEC_W_WIDTH = _offsets(DEC_W_ENTRIES)

# Per-layer biases + LayerNorm params, lane-concatenated (tile-aligned groups): 544 lanes.
DEC_V_ENTRIES = [('sa_qkv_b', 3 * _D), ('sa_out_b', _D),
                 ('ca_kv_b', 2 * _D), ('ff1_b', _F),
                 ('ca_q_b', _D), ('ca_out_b', _D), ('ff2_b', _D), ('n1_g', _D),
                 ('n1_b', _D), ('n2_g', _D), ('n2_b', _D), ('n3_g', _D),
                 ('n3_b', _D)]
DEC_V_OFF, DEC_V_WIDTH = _offsets(DEC_V_ENTRIES)

# Backbone / embedding weights row-concatenated (all have D output lanes): 208 rows, offsets
# are multiples of 8 so static row slices are sublane-tile aligned.
HEAD_W_ENTRIES = [('patch_w', _CPP), ('l1_w', _NF), ('l2_w', _NF), ('de_w', _T)]
HEAD_W_OFF, HEAD_W_ROWS = _offsets(HEAD_W_ENTRIES)

# Non-decoder vectors, lane-concatenated: cls bias (padded to 128) first so it owns tile 0.
HEAD_V_ENTRIES = [('cls_b', OUT_PAD), ('patch_b', _NF), ('l1_b', _NF), ('l2_b', _D),
                  ('de_b', _D), ('dn_g', _D), ('dn_b', _D)]
HEAD_V_OFF, HEAD_V_WIDTH = _offsets(HEAD_V_ENTRIES)


# ------------------------------ fused kernel ----------------------------------
def _medklip_fused_kernel(
    patches_ref, book_ref, head_w_ref, head_v_ref, cls_w_ref,
    dec_wd_ref, dec_wf_ref, dec_v_ref,
    out_ref,
    *, B, N, Q, D, H, F, L, out_pad,
):
    """Full MedKLIP forward for the whole batch in a single program."""
    f32 = jnp.float32
    dh = D // H

    def ln(x, g, b):
        mu = jnp.mean(x, axis=-1, keepdims=True)
        var = jnp.mean((x - mu) ** 2, axis=-1, keepdims=True)
        return (x - mu) * jax.lax.rsqrt(var + _EPS) * g + b

    def hrow(name):                       # static row slice of the head weight slab
        s, e = HEAD_W_OFF[name]
        return head_w_ref[s:e, :]

    def hvec(name):                       # static lane slice of the head vector slab
        s, e = HEAD_V_OFF[name]
        return head_v_ref[:, s:e]

    def dwd(li, name):                    # static lane slice of the per-layer weight slab
        s, e = DEC_W_OFF[name]
        return dec_wd_ref[li, :, s:e]

    def dvec(li, name):                   # static lane slice of the per-layer vector slab
        s, e = DEC_V_OFF[name]
        return dec_v_ref[li, :, s:e]

    def split_heads(x2d, lt):
        # (B*lt, D) -> (B*H, lt, dh): heads become the batch dim of the score einsums
        return x2d.reshape(B, lt, H, dh).transpose(0, 2, 1, 3).reshape(B * H, lt, dh)

    def merge_heads(x, lt):
        # (B*H, lt, dh) -> (B*lt, D): concatenated heads ready for one output projection
        return x.reshape(B, H, lt, dh).transpose(0, 2, 1, 3).reshape(B * lt, D)

    def attention(q2d, k2d, v2d, lq, lk, exact_softmax):
        qh = split_heads(q2d, lq)         # 1/sqrt(dh) already folded into the q weights
        kh = split_heads(k2d, lk)
        vh = split_heads(v2d, lk)
        s = jnp.einsum('zqd,zkd->zqk', qh, kh, preferred_element_type=f32)
        s = s - jnp.max(s, axis=-1, keepdims=True)
        e = jnp.exp(s)
        denom = jnp.sum(e, axis=-1, keepdims=True)
        if exact_softmax:                 # cross-attn maps are returned as `ws`: keep exact
            attn = e / denom
        else:                             # self-attn: approx reciprocal on the EUP slot
            attn = e * pl.reciprocal(denom, approx=True)
        ctx = jnp.einsum('zqk,zkd->zqd', attn, vh, preferred_element_type=f32)
        return merge_heads(ctx, lq), attn

    # --- visual backbone stand-in (patch conv) + image_encoder head (res_l1/relu/res_l2) ---
    px = patches_ref[...].reshape(B * N, -1)                                    # (B*N, C*P*P)
    feat = jnp.maximum(
        jnp.dot(px, hrow('patch_w'), preferred_element_type=f32) + hvec('patch_b'), 0.0)
    hdn = jnp.maximum(
        jnp.dot(feat, hrow('l1_w'), preferred_element_type=f32) + hvec('l1_b'), 0.0)
    mem2 = jnp.dot(hdn, hrow('l2_w'), preferred_element_type=f32) + hvec('l2_b')  # (B*N, D)

    # --- disease queries: disease_embedding_layer(disease_book), shared across batch ---
    tgt0 = jnp.dot(book_ref[...], hrow('de_w'), preferred_element_type=f32) + hvec('de_b')
    tgt = jnp.broadcast_to(tgt0.reshape(1, Q, D), (B, Q, D))   # query_embed.repeat(1, B, 1)

    ws_zpad = jnp.zeros((B, Q, out_pad - N), f32)              # hoisted lane padding for ws

    # --- transformer decoder: L pre-norm DETR layers; tgt stays resident in vregs/VMEM ---
    # NOTE: at L=2 / D=32 a Python unroll is fine; switch to lax.fori_loop indexing the
    # stacked (L, ...) slabs if the layer count / d_model grow (vreg live-range safeguard).
    for li in range(L):
        # self-attention block (query_pos is None) — packed QKV, one wide matmul
        t2 = ln(tgt, dvec(li, 'n1_g'), dvec(li, 'n1_b')).reshape(B * Q, D)
        qkv = jnp.dot(t2, dwd(li, 'sa_qkv'), preferred_element_type=f32) + dvec(li, 'sa_qkv_b')
        sa_ctx, _ = attention(qkv[:, 0:D], qkv[:, D:2 * D], qkv[:, 2 * D:3 * D],
                              Q, Q, exact_softmax=False)
        sa = jnp.dot(sa_ctx, dwd(li, 'sa_out'), preferred_element_type=f32) + dvec(li, 'sa_out_b')
        tgt = tgt + sa.reshape(B, Q, D)

        # cross-attention block over the visual memory (pos is None) — packed K/V matmul
        t2 = ln(tgt, dvec(li, 'n2_g'), dvec(li, 'n2_b')).reshape(B * Q, D)
        q2 = jnp.dot(t2, dwd(li, 'ca_q'), preferred_element_type=f32) + dvec(li, 'ca_q_b')
        kv = jnp.dot(mem2, dwd(li, 'ca_kv'), preferred_element_type=f32) + dvec(li, 'ca_kv_b')
        ca_ctx, attn = attention(q2, kv[:, 0:D], kv[:, D:2 * D], Q, N, exact_softmax=True)
        ca = jnp.dot(ca_ctx, dwd(li, 'ca_out'), preferred_element_type=f32) + dvec(li, 'ca_out_b')
        tgt = tgt + ca.reshape(B, Q, D)

        # head-averaged cross-attention map (PyTorch MHA default), stored lane-dense
        ws = jnp.mean(attn.reshape(B, H, Q, N), axis=1)                       # (B, Q, N)
        out_ref[:, li * Q:(li + 1) * Q, :] = jnp.concatenate([ws, ws_zpad], axis=-1)

        # feed-forward block
        t2 = ln(tgt, dvec(li, 'n3_g'), dvec(li, 'n3_b')).reshape(B * Q, D)
        ffh = jnp.maximum(
            jnp.dot(t2, dwd(li, 'ff1'), preferred_element_type=f32) + dvec(li, 'ff1_b'), 0.0)
        ff = jnp.dot(ffh, dec_wf_ref[li], preferred_element_type=f32) + dvec(li, 'ff2_b')
        tgt = tgt + ff.reshape(B, Q, D)

    # --- decoder_norm + dropout_feas (identity) + classifier (lane-padded to out_pad) ---
    xn = ln(tgt, hvec('dn_g'), hvec('dn_b')).reshape(B * Q, D)
    logits = jnp.dot(xn, cls_w_ref[...], preferred_element_type=f32) + hvec('cls_b')
    out_ref[:, L * Q:(L + 1) * Q, :] = logits.reshape(B, Q, out_pad)


# ------------------------------ forward (wrapper) ------------------------------
def medklip_forward(images, params, cfg):
    b, c, h, w = images.shape
    p = cfg['PATCH']
    n1, n2 = h // p, w // p
    n = n1 * n2
    q = cfg['NUM_QUERIES']
    d = cfg['D_MODEL']
    nlayers = cfg['NLAYERS']

    # TODO(synk): the truncated ResNet-50 backbone (res_features) has no compact Pallas
    # equivalent; it is replaced by a single strided patch-conv done as an in-kernel matmul.
    patches = images.reshape(b, c, n1, p, n2, p)
    patches = patches.transpose(0, 2, 4, 1, 3, 5).reshape(b, n, c * p * p)

    kernel = functools.partial(
        _medklip_fused_kernel,
        B=b, N=n, Q=q, D=d, H=cfg['NHEAD'], F=cfg['DIM_FF'], L=nlayers, out_pad=OUT_PAD)

    operands = (patches, params['disease_book'], params['head_w'], params['head_vec'],
                params['cls_w_pad'], params['dec_wd'], params['dec_wf'], params['dec_vec'])

    # Whole batch in one grid-less program (single-TC v5e/v6e sweet spot). On v7x with larger
    # batches, reintroduce a 2-wide "parallel" batch grid axis to use both TensorCores.
    out = pl.pallas_call(
        kernel,
        out_shape=jax.ShapeDtypeStruct((b, (nlayers + 1) * q, OUT_PAD), jnp.float32),
        in_specs=[pl.BlockSpec(memory_space=pltpu.MemorySpace.VMEM) for _ in operands],
        out_specs=pl.BlockSpec(memory_space=pltpu.MemorySpace.VMEM),
        compiler_params=pltpu.CompilerParams(vmem_limit_bytes=32 * 1024 * 1024),
    )(*operands)

    # unpack the merged lane-dense output slab
    ws = out[:, :nlayers * q, :n].reshape(b, nlayers, q, n).transpose(1, 0, 2, 3)  # (L, B, Q, n)
    logits = out[:, nlayers * q:, :cfg['ATTR']]                                    # (B, Q, attr)
    return logits, ws


# ------------------------------ parameter init --------------------------------
def init_params(key, cfg):
    keys = iter(jax.random.split(key, 64))
    std = 0.02
    D, F, H = cfg['D_MODEL'], cfg['DIM_FF'], cfg['NHEAD']
    dh = D // H
    T, NF, Q = cfg['TEXT_DIM'], cfg['NUM_FTRS'], cfg['NUM_QUERIES']
    L, A = cfg['NLAYERS'], cfg['ATTR']
    CPP = cfg['C'] * cfg['PATCH'] ** 2
    assert NF == D, "row-packed head_w slab assumes num_ftrs == d_model (pad columns otherwise)"

    def W(shape):  # BERT-style init used by _init_weights
        return jax.random.normal(next(keys), shape, jnp.float32) * std

    zeros = lambda s: jnp.zeros(s, jnp.float32)
    ones = lambda s: jnp.ones(s, jnp.float32)
    q_scale = 1.0 / float(dh) ** 0.5   # folded into query projections (biases are zero anyway)

    # ---- head slabs (backbone stand-in + res_l1/res_l2 + disease embedding + classifier) ----
    head_w = jnp.concatenate([W((CPP, NF)),     # patch-conv stand-in
                              W((NF, NF)),      # res_l1
                              W((NF, D)),       # res_l2
                              W((T, D))],       # disease_embedding_layer (768 -> 256 scaled)
                             axis=0)
    head_vec_parts = {
        'cls_b': zeros((1, OUT_PAD)),
        'patch_b': zeros((1, NF)), 'l1_b': zeros((1, NF)), 'l2_b': zeros((1, D)),
        'de_b': zeros((1, D)), 'dn_g': ones((1, D)), 'dn_b': zeros((1, D)),
    }
    head_vec = jnp.concatenate([head_vec_parts[n] for n, _ in HEAD_V_ENTRIES], axis=1)
    cls_w_pad = jnp.concatenate([W((D, A)), zeros((D, OUT_PAD - A))], axis=1)

    # ---- decoder per-layer slabs (stacked on a leading layer axis) ----
    dec_wd, dec_vec, dec_wf = [], [], []
    for _ in range(L):
        w_parts = {
            'sa_qkv': jnp.concatenate([W((D, D)) * q_scale, W((D, D)), W((D, D))], axis=1),
            'sa_out': W((D, D)),
            'ca_kv': jnp.concatenate([W((D, D)), W((D, D))], axis=1),
            'ff1': W((D, F)),
            'ca_q': W((D, D)) * q_scale,
            'ca_out': W((D, D)),
        }
        v_parts = {
            'sa_qkv_b': zeros((1, 3 * D)), 'sa_out_b': zeros((1, D)),
            'ca_kv_b': zeros((1, 2 * D)), 'ff1_b': zeros((1, F)),
            'ca_q_b': zeros((1, D)), 'ca_out_b': zeros((1, D)), 'ff2_b': zeros((1, D)),
            'n1_g': ones((1, D)), 'n1_b': zeros((1, D)),
            'n2_g': ones((1, D)), 'n2_b': zeros((1, D)),
            'n3_g': ones((1, D)), 'n3_b': zeros((1, D)),
        }
        dec_wd.append(jnp.concatenate([w_parts[n] for n, _ in DEC_W_ENTRIES], axis=1))
        dec_vec.append(jnp.concatenate([v_parts[n] for n, _ in DEC_V_ENTRIES], axis=1))
        dec_wf.append(W((F, D)))

    return dict(
        # TODO(synk): the BERT text encoder (init-time only) is replaced by fixed random
        # CLS embeddings standing in for disease_book.
        disease_book=jax.random.normal(next(keys), (Q, T), jnp.float32),
        head_w=head_w, head_vec=head_vec, cls_w_pad=cls_w_pad,
        dec_wd=jnp.stack(dec_wd),     # (L, D, 320)
        dec_vec=jnp.stack(dec_vec),   # (L, 1, 544)
        dec_wf=jnp.stack(dec_wf),     # (L, F, D)
        # note: cl_fc (Linear(256, 768)) is unused in forward() and therefore omitted.
    )


# ----------------------------------- main --------------------------------------
if __name__ == "__main__":
    key = jax.random.PRNGKey(0)
    k_img, k_par = jax.random.split(key)

    images = jax.random.normal(k_img, (CFG['B'], CFG['C'], CFG['IMG'], CFG['IMG']), jnp.float32)
    params = init_params(k_par, CFG)

    fwd = jax.jit(functools.partial(medklip_forward, cfg=CFG))
    logits, ws = fwd(images, params)
    jax.block_until_ready((logits, ws))

    n_tokens = (CFG['IMG'] // CFG['PATCH']) ** 2
    assert logits.shape == (CFG['B'], CFG['NUM_QUERIES'], CFG['ATTR'])
    assert ws.shape == (CFG['NLAYERS'], CFG['B'], CFG['NUM_QUERIES'], n_tokens)
    assert bool(jnp.all(jnp.isfinite(logits))) and bool(jnp.all(jnp.isfinite(ws)))
    print("KERNEL_OK")
</pallas_src>

<mosaic_0001>
module attributes {stable_mosaic.version = 11 : i64} {
  func.func @_medklip_fused_kernel(%arg0: memref<2x16x48xf32, #tpu.memory_space<vmem>>, %arg1: memref<8x96xf32, #tpu.memory_space<vmem>>, %arg2: memref<208x32xf32, #tpu.memory_space<vmem>>, %arg3: memref<1x320xf32, #tpu.memory_space<vmem>>, %arg4: memref<32x128xf32, #tpu.memory_space<vmem>>, %arg5: memref<2x32x320xf32, #tpu.memory_space<vmem>>, %arg6: memref<2x64x32xf32, #tpu.memory_space<vmem>>, %arg7: memref<2x1x544xf32, #tpu.memory_space<vmem>>, %arg8: memref<2x24x128xf32, #tpu.memory_space<vmem>>) attributes {dimension_semantics = [], scalar_prefetch = 0 : i64, scratch_operands = 0 : i64, tpu.core_type = #tpu.core_type<tc>} {
    %c0 = arith.constant 0 : index
    %c0_0 = arith.constant 0 : index
    %c0_1 = arith.constant 0 : index
    %0 = vector.load %arg0[%c0, %c0_0, %c0_1] : memref<2x16x48xf32, #tpu.memory_space<vmem>>, vector<2x16x48xf32>
    %1 = vector.shape_cast %0 : vector<2x16x48xf32> to vector<32x48xf32>
    %c0_2 = arith.constant 0 : index
    %c0_3 = arith.constant 0 : index
    %2 = vector.load %arg2[%c0_2, %c0_3] : memref<208x32xf32, #tpu.memory_space<vmem>>, vector<48x32xf32>
    %cst = arith.constant dense<0.000000e+00> : vector<32x32xf32>
    %3 = tpu.matmul %1, %2, %cst {dimension_numbers = #tpu.dot_dimension_numbers<[1], [0], [0], [1], [0, 0, 1, 1], [], []>} : vector<32x48xf32>, vector<48x32xf32>, vector<32x32xf32> -> vector<32x32xf32>
    %c0_4 = arith.constant 0 : index
    %c128 = arith.constant 128 : index
    %4 = vector.load %arg3[%c0_4, %c128] : memref<1x320xf32, #tpu.memory_space<vmem>>, vector<1x32xf32>
    %5 = vector.broadcast %4 : vector<1x32xf32> to vector<32x32xf32>
    %6 = arith.addf %3, %5 : vector<32x32xf32>
    %cst_5 = arith.constant 0.000000e+00 : f32
    %7 = vector.broadcast %cst_5 : f32 to vector<32x32xf32>
    %8 = arith.maximumf %6, %7 : vector<32x32xf32>
    %c48 = arith.constant 48 : index
    %c0_6 = arith.constant 0 : index
    %9 = vector.load %arg2[%c48, %c0_6] : memref<208x32xf32, #tpu.memory_space<vmem>>, vector<32x32xf32>
    %cst_7 = arith.constant dense<0.000000e+00> : vector<32x32xf32>
    %10 = tpu.matmul %8, %9, %cst_7 {dimension_numbers = #tpu.dot_dimension_numbers<[1], [0], [0], [1], [0, 0, 1, 1], [], []>} : vector<32x32xf32>, vector<32x32xf32>, vector<32x32xf32> -> vector<32x32xf32>
    %c0_8 = arith.constant 0 : index
    %c160 = arith.constant 160 : index
    %11 = vector.load %arg3[%c0_8, %c160] : memref<1x320xf32, #tpu.memory_space<vmem>>, vector<1x32xf32>
    %12 = vector.broadcast %11 : vector<1x32xf32> to vector<32x32xf32>
    %13 = arith.addf %10, %12 : vector<32x32xf32>
    %cst_9 = arith.constant 0.000000e+00 : f32
    %14 = vector.broadcast %cst_9 : f32 to vector<32x32xf32>
    %15 = arith.maximumf %13, %14 : vector<32x32xf32>
    %c80 = arith.constant 80 : index
    %c0_10 = arith.constant 0 : index
    %16 = vector.load %arg2[%c80, %c0_10] : memref<208x32xf32, #tpu.memory_space<vmem>>, vector<32x32xf32>
    %cst_11 = arith.constant dense<0.000000e+00> : vector<32x32xf32>
    %17 = tpu.matmul %15, %16, %cst_11 {dimension_numbers = #tpu.dot_dimension_numbers<[1], [0], [0], [1], [0, 0, 1, 1], [], []>} : vector<32x32xf32>, vector<32x32xf32>, vector<32x32xf32> -> vector<32x32xf32>
    %c0_12 = arith.constant 0 : index
    %c192 = arith.constant 192 : index
    %18 = vector.load %arg3[%c0_12, %c192] : memref<1x320xf32, #tpu.memory_space<vmem>>, vector<1x32xf32>
    %19 = vector.broadcast %18 : vector<1x32xf32> to vector<32x32xf32>
    %20 = arith.addf %17, %19 : vector<32x32xf32>
    %c0_13 = arith.constant 0 : index
    %c0_14 = arith.constant 0 : index
    %21 = vector.load %arg1[%c0_13, %c0_14] : memref<8x96xf32, #tpu.memory_space<vmem>>, vector<8x96xf32>
    %c112 = arith.constant 112 : index
    %c0_15 = arith.constant 0 : index
    %22 = vector.load %arg2[%c112, %c0_15] : memref<208x32xf32, #tpu.memory_space<vmem>>, vector<96x32xf32>
    %cst_16 = arith.constant dense<0.000000e+00> : vector<8x32xf32>
    %23 = tpu.matmul %21, %22, %cst_16 {dimension_numbers = #tpu.dot_dimension_numbers<[1], [0], [0], [1], [0, 0, 1, 1], [], []>} : vector<8x96xf32>, vector<96x32xf32>, vector<8x32xf32> -> vector<8x32xf32>
    %c0_17 = arith.constant 0 : index
    %c224 = arith.constant 224 : index
    %24 = vector.load %arg3[%c0_17, %c224] : memref<1x320xf32, #tpu.memory_space<vmem>>, vector<1x32xf32>
    %25 = vector.broadcast %24 : vector<1x32xf32> to vector<8x32xf32>
    %26 = arith.addf %23, %25 : vector<8x32xf32>
    %27 = vector.shape_cast %26 : vector<8x32xf32> to vector<1x8x32xf32>
    %28 = vector.shape_cast %27 : vector<1x8x32xf32> to vector<1x8x32xf32>
    %29 = vector.broadcast %28 : vector<1x8x32xf32> to vector<2x8x32xf32>
    %cst_18 = arith.constant 0.000000e+00 : f32
    %30 = vector.broadcast %cst_18 : f32 to vector<2x8x112xf32>
    %c0_19 = arith.constant 0 : index
    %c0_20 = arith.constant 0 : index
    %c352 = arith.constant 352 : index
    %31 = vector.load %arg7[%c0_19, %c0_20, %c352] : memref<2x1x544xf32, #tpu.memory_space<vmem>>, vector<1x1x32xf32>
    %32 = vector.shape_cast %31 : vector<1x1x32xf32> to vector<1x32xf32>
    %c0_21 = arith.constant 0 : index
    %c0_22 = arith.constant 0 : index
    %c384 = arith.constant 384 : index
    %33 = vector.load %arg7[%c0_21, %c0_22, %c384] : memref<2x1x544xf32, #tpu.memory_space<vmem>>, vector<1x1x32xf32>
    %34 = vector.shape_cast %33 : vector<1x1x32xf32> to vector<1x32xf32>
    %cst_23 = arith.constant dense<0.000000e+00> : vector<2x8xf32>
    %35 = vector.multi_reduction <add>, %29, %cst_23 [2] : vector<2x8x32xf32> to vector<2x8xf32>
    %36 = vector.shape_cast %35 : vector<2x8xf32> to vector<2x8x1xf32>
    %cst_24 = arith.constant 3.200000e+01 : f32
    %37 = vector.broadcast %cst_24 : f32 to vector<2x8x1xf32>
    %38 = arith.divf %36, %37 : vector<2x8x1xf32>
    %39 = vector.broadcast %38 : vector<2x8x1xf32> to vector<2x8x32xf32>
    %40 = arith.subf %29, %39 : vector<2x8x32xf32>
    %41 = arith.mulf %40, %40 : vector<2x8x32xf32>
    %cst_25 = arith.constant dense<0.000000e+00> : vector<2x8xf32>
    %42 = vector.multi_reduction <add>, %41, %cst_25 [2] : vector<2x8x32xf32> to vector<2x8xf32>
    %43 = vector.shape_cast %42 : vector<2x8xf32> to vector<2x8x1xf32>
    %cst_26 = arith.constant 3.200000e+01 : f32
    %44 = vector.broadcast %cst_26 : f32 to vector<2x8x1xf32>
    %45 = arith.divf %43, %44 : vector<2x8x1xf32>
    %46 = vector.broadcast %38 : vector<2x8x1xf32> to vector<2x8x32xf32>
    %47 = arith.subf %29, %46 : vector<2x8x32xf32>
    %cst_27 = arith.constant 9.99999974E-6 : f32
    %48 = vector.broadcast %cst_27 : f32 to vector<2x8x1xf32>
    %49 = arith.addf %45, %48 : vector<2x8x1xf32>
    %50 = math.rsqrt %49 : vector<2x8x1xf32>
    %51 = vector.broadcast %50 : vector<2x8x1xf32> to vector<2x8x32xf32>
    %52 = arith.mulf %47, %51 : vector<2x8x32xf32>
    %53 = vector.shape_cast %32 : vector<1x32xf32> to vector<1x1x32xf32>
    %54 = vector.broadcast %53 : vector<1x1x32xf32> to vector<2x8x32xf32>
    %55 = arith.mulf %52, %54 : vector<2x8x32xf32>
    %56 = vector.shape_cast %34 : vector<1x32xf32> to vector<1x1x32xf32>
    %57 = vector.broadcast %56 : vector<1x1x32xf32> to vector<2x8x32xf32>
    %58 = arith.addf %55, %57 : vector<2x8x32xf32>
    %59 = vector.shape_cast %58 : vector<2x8x32xf32> to vector<16x32xf32>
    %c0_28 = arith.constant 0 : index
    %c0_29 = arith.constant 0 : index
    %c0_30 = arith.constant 0 : index
    %60 = vector.load %arg5[%c0_28, %c0_29, %c0_30] : memref<2x32x320xf32, #tpu.memory_space<vmem>>, vector<1x32x96xf32>
    %61 = vector.shape_cast %60 : vector<1x32x96xf32> to vector<32x96xf32>
    %cst_31 = arith.constant dense<0.000000e+00> : vector<16x96xf32>
    %62 = tpu.matmul %59, %61, %cst_31 {dimension_numbers = #tpu.dot_dimension_numbers<[1], [0], [0], [1], [0, 0, 1, 1], [], []>} : vector<16x32xf32>, vector<32x96xf32>, vector<16x96xf32> -> vector<16x96xf32>
    %c0_32 = arith.constant 0 : index
    %c0_33 = arith.constant 0 : index
    %c0_34 = arith.constant 0 : index
    %63 = vector.load %arg7[%c0_32, %c0_33, %c0_34] : memref<2x1x544xf32, #tpu.memory_space<vmem>>, vector<1x1x96xf32>
    %64 = vector.shape_cast %63 : vector<1x1x96xf32> to vector<1x96xf32>
    %65 = vector.broadcast %64 : vector<1x96xf32> to vector<16x96xf32>
    %66 = arith.addf %62, %65 : vector<16x96xf32>
    %67 = vector.extract_strided_slice %66 {offsets = [0, 0], sizes = [16, 32], strides = [1, 1]} : vector<16x96xf32> to vector<16x32xf32>
    %68 = vector.extract_strided_slice %66 {offsets = [0, 32], sizes = [16, 32], strides = [1, 1]} : vector<16x96xf32> to vector<16x32xf32>
    %69 = vector.extract_strided_slice %66 {offsets = [0, 64], sizes = [16, 32], strides = [1, 1]} : vector<16x96xf32> to vector<16x32xf32>
    %70 = vector.shape_cast %67 : vector<16x32xf32> to vector<2x8x4x8xf32>
    %71 = tpu.transpose %70, [0, 2, 1, 3] : vector<2x8x4x8xf32> -> vector<2x4x8x8xf32>
    %72 = vector.shape_cast %71 : vector<2x4x8x8xf32> to vector<8x8x8xf32>
    %73 = vector.shape_cast %68 : vector<16x32xf32> to vector<2x8x4x8xf32>
    %74 = tpu.transpose %73, [0, 2, 1, 3] : vector<2x8x4x8xf32> -> vector<2x4x8x8xf32>
    %75 = vector.shape_cast %74 : vector<2x4x8x8xf32> to vector<8x8x8xf32>
    %76 = vector.shape_cast %69 : vector<16x32xf32> to vector<2x8x4x8xf32>
    %77 = tpu.transpose %76, [0, 2, 1, 3] : vector<2x8x4x8xf32> -> vector<2x4x8x8xf32>
    %78 = vector.shape_cast %77 : vector<2x4x8x8xf32> to vector<8x8x8xf32>
    "tpu.trace_start"() <{level = 10 : i32, message = "zqd,zkd->zqk"}> : () -> ()
    %cst_35 = arith.constant dense<0.000000e+00> : vector<8x8x8xf32>
    %79 = tpu.matmul %72, %75, %cst_35 {dimension_numbers = #tpu.dot_dimension_numbers<[2], [2], [1], [1], [0, 0, 0, 1, 1, 1], [0], [0]>} : vector<8x8x8xf32>, vector<8x8x8xf32>, vector<8x8x8xf32> -> vector<8x8x8xf32>
    "tpu.trace_stop"() : () -> ()
    %cst_36 = arith.constant dense<0xFF800000> : vector<8x8xf32>
    %80 = vector.multi_reduction <maximumf>, %79, %cst_36 [2] : vector<8x8x8xf32> to vector<8x8xf32>
    %81 = vector.shape_cast %80 : vector<8x8xf32> to vector<8x8x1xf32>
    %82 = vector.broadcast %81 : vector<8x8x1xf32> to vector<8x8x8xf32>
    %83 = arith.subf %79, %82 : vector<8x8x8xf32>
    %84 = math.exp %83 : vector<8x8x8xf32>
    %cst_37 = arith.constant dense<0.000000e+00> : vector<8x8xf32>
    %85 = vector.multi_reduction <add>, %84, %cst_37 [2] : vector<8x8x8xf32> to vector<8x8xf32>
    %86 = vector.shape_cast %85 : vector<8x8xf32> to vector<8x8x1xf32>
    %87 = tpu.reciprocal %86 {approx = true} : vector<8x8x1xf32> -> vector<8x8x1xf32>
    %88 = vector.broadcast %87 : vector<8x8x1xf32> to vector<8x8x8xf32>
    %89 = arith.mulf %84, %88 : vector<8x8x8xf32>
    "tpu.trace_start"() <{level = 10 : i32, message = "zqk,zkd->zqd"}> : () -> ()
    %cst_38 = arith.constant dense<0.000000e+00> : vector<8x8x8xf32>
    %90 = tpu.matmul %89, %78, %cst_38 {dimension_numbers = #tpu.dot_dimension_numbers<[2], [1], [1], [2], [0, 0, 0, 1, 1, 2], [0], [0]>} : vector<8x8x8xf32>, vector<8x8x8xf32>, vector<8x8x8xf32> -> vector<8x8x8xf32>
    "tpu.trace_stop"() : () -> ()
    %91 = vector.shape_cast %90 : vector<8x8x8xf32> to vector<2x4x8x8xf32>
    %92 = tpu.transpose %91, [0, 2, 1, 3] : vector<2x4x8x8xf32> -> vector<2x8x4x8xf32>
    %93 = vector.shape_cast %92 : vector<2x8x4x8xf32> to vector<16x32xf32>
    %c0_39 = arith.constant 0 : index
    %c0_40 = arith.constant 0 : index
    %c96 = arith.constant 96 : index
    %94 = vector.load %arg5[%c0_39, %c0_40, %c96] : memref<2x32x320xf32, #tpu.memory_space<vmem>>, vector<1x32x32xf32>
    %95 = vector.shape_cast %94 : vector<1x32x32xf32> to vector<32x32xf32>
    %cst_41 = arith.constant dense<0.000000e+00> : vector<16x32xf32>
    %96 = tpu.matmul %93, %95, %cst_41 {dimension_numbers = #tpu.dot_dimension_numbers<[1], [0], [0], [1], [0, 0, 1, 1], [], []>} : vector<16x32xf32>, vector<32x32xf32>, vector<16x32xf32> -> vector<16x32xf32>
    %c0_42 = arith.constant 0 : index
    %c0_43 = arith.constant 0 : index
    %c96_44 = arith.constant 96 : index
    %97 = vector.load %arg7[%c0_42, %c0_43, %c96_44] : memref<2x1x544xf32, #tpu.memory_space<vmem>>, vector<1x1x32xf32>
    %98 = vector.shape_cast %97 : vector<1x1x32xf32> to vector<1x32xf32>
    %99 = vector.broadcast %98 : vector<1x32xf32> to vector<16x32xf32>
    %100 = arith.addf %96, %99 : vector<16x32xf32>
    %101 = vector.shape_cast %100 : vector<16x32xf32> to vector<2x8x32xf32>
    %102 = arith.addf %29, %101 : vector<2x8x32xf32>
    %c0_45 = arith.constant 0 : index
    %c0_46 = arith.constant 0 : index
    %c416 = arith.constant 416 : index
    %103 = vector.load %arg7[%c0_45, %c0_46, %c416] : memref<2x1x544xf32, #tpu.memory_space<vmem>>, vector<1x1x32xf32>
    %104 = vector.shape_cast %103 : vector<1x1x32xf32> to vector<1x32xf32>
    %c0_47 = arith.constant 0 : index
    %c0_48 = arith.constant 0 : index
    %c448 = arith.constant 448 : index
    %105 = vector.load %arg7[%c0_47, %c0_48, %c448] : memref<2x1x544xf32, #tpu.memory_space<vmem>>, vector<1x1x32xf32>
    %106 = vector.shape_cast %105 : vector<1x1x32xf32> to vector<1x32xf32>
    %cst_49 = arith.constant dense<0.000000e+00> : vector<2x8xf32>
    %107 = vector.multi_reduction <add>, %102, %cst_49 [2] : vector<2x8x32xf32> to vector<2x8xf32>
    %108 = vector.shape_cast %107 : vector<2x8xf32> to vector<2x8x1xf32>
    %cst_50 = arith.constant 3.200000e+01 : f32
    %109 = vector.broadcast %cst_50 : f32 to vector<2x8x1xf32>
    %110 = arith.divf %108, %109 : vector<2x8x1xf32>
    %111 = vector.broadcast %110 : vector<2x8x1xf32> to vector<2x8x32xf32>
    %112 = arith.subf %102, %111 : vector<2x8x32xf32>
    %113 = arith.mulf %112, %112 : vector<2x8x32xf32>
    %cst_51 = arith.constant dense<0.000000e+00> : vector<2x8xf32>
    %114 = vector.multi_reduction <add>, %113, %cst_51 [2] : vector<2x8x32xf32> to vector<2x8xf32>
    %115 = vector.shape_cast %114 : vector<2x8xf32> to vector<2x8x1xf32>
    %cst_52 = arith.constant 3.200000e+01 : f32
    %116 = vector.broadcast %cst_52 : f32 to vector<2x8x1xf32>
    %117 = arith.divf %115, %116 : vector<2x8x1xf32>
    %118 = vector.broadcast %110 : vector<2x8x1xf32> to vector<2x8x32xf32>
    %119 = arith.subf %102, %118 : vector<2x8x32xf32>
    %cst_53 = arith.constant 9.99999974E-6 : f32
    %120 = vector.broadcast %cst_53 : f32 to vector<2x8x1xf32>
    %121 = arith.addf %117, %120 : vector<2x8x1xf32>
    %122 = math.rsqrt %121 : vector<2x8x1xf32>
    %123 = vector.broadcast %122 : vector<2x8x1xf32> to vector<2x8x32xf32>
    %124 = arith.mulf %119, %123 : vector<2x8x32xf32>
    %125 = vector.shape_cast %104 : vector<1x32xf32> to vector<1x1x32xf32>
    %126 = vector.broadcast %125 : vector<1x1x32xf32> to vector<2x8x32xf32>
    %127 = arith.mulf %124, %126 : vector<2x8x32xf32>
    %128 = vector.shape_cast %106 : vector<1x32xf32> to vector<1x1x32xf32>
    %129 = vector.broadcast %128 : vector<1x1x32xf32> to vector<2x8x32xf32>
    %130 = arith.addf %127, %129 : vector<2x8x32xf32>
    %131 = vector.shape_cast %130 : vector<2x8x32xf32> to vector<16x32xf32>
    %c0_54 = arith.constant 0 : index
    %c0_55 = arith.constant 0 : index
    %c256 = arith.constant 256 : index
    %132 = vector.load %arg5[%c0_54, %c0_55, %c256] : memref<2x32x320xf32, #tpu.memory_space<vmem>>, vector<1x32x32xf32>
    %133 = vector.shape_cast %132 : vector<1x32x32xf32> to vector<32x32xf32>
    %cst_56 = arith.constant dense<0.000000e+00> : vector<16x32xf32>
    %134 = tpu.matmul %131, %133, %cst_56 {dimension_numbers = #tpu.dot_dimension_numbers<[1], [0], [0], [1], [0, 0, 1, 1], [], []>} : vector<16x32xf32>, vector<32x32xf32>, vector<16x32xf32> -> vector<16x32xf32>
    %c0_57 = arith.constant 0 : index
    %c0_58 = arith.constant 0 : index
    %c256_59 = arith.constant 256 : index
    %135 = vector.load %arg7[%c0_57, %c0_58, %c256_59] : memref<2x1x544xf32, #tpu.memory_space<vmem>>, vector<1x1x32xf32>
    %136 = vector.shape_cast %135 : vector<1x1x32xf32> to vector<1x32xf32>
    %137 = vector.broadcast %136 : vector<1x32xf32> to vector<16x32xf32>
    %138 = arith.addf %134, %137 : vector<16x32xf32>
    %c0_60 = arith.constant 0 : index
    %c0_61 = arith.constant 0 : index
    %c128_62 = arith.constant 128 : index
    %139 = vector.load %arg5[%c0_60, %c0_61, %c128_62] : memref<2x32x320xf32, #tpu.memory_space<vmem>>, vector<1x32x64xf32>
    %140 = vector.shape_cast %139 : vector<1x32x64xf32> to vector<32x64xf32>
    %cst_63 = arith.constant dense<0.000000e+00> : vector<32x64xf32>
    %141 = tpu.matmul %20, %140, %cst_63 {dimension_numbers = #tpu.dot_dimension_numbers<[1], [0], [0], [1], [0, 0, 1, 1], [], []>} : vector<32x32xf32>, vector<32x64xf32>, vector<32x64xf32> -> vector<32x64xf32>
    %c0_64 = arith.constant 0 : index
    %c0_65 = arith.constant 0 : index
    %c128_66 = arith.constant 128 : index
    %142 = vector.load %arg7[%c0_64, %c0_65, %c128_66] : memref<2x1x544xf32, #tpu.memory_space<vmem>>, vector<1x1x64xf32>
    %143 = vector.shape_cast %142 : vector<1x1x64xf32> to vector<1x64xf32>
    %144 = vector.broadcast %143 : vector<1x64xf32> to vector<32x64xf32>
    %145 = arith.addf %141, %144 : vector<32x64xf32>
    %146 = vector.extract_strided_slice %145 {offsets = [0, 0], sizes = [32, 32], strides = [1, 1]} : vector<32x64xf32> to vector<32x32xf32>
    %147 = vector.extract_strided_slice %145 {offsets = [0, 32], sizes = [32, 32], strides = [1, 1]} : vector<32x64xf32> to vector<32x32xf32>
    %148 = vector.shape_cast %138 : vector<16x32xf32> to vector<2x8x4x8xf32>
    %149 = tpu.transpose %148, [0, 2, 1, 3] : vector<2x8x4x8xf32> -> vector<2x4x8x8xf32>
    %150 = vector.shape_cast %149 : vector<2x4x8x8xf32> to vector<8x8x8xf32>
    %151 = vector.shape_cast %146 : vector<32x32xf32> to vector<2x16x4x8xf32>
    %152 = tpu.transpose %151, [0, 2, 1, 3] : vector<2x16x4x8xf32> -> vector<2x4x16x8xf32>
    %153 = vector.shape_cast %152 : vector<2x4x16x8xf32> to vector<8x16x8xf32>
    %154 = vector.shape_cast %147 : vector<32x32xf32> to vector<2x16x4x8xf32>
    %155 = tpu.transpose %154, [0, 2, 1, 3] : vector<2x16x4x8xf32> -> vector<2x4x16x8xf32>
    %156 = vector.shape_cast %155 : vector<2x4x16x8xf32> to vector<8x16x8xf32>
    "tpu.trace_start"() <{level = 10 : i32, message = "zqd,zkd->zqk"}> : () -> ()
    %cst_67 = arith.constant dense<0.000000e+00> : vector<8x8x16xf32>
    %157 = tpu.matmul %150, %153, %cst_67 {dimension_numbers = #tpu.dot_dimension_numbers<[2], [2], [1], [1], [0, 0, 0, 1, 1, 1], [0], [0]>} : vector<8x8x8xf32>, vector<8x16x8xf32>, vector<8x8x16xf32> -> vector<8x8x16xf32>
    "tpu.trace_stop"() : () -> ()
    %cst_68 = arith.constant dense<0xFF800000> : vector<8x8xf32>
    %158 = vector.multi_reduction <maximumf>, %157, %cst_68 [2] : vector<8x8x16xf32> to vector<8x8xf32>
    %159 = vector.shape_cast %158 : vector<8x8xf32> to vector<8x8x1xf32>
    %160 = vector.broadcast %159 : vector<8x8x1xf32> to vector<8x8x16xf32>
    %161 = arith.subf %157, %160 : vector<8x8x16xf32>
    %162 = math.exp %161 : vector<8x8x16xf32>
    %cst_69 = arith.constant dense<0.000000e+00> : vector<8x8xf32>
    %163 = vector.multi_reduction <add>, %162, %cst_69 [2] : vector<8x8x16xf32> to vector<8x8xf32>
    %164 = vector.shape_cast %163 : vector<8x8xf32> to vector<8x8x1xf32>
    %165 = vector.broadcast %164 : vector<8x8x1xf32> to vector<8x8x16xf32>
    %166 = arith.divf %162, %165 : vector<8x8x16xf32>
    "tpu.trace_start"() <{level = 10 : i32, message = "zqk,zkd->zqd"}> : () -> ()
    %cst_70 = arith.constant dense<0.000000e+00> : vector<8x8x8xf32>
    %167 = tpu.matmul %166, %156, %cst_70 {dimension_numbers = #tpu.dot_dimension_numbers<[2], [1], [1], [2], [0, 0, 0, 1, 1, 2], [0], [0]>} : vector<8x8x16xf32>, vector<8x16x8xf32>, vector<8x8x8xf32> -> vector<8x8x8xf32>
    "tpu.trace_stop"() : () -> ()
    %168 = vector.shape_cast %167 : vector<8x8x8xf32> to vector<2x4x8x8xf32>
    %169 = tpu.transpose %168, [0, 2, 1, 3] : vector<2x4x8x8xf32> -> vector<2x8x4x8xf32>
    %170 = vector.shape_cast %169 : vector<2x8x4x8xf32> to vector<16x32xf32>
    %c0_71 = arith.constant 0 : index
    %c0_72 = arith.constant 0 : index
    %c288 = arith.constant 288 : index
    %171 = vector.load %arg5[%c0_71, %c0_72, %c288] : memref<2x32x320xf32, #tpu.memory_space<vmem>>, vector<1x32x32xf32>
    %172 = vector.shape_cast %171 : vector<1x32x32xf32> to vector<32x32xf32>
    %cst_73 = arith.constant dense<0.000000e+00> : vector<16x32xf32>
    %173 = tpu.matmul %170, %172, %cst_73 {dimension_numbers = #tpu.dot_dimension_numbers<[1], [0], [0], [1], [0, 0, 1, 1], [], []>} : vector<16x32xf32>, vector<32x32xf32>, vector<16x32xf32> -> vector<16x32xf32>
    %c0_74 = arith.constant 0 : index
    %c0_75 = arith.constant 0 : index
    %c288_76 = arith.constant 288 : index
    %174 = vector.load %arg7[%c0_74, %c0_75, %c288_76] : memref<2x1x544xf32, #tpu.memory_space<vmem>>, vector<1x1x32xf32>
    %175 = vector.shape_cast %174 : vector<1x1x32xf32> to vector<1x32xf32>
    %176 = vector.broadcast %175 : vector<1x32xf32> to vector<16x32xf32>
    %177 = arith.addf %173, %176 : vector<16x32xf32>
    %178 = vector.shape_cast %177 : vector<16x32xf32> to vector<2x8x32xf32>
    %179 = arith.addf %102, %178 : vector<2x8x32xf32>
    %180 = vector.shape_cast %166 : vector<8x8x16xf32> to vector<2x4x8x16xf32>
    %cst_77 = arith.constant dense<0.000000e+00> : vector<2x8x16xf32>
    %181 = vector.multi_reduction <add>, %180, %cst_77 [1] : vector<2x4x8x16xf32> to vector<2x8x16xf32>
    %cst_78 = arith.constant 4.000000e+00 : f32
    %182 = vector.broadcast %cst_78 : f32 to vector<2x8x16xf32>
    %183 = arith.divf %181, %182 : vector<2x8x16xf32>
    %184 = tpu.concatenate %183, %30 in 2 : vector<2x8x16xf32>, vector<2x8x112xf32> -> vector<2x8x128xf32>
    %c0_79 = arith.constant 0 : index
    %c0_80 = arith.constant 0 : index
    %c0_81 = arith.constant 0 : index
    %185 = vector.load %arg8[%c0_79, %c0_80, %c0_81] : memref<2x24x128xf32, #tpu.memory_space<vmem>>, vector<2x8x128xf32>
    tpu.vector_store %arg8[%c0_79, %c0_80, %c0_81], %184 {strides = array<i32>} : memref<2x24x128xf32, #tpu.memory_space<vmem>>, vector<2x8x128xf32>,
    %c0_82 = arith.constant 0 : index
    %c0_83 = arith.constant 0 : index
    %c480 = arith.constant 480 : index
    %186 = vector.load %arg7[%c0_82, %c0_83, %c480] : memref<2x1x544xf32, #tpu.memory_space<vmem>>, vector<1x1x32xf32>
    %187 = vector.shape_cast %186 : vector<1x1x32xf32> to vector<1x32xf32>
    %c0_84 = arith.constant 0 : index
    %c0_85 = arith.constant 0 : index
    %c512 = arith.constant 512 : index
    %188 = vector.load %arg7[%c0_84, %c0_85, %c512] : memref<2x1x544xf32, #tpu.memory_space<vmem>>, vector<1x1x32xf32>
    %189 = vector.shape_cast %188 : vector<1x1x32xf32> to vector<1x32xf32>
    %cst_86 = arith.constant dense<0.000000e+00> : vector<2x8xf32>
    %190 = vector.multi_reduction <add>, %179, %cst_86 [2] : vector<2x8x32xf32> to vector<2x8xf32>
    %191 = vector.shape_cast %190 : vector<2x8xf32> to vector<2x8x1xf32>
    %cst_87 = arith.constant 3.200000e+01 : f32
    %192 = vector.broadcast %cst_87 : f32 to vector<2x8x1xf32>
    %193 = arith.divf %191, %192 : vector<2x8x1xf32>
    %194 = vector.broadcast %193 : vector<2x8x1xf32> to vector<2x8x32xf32>
    %195 = arith.subf %179, %194 : vector<2x8x32xf32>
    %196 = arith.mulf %195, %195 : vector<2x8x32xf32>
    %cst_88 = arith.constant dense<0.000000e+00> : vector<2x8xf32>
    %197 = vector.multi_reduction <add>, %196, %cst_88 [2] : vector<2x8x32xf32> to vector<2x8xf32>
    %198 = vector.shape_cast %197 : vector<2x8xf32> to vector<2x8x1xf32>
    %cst_89 = arith.constant 3.200000e+01 : f32
    %199 = vector.broadcast %cst_89 : f32 to vector<2x8x1xf32>
    %200 = arith.divf %198, %199 : vector<2x8x1xf32>
    %201 = vector.broadcast %193 : vector<2x8x1xf32> to vector<2x8x32xf32>
    %202 = arith.subf %179, %201 : vector<2x8x32xf32>
    %cst_90 = arith.constant 9.99999974E-6 : f32
    %203 = vector.broadcast %cst_90 : f32 to vector<2x8x1xf32>
    %204 = arith.addf %200, %203 : vector<2x8x1xf32>
    %205 = math.rsqrt %204 : vector<2x8x1xf32>
    %206 = vector.broadcast %205 : vector<2x8x1xf32> to vector<2x8x32xf32>
    %207 = arith.mulf %202, %206 : vector<2x8x32xf32>
    %208 = vector.shape_cast %187 : vector<1x32xf32> to vector<1x1x32xf32>
    %209 = vector.broadcast %208 : vector<1x1x32xf32> to vector<2x8x32xf32>
    %210 = arith.mulf %207, %209 : vector<2x8x32xf32>
    %211 = vector.shape_cast %189 : vector<1x32xf32> to vector<1x1x32xf32>
    %212 = vector.broadcast %211 : vector<1x1x32xf32> to vector<2x8x32xf32>
    %213 = arith.addf %210, %212 : vector<2x8x32xf32>
    %214 = vector.shape_cast %213 : vector<2x8x32xf32> to vector<16x32xf32>
    %c0_91 = arith.constant 0 : index
    %c0_92 = arith.constant 0 : index
    %c192_93 = arith.constant 192 : index
    %215 = vector.load %arg5[%c0_91, %c0_92, %c192_93] : memref<2x32x320xf32, #tpu.memory_space<vmem>>, vector<1x32x64xf32>
    %216 = vector.shape_cast %215 : vector<1x32x64xf32> to vector<32x64xf32>
    %cst_94 = arith.constant dense<0.000000e+00> : vector<16x64xf32>
    %217 = tpu.matmul %214, %216, %cst_94 {dimension_numbers = #tpu.dot_dimension_numbers<[1], [0], [0], [1], [0, 0, 1, 1], [], []>} : vector<16x32xf32>, vector<32x64xf32>, vector<16x64xf32> -> vector<16x64xf32>
    %c0_95 = arith.constant 0 : index
    %c0_96 = arith.constant 0 : index
    %c192_97 = arith.constant 192 : index
    %218 = vector.load %arg7[%c0_95, %c0_96, %c192_97] : memref<2x1x544xf32, #tpu.memory_space<vmem>>, vector<1x1x64xf32>
    %219 = vector.shape_cast %218 : vector<1x1x64xf32> to vector<1x64xf32>
    %220 = vector.broadcast %219 : vector<1x64xf32> to vector<16x64xf32>
    %221 = arith.addf %217, %220 : vector<16x64xf32>
    %cst_98 = arith.constant 0.000000e+00 : f32
    %222 = vector.broadcast %cst_98 : f32 to vector<16x64xf32>
    %223 = arith.maximumf %221, %222 : vector<16x64xf32>
    %c0_99 = arith.constant 0 : index
    %c0_100 = arith.constant 0 : index
    %c0_101 = arith.constant 0 : index
    %224 = vector.load %arg6[%c0_99, %c0_100, %c0_101] : memref<2x64x32xf32, #tpu.memory_space<vmem>>, vector<1x64x32xf32>
    %225 = vector.shape_cast %224 : vector<1x64x32xf32> to vector<64x32xf32>
    %cst_102 = arith.constant dense<0.000000e+00> : vector<16x32xf32>
    %226 = tpu.matmul %223, %225, %cst_102 {dimension_numbers = #tpu.dot_dimension_numbers<[1], [0], [0], [1], [0, 0, 1, 1], [], []>} : vector<16x64xf32>, vector<64x32xf32>, vector<16x32xf32> -> vector<16x32xf32>
    %c0_103 = arith.constant 0 : index
    %c0_104 = arith.constant 0 : index
    %c320 = arith.constant 320 : index
    %227 = vector.load %arg7[%c0_103, %c0_104, %c320] : memref<2x1x544xf32, #tpu.memory_space<vmem>>, vector<1x1x32xf32>
    %228 = vector.shape_cast %227 : vector<1x1x32xf32> to vector<1x32xf32>
    %229 = vector.broadcast %228 : vector<1x32xf32> to vector<16x32xf32>
    %230 = arith.addf %226, %229 : vector<16x32xf32>
    %231 = vector.shape_cast %230 : vector<16x32xf32> to vector<2x8x32xf32>
    %232 = arith.addf %179, %231 : vector<2x8x32xf32>
    %c1 = arith.constant 1 : index
    %c0_105 = arith.constant 0 : index
    %c352_106 = arith.constant 352 : index
    %233 = vector.load %arg7[%c1, %c0_105, %c352_106] : memref<2x1x544xf32, #tpu.memory_space<vmem>>, vector<1x1x32xf32>
    %234 = vector.shape_cast %233 : vector<1x1x32xf32> to vector<1x32xf32>
    %c1_107 = arith.constant 1 : index
    %c0_108 = arith.constant 0 : index
    %c384_109 = arith.constant 384 : index
    %235 = vector.load %arg7[%c1_107, %c0_108, %c384_109] : memref<2x1x544xf32, #tpu.memory_space<vmem>>, vector<1x1x32xf32>
    %236 = vector.shape_cast %235 : vector<1x1x32xf32> to vector<1x32xf32>
    %cst_110 = arith.constant dense<0.000000e+00> : vector<2x8xf32>
    %237 = vector.multi_reduction <add>, %232, %cst_110 [2] : vector<2x8x32xf32> to vector<2x8xf32>
    %238 = vector.shape_cast %237 : vector<2x8xf32> to vector<2x8x1xf32>
    %cst_111 = arith.constant 3.200000e+01 : f32
    %239 = vector.broadcast %cst_111 : f32 to vector<2x8x1xf32>
    %240 = arith.divf %238, %239 : vector<2x8x1xf32>
    %241 = vector.broadcast %240 : vector<2x8x1xf32> to vector<2x8x32xf32>
    %242 = arith.subf %232, %241 : vector<2x8x32xf32>
    %243 = arith.mulf %242, %242 : vector<2x8x32xf32>
    %cst_112 = arith.constant dense<0.000000e+00> : vector<2x8xf32>
    %244 = vector.multi_reduction <add>, %243, %cst_112 [2] : vector<2x8x32xf32> to vector<2x8xf32>
    %245 = vector.shape_cast %244 : vector<2x8xf32> to vector<2x8x1xf32>
    %cst_113 = arith.constant 3.200000e+01 : f32
    %246 = vector.broadcast %cst_113 : f32 to vector<2x8x1xf32>
    %247 = arith.divf %245, %246 : vector<2x8x1xf32>
    %248 = vector.broadcast %240 : vector<2x8x1xf32> to vector<2x8x32xf32>
    %249 = arith.subf %232, %248 : vector<2x8x32xf32>
    %cst_114 = arith.constant 9.99999974E-6 : f32
    %250 = vector.broadcast %cst_114 : f32 to vector<2x8x1xf32>
    %251 = arith.addf %247, %250 : vector<2x8x1xf32>
    %252 = math.rsqrt %251 : vector<2x8x1xf32>
    %253 = vector.broadcast %252 : vector<2x8x1xf32> to vector<2x8x32xf32>
    %254 = arith.mulf %249, %253 : vector<2x8x32xf32>
    %255 = vector.shape_cast %234 : vector<1x32xf32> to vector<1x1x32xf32>
    %256 = vector.broadcast %255 : vector<1x1x32xf32> to vector<2x8x32xf32>
    %257 = arith.mulf %254, %256 : vector<2x8x32xf32>
    %258 = vector.shape_cast %236 : vector<1x32xf32> to vector<1x1x32xf32>
    %259 = vector.broadcast %258 : vector<1x1x32xf32> to vector<2x8x32xf32>
    %260 = arith.addf %257, %259 : vector<2x8x32xf32>
    %261 = vector.shape_cast %260 : vector<2x8x32xf32> to vector<16x32xf32>
    %c1_115 = arith.constant 1 : index
    %c0_116 = arith.constant 0 : index
    %c0_117 = arith.constant 0 : index
    %262 = vector.load %arg5[%c1_115, %c0_116, %c0_117] : memref<2x32x320xf32, #tpu.memory_space<vmem>>, vector<1x32x96xf32>
    %263 = vector.shape_cast %262 : vector<1x32x96xf32> to vector<32x96xf32>
    %cst_118 = arith.constant dense<0.000000e+00> : vector<16x96xf32>
    %264 = tpu.matmul %261, %263, %cst_118 {dimension_numbers = #tpu.dot_dimension_numbers<[1], [0], [0], [1], [0, 0, 1, 1], [], []>} : vector<16x32xf32>, vector<32x96xf32>, vector<16x96xf32> -> vector<16x96xf32>
    %c1_119 = arith.constant 1 : index
    %c0_120 = arith.constant 0 : index
    %c0_121 = arith.constant 0 : index
    %265 = vector.load %arg7[%c1_119, %c0_120, %c0_121] : memref<2x1x544xf32, #tpu.memory_space<vmem>>, vector<1x1x96xf32>
    %266 = vector.shape_cast %265 : vector<1x1x96xf32> to vector<1x96xf32>
    %267 = vector.broadcast %266 : vector<1x96xf32> to vector<16x96xf32>
    %268 = arith.addf %264, %267 : vector<16x96xf32>
    %269 = vector.extract_strided_slice %268 {offsets = [0, 0], sizes = [16, 32], strides = [1, 1]} : vector<16x96xf32> to vector<16x32xf32>
    %270 = vector.extract_strided_slice %268 {offsets = [0, 32], sizes = [16, 32], strides = [1, 1]} : vector<16x96xf32> to vector<16x32xf32>
    %271 = vector.extract_strided_slice %268 {offsets = [0, 64], sizes = [16, 32], strides = [1, 1]} : vector<16x96xf32> to vector<16x32xf32>
    %272 = vector.shape_cast %269 : vector<16x32xf32> to vector<2x8x4x8xf32>
    %273 = tpu.transpose %272, [0, 2, 1, 3] : vector<2x8x4x8xf32> -> vector<2x4x8x8xf32>
    %274 = vector.shape_cast %273 : vector<2x4x8x8xf32> to vector<8x8x8xf32>
    %275 = vector.shape_cast %270 : vector<16x32xf32> to vector<2x8x4x8xf32>
    %276 = tpu.transpose %275, [0, 2, 1, 3] : vector<2x8x4x8xf32> -> vector<2x4x8x8xf32>
    %277 = vector.shape_cast %276 : vector<2x4x8x8xf32> to vector<8x8x8xf32>
    %278 = vector.shape_cast %271 : vector<16x32xf32> to vector<2x8x4x8xf32>
    %279 = tpu.transpose %278, [0, 2, 1, 3] : vector<2x8x4x8xf32> -> vector<2x4x8x8xf32>
    %280 = vector.shape_cast %279 : vector<2x4x8x8xf32> to vector<8x8x8xf32>
    "tpu.trace_start"() <{level = 10 : i32, message = "zqd,zkd->zqk"}> : () -> ()
    %cst_122 = arith.constant dense<0.000000e+00> : vector<8x8x8xf32>
    %281 = tpu.matmul %274, %277, %cst_122 {dimension_numbers = #tpu.dot_dimension_numbers<[2], [2], [1], [1], [0, 0, 0, 1, 1, 1], [0], [0]>} : vector<8x8x8xf32>, vector<8x8x8xf32>, vector<8x8x8xf32> -> vector<8x8x8xf32>
    "tpu.trace_stop"() : () -> ()
    %cst_123 = arith.constant dense<0xFF800000> : vector<8x8xf32>
    %282 = vector.multi_reduction <maximumf>, %281, %cst_123 [2] : vector<8x8x8xf32> to vector<8x8xf32>
    %283 = vector.shape_cast %282 : vector<8x8xf32> to vector<8x8x1xf32>
    %284 = vector.broadcast %283 : vector<8x8x1xf32> to vector<8x8x8xf32>
    %285 = arith.subf %281, %284 : vector<8x8x8xf32>
    %286 = math.exp %285 : vector<8x8x8xf32>
    %cst_124 = arith.constant dense<0.000000e+00> : vector<8x8xf32>
    %287 = vector.multi_reduction <add>, %286, %cst_124 [2] : vector<8x8x8xf32> to vector<8x8xf32>
    %288 = vector.shape_cast %287 : vector<8x8xf32> to vector<8x8x1xf32>
    %289 = tpu.reciprocal %288 {approx = true} : vector<8x8x1xf32> -> vector<8x8x1xf32>
    %290 = vector.broadcast %289 : vector<8x8x1xf32> to vector<8x8x8xf32>
    %291 = arith.mulf %286, %290 : vector<8x8x8xf32>
    "tpu.trace_start"() <{level = 10 : i32, message = "zqk,zkd->zqd"}> : () -> ()
    %cst_125 = arith.constant dense<0.000000e+00> : vector<8x8x8xf32>
    %292 = tpu.matmul %291, %280, %cst_125 {dimension_numbers = #tpu.dot_dimension_numbers<[2], [1], [1], [2], [0, 0, 0, 1, 1, 2], [0], [0]>} : vector<8x8x8xf32>, vector<8x8x8xf32>, vector<8x8x8xf32> -> vector<8x8x8xf32>
    "tpu.trace_stop"() : () -> ()
    %293 = vector.shape_cast %292 : vector<8x8x8xf32> to vector<2x4x8x8xf32>
    %294 = tpu.transpose %293, [0, 2, 1, 3] : vector<2x4x8x8xf32> -> vector<2x8x4x8xf32>
    %295 = vector.shape_cast %294 : vector<2x8x4x8xf32> to vector<16x32xf32>
    %c1_126 = arith.constant 1 : index
    %c0_127 = arith.constant 0 : index
    %c96_128 = arith.constant 96 : index
    %296 = vector.load %arg5[%c1_126, %c0_127, %c96_128] : memref<2x32x320xf32, #tpu.memory_space<vmem>>, vector<1x32x32xf32>
    %297 = vector.shape_cast %296 : vector<1x32x32xf32> to vector<32x32xf32>
    %cst_129 = arith.constant dense<0.000000e+00> : vector<16x32xf32>
    %298 = tpu.matmul %295, %297, %cst_129 {dimension_numbers = #tpu.dot_dimension_numbers<[1], [0], [0], [1], [0, 0, 1, 1], [], []>} : vector<16x32xf32>, vector<32x32xf32>, vector<16x32xf32> -> vector<16x32xf32>
    %c1_130 = arith.constant 1 : index
    %c0_131 = arith.constant 0 : index
    %c96_132 = arith.constant 96 : index
    %299 = vector.load %arg7[%c1_130, %c0_131, %c96_132] : memref<2x1x544xf32, #tpu.memory_space<vmem>>, vector<1x1x32xf32>
    %300 = vector.shape_cast %299 : vector<1x1x32xf32> to vector<1x32xf32>
    %301 = vector.broadcast %300 : vector<1x32xf32> to vector<16x32xf32>
    %302 = arith.addf %298, %301 : vector<16x32xf32>
    %303 = vector.shape_cast %302 : vector<16x32xf32> to vector<2x8x32xf32>
    %304 = arith.addf %232, %303 : vector<2x8x32xf32>
    %c1_133 = arith.constant 1 : index
    %c0_134 = arith.constant 0 : index
    %c416_135 = arith.constant 416 : index
    %305 = vector.load %arg7[%c1_133, %c0_134, %c416_135] : memref<2x1x544xf32, #tpu.memory_space<vmem>>, vector<1x1x32xf32>
    %306 = vector.shape_cast %305 : vector<1x1x32xf32> to vector<1x32xf32>
    %c1_136 = arith.constant 1 : index
    %c0_137 = arith.constant 0 : index
    %c448_138 = arith.constant 448 : index
    %307 = vector.load %arg7[%c1_136, %c0_137, %c448_138] : memref<2x1x544xf32, #tpu.memory_space<vmem>>, vector<1x1x32xf32>
    %308 = vector.shape_cast %307 : vector<1x1x32xf32> to vector<1x32xf32>
    %cst_139 = arith.constant dense<0.000000e+00> : vector<2x8xf32>
    %309 = vector.multi_reduction <add>, %304, %cst_139 [2] : vector<2x8x32xf32> to vector<2x8xf32>
    %310 = vector.shape_cast %309 : vector<2x8xf32> to vector<2x8x1xf32>
    %cst_140 = arith.constant 3.200000e+01 : f32
    %311 = vector.broadcast %cst_140 : f32 to vector<2x8x1xf32>
    %312 = arith.divf %310, %311 : vector<2x8x1xf32>
    %313 = vector.broadcast %312 : vector<2x8x1xf32> to vector<2x8x32xf32>
    %314 = arith.subf %304, %313 : vector<2x8x32xf32>
    %315 = arith.mulf %314, %314 : vector<2x8x32xf32>
    %cst_141 = arith.constant dense<0.000000e+00> : vector<2x8xf32>
    %316 = vector.multi_reduction <add>, %315, %cst_141 [2] : vector<2x8x32xf32> to vector<2x8xf32>
    %317 = vector.shape_cast %316 : vector<2x8xf32> to vector<2x8x1xf32>
    %cst_142 = arith.constant 3.200000e+01 : f32
    %318 = vector.broadcast %cst_142 : f32 to vector<2x8x1xf32>
    %319 = arith.divf %317, %318 : vector<2x8x1xf32>
    %320 = vector.broadcast %312 : vector<2x8x1xf32> to vector<2x8x32xf32>
    %321 = arith.subf %304, %320 : vector<2x8x32xf32>
    %cst_143 = arith.constant 9.99999974E-6 : f32
    %322 = vector.broadcast %cst_143 : f32 to vector<2x8x1xf32>
    %323 = arith.addf %319, %322 : vector<2x8x1xf32>
    %324 = math.rsqrt %323 : vector<2x8x1xf32>
    %325 = vector.broadcast %324 : vector<2x8x1xf32> to vector<2x8x32xf32>
    %326 = arith.mulf %321, %325 : vector<2x8x32xf32>
    %327 = vector.shape_cast %306 : vector<1x32xf32> to vector<1x1x32xf32>
    %328 = vector.broadcast %327 : vector<1x1x32xf32> to vector<2x8x32xf32>
    %329 = arith.mulf %326, %328 : vector<2x8x32xf32>
    %330 = vector.shape_cast %308 : vector<1x32xf32> to vector<1x1x32xf32>
    %331 = vector.broadcast %330 : vector<1x1x32xf32> to vector<2x8x32xf32>
    %332 = arith.addf %329, %331 : vector<2x8x32xf32>
    %333 = vector.shape_cast %332 : vector<2x8x32xf32> to vector<16x32xf32>
    %c1_144 = arith.constant 1 : index
    %c0_145 = arith.constant 0 : index
    %c256_146 = arith.constant 256 : index
    %334 = vector.load %arg5[%c1_144, %c0_145, %c256_146] : memref<2x32x320xf32, #tpu.memory_space<vmem>>, vector<1x32x32xf32>
    %335 = vector.shape_cast %334 : vector<1x32x32xf32> to vector<32x32xf32>
    %cst_147 = arith.constant dense<0.000000e+00> : vector<16x32xf32>
    %336 = tpu.matmul %333, %335, %cst_147 {dimension_numbers = #tpu.dot_dimension_numbers<[1], [0], [0], [1], [0, 0, 1, 1], [], []>} : vector<16x32xf32>, vector<32x32xf32>, vector<16x32xf32> -> vector<16x32xf32>
    %c1_148 = arith.constant 1 : index
    %c0_149 = arith.constant 0 : index
    %c256_150 = arith.constant 256 : index
    %337 = vector.load %arg7[%c1_148, %c0_149, %c256_150] : memref<2x1x544xf32, #tpu.memory_space<vmem>>, vector<1x1x32xf32>
    %338 = vector.shape_cast %337 : vector<1x1x32xf32> to vector<1x32xf32>
    %339 = vector.broadcast %338 : vector<1x32xf32> to vector<16x32xf32>
    %340 = arith.addf %336, %339 : vector<16x32xf32>
    %c1_151 = arith.constant 1 : index
    %c0_152 = arith.constant 0 : index
    %c128_153 = arith.constant 128 : index
    %341 = vector.load %arg5[%c1_151, %c0_152, %c128_153] : memref<2x32x320xf32, #tpu.memory_space<vmem>>, vector<1x32x64xf32>
    %342 = vector.shape_cast %341 : vector<1x32x64xf32> to vector<32x64xf32>
    %cst_154 = arith.constant dense<0.000000e+00> : vector<32x64xf32>
    %343 = tpu.matmul %20, %342, %cst_154 {dimension_numbers = #tpu.dot_dimension_numbers<[1], [0], [0], [1], [0, 0, 1, 1], [], []>} : vector<32x32xf32>, vector<32x64xf32>, vector<32x64xf32> -> vector<32x64xf32>
    %c1_155 = arith.constant 1 : index
    %c0_156 = arith.constant 0 : index
    %c128_157 = arith.constant 128 : index
    %344 = vector.load %arg7[%c1_155, %c0_156, %c128_157] : memref<2x1x544xf32, #tpu.memory_space<vmem>>, vector<1x1x64xf32>
    %345 = vector.shape_cast %344 : vector<1x1x64xf32> to vector<1x64xf32>
    %346 = vector.broadcast %345 : vector<1x64xf32> to vector<32x64xf32>
    %347 = arith.addf %343, %346 : vector<32x64xf32>
    %348 = vector.extract_strided_slice %347 {offsets = [0, 0], sizes = [32, 32], strides = [1, 1]} : vector<32x64xf32> to vector<32x32xf32>
    %349 = vector.extract_strided_slice %347 {offsets = [0, 32], sizes = [32, 32], strides = [1, 1]} : vector<32x64xf32> to vector<32x32xf32>
    %350 = vector.shape_cast %340 : vector<16x32xf32> to vector<2x8x4x8xf32>
    %351 = tpu.transpose %350, [0, 2, 1, 3] : vector<2x8x4x8xf32> -> vector<2x4x8x8xf32>
    %352 = vector.shape_cast %351 : vector<2x4x8x8xf32> to vector<8x8x8xf32>
    %353 = vector.shape_cast %348 : vector<32x32xf32> to vector<2x16x4x8xf32>
    %354 = tpu.transpose %353, [0, 2, 1, 3] : vector<2x16x4x8xf32> -> vector<2x4x16x8xf32>
    %355 = vector.shape_cast %354 : vector<2x4x16x8xf32> to vector<8x16x8xf32>
    %356 = vector.shape_cast %349 : vector<32x32xf32> to vector<2x16x4x8xf32>
    %357 = tpu.transpose %356, [0, 2, 1, 3] : vector<2x16x4x8xf32> -> vector<2x4x16x8xf32>
    %358 = vector.shape_cast %357 : vector<2x4x16x8xf32> to vector<8x16x8xf32>
    "tpu.trace_start"() <{level = 10 : i32, message = "zqd,zkd->zqk"}> : () -> ()
    %cst_158 = arith.constant dense<0.000000e+00> : vector<8x8x16xf32>
    %359 = tpu.matmul %352, %355, %cst_158 {dimension_numbers = #tpu.dot_dimension_numbers<[2], [2], [1], [1], [0, 0, 0, 1, 1, 1], [0], [0]>} : vector<8x8x8xf32>, vector<8x16x8xf32>, vector<8x8x16xf32> -> vector<8x8x16xf32>
    "tpu.trace_stop"() : () -> ()
    %cst_159 = arith.constant dense<0xFF800000> : vector<8x8xf32>
    %360 = vector.multi_reduction <maximumf>, %359, %cst_159 [2] : vector<8x8x16xf32> to vector<8x8xf32>
    %361 = vector.shape_cast %360 : vector<8x8xf32> to vector<8x8x1xf32>
    %362 = vector.broadcast %361 : vector<8x8x1xf32> to vector<8x8x16xf32>
    %363 = arith.subf %359, %362 : vector<8x8x16xf32>
    %364 = math.exp %363 : vector<8x8x16xf32>
    %cst_160 = arith.constant dense<0.000000e+00> : vector<8x8xf32>
    %365 = vector.multi_reduction <add>, %364, %cst_160 [2] : vector<8x8x16xf32> to vector<8x8xf32>
    %366 = vector.shape_cast %365 : vector<8x8xf32> to vector<8x8x1xf32>
    %367 = vector.broadcast %366 : vector<8x8x1xf32> to vector<8x8x16xf32>
    %368 = arith.divf %364, %367 : vector<8x8x16xf32>
    "tpu.trace_start"() <{level = 10 : i32, message = "zqk,zkd->zqd"}> : () -> ()
    %cst_161 = arith.constant dense<0.000000e+00> : vector<8x8x8xf32>
    %369 = tpu.matmul %368, %358, %cst_161 {dimension_numbers = #tpu.dot_dimension_numbers<[2], [1], [1], [2], [0, 0, 0, 1, 1, 2], [0], [0]>} : vector<8x8x16xf32>, vector<8x16x8xf32>, vector<8x8x8xf32> -> vector<8x8x8xf32>
    "tpu.trace_stop"() : () -> ()
    %370 = vector.shape_cast %369 : vector<8x8x8xf32> to vector<2x4x8x8xf32>
    %371 = tpu.transpose %370, [0, 2, 1, 3] : vector<2x4x8x8xf32> -> vector<2x8x4x8xf32>
    %372 = vector.shape_cast %371 : vector<2x8x4x8xf32> to vector<16x32xf32>
    %c1_162 = arith.constant 1 : index
    %c0_163 = arith.constant 0 : index
    %c288_164 = arith.constant 288 : index
    %373 = vector.load %arg5[%c1_162, %c0_163, %c288_164] : memref<2x32x320xf32, #tpu.memory_space<vmem>>, vector<1x32x32xf32>
    %374 = vector.shape_cast %373 : vector<1x32x32xf32> to vector<32x32xf32>
    %cst_165 = arith.constant dense<0.000000e+00> : vector<16x32xf32>
    %375 = tpu.matmul %372, %374, %cst_165 {dimension_numbers = #tpu.dot_dimension_numbers<[1], [0], [0], [1], [0, 0, 1, 1], [], []>} : vector<16x32xf32>, vector<32x32xf32>, vector<16x32xf32> -> vector<16x32xf32>
    %c1_166 = arith.constant 1 : index
    %c0_167 = arith.constant 0 : index
    %c288_168 = arith.constant 288 : index
    %376 = vector.load %arg7[%c1_166, %c0_167, %c288_168] : memref<2x1x544xf32, #tpu.memory_space<vmem>>, vector<1x1x32xf32>
    %377 = vector.shape_cast %376 : vector<1x1x32xf32> to vector<1x32xf32>
    %378 = vector.broadcast %377 : vector<1x32xf32> to vector<16x32xf32>
    %379 = arith.addf %375, %378 : vector<16x32xf32>
    %380 = vector.shape_cast %379 : vector<16x32xf32> to vector<2x8x32xf32>
    %381 = arith.addf %304, %380 : vector<2x8x32xf32>
    %382 = vector.shape_cast %368 : vector<8x8x16xf32> to vector<2x4x8x16xf32>
    %cst_169 = arith.constant dense<0.000000e+00> : vector<2x8x16xf32>
    %383 = vector.multi_reduction <add>, %382, %cst_169 [1] : vector<2x4x8x16xf32> to vector<2x8x16xf32>
    %cst_170 = arith.constant 4.000000e+00 : f32
    %384 = vector.broadcast %cst_170 : f32 to vector<2x8x16xf32>
    %385 = arith.divf %383, %384 : vector<2x8x16xf32>
    %386 = tpu.concatenate %385, %30 in 2 : vector<2x8x16xf32>, vector<2x8x112xf32> -> vector<2x8x128xf32>
    %c0_171 = arith.constant 0 : index
    %c8 = arith.constant 8 : index
    %c0_172 = arith.constant 0 : index
    %387 = vector.load %arg8[%c0_171, %c8, %c0_172] : memref<2x24x128xf32, #tpu.memory_space<vmem>>, vector<2x8x128xf32>
    tpu.vector_store %arg8[%c0_171, %c8, %c0_172], %386 {strides = array<i32>} : memref<2x24x128xf32, #tpu.memory_space<vmem>>, vector<2x8x128xf32>,
    %c1_173 = arith.constant 1 : index
    %c0_174 = arith.constant 0 : index
    %c480_175 = arith.constant 480 : index
    %388 = vector.load %arg7[%c1_173, %c0_174, %c480_175] : memref<2x1x544xf32, #tpu.memory_space<vmem>>, vector<1x1x32xf32>
    %389 = vector.shape_cast %388 : vector<1x1x32xf32> to vector<1x32xf32>
    %c1_176 = arith.constant 1 : index
    %c0_177 = arith.constant 0 : index
    %c512_178 = arith.constant 512 : index
    %390 = vector.load %arg7[%c1_176, %c0_177, %c512_178] : memref<2x1x544xf32, #tpu.memory_space<vmem>>, vector<1x1x32xf32>
    %391 = vector.shape_cast %390 : vector<1x1x32xf32> to vector<1x32xf32>
    %cst_179 = arith.constant dense<0.000000e+00> : vector<2x8xf32>
    %392 = vector.multi_reduction <add>, %381, %cst_179 [2] : vector<2x8x32xf32> to vector<2x8xf32>
    %393 = vector.shape_cast %392 : vector<2x8xf32> to vector<2x8x1xf32>
    %cst_180 = arith.constant 3.200000e+01 : f32
    %394 = vector.broadcast %cst_180 : f32 to vector<2x8x1xf32>
    %395 = arith.divf %393, %394 : vector<2x8x1xf32>
    %396 = vector.broadcast %395 : vector<2x8x1xf32> to vector<2x8x32xf32>
    %397 = arith.subf %381, %396 : vector<2x8x32xf32>
    %398 = arith.mulf %397, %397 : vector<2x8x32xf32>
    %cst_181 = arith.constant dense<0.000000e+00> : vector<2x8xf32>
    %399 = vector.multi_reduction <add>, %398, %cst_181 [2] : vector<2x8x32xf32> to vector<2x8xf32>
    %400 = vector.shape_cast %399 : vector<2x8xf32> to vector<2x8x1xf32>
    %cst_182 = arith.constant 3.200000e+01 : f32
    %401 = vector.broadcast %cst_182 : f32 to vector<2x8x1xf32>
    %402 = arith.divf %400, %401 : vector<2x8x1xf32>
    %403 = vector.broadcast %395 : vector<2x8x1xf32> to vector<2x8x32xf32>
    %404 = arith.subf %381, %403 : vector<2x8x32xf32>
    %cst_183 = arith.constant 9.99999974E-6 : f32
    %405 = vector.broadcast %cst_183 : f32 to vector<2x8x1xf32>
    %406 = arith.addf %402, %405 : vector<2x8x1xf32>
    %407 = math.rsqrt %406 : vector<2x8x1xf32>
    %408 = vector.broadcast %407 : vector<2x8x1xf32> to vector<2x8x32xf32>
    %409 = arith.mulf %404, %408 : vector<2x8x32xf32>
    %410 = vector.shape_cast %389 : vector<1x32xf32> to vector<1x1x32xf32>
    %411 = vector.broadcast %410 : vector<1x1x32xf32> to vector<2x8x32xf32>
    %412 = arith.mulf %409, %411 : vector<2x8x32xf32>
    %413 = vector.shape_cast %391 : vector<1x32xf32> to vector<1x1x32xf32>
    %414 = vector.broadcast %413 : vector<1x1x32xf32> to vector<2x8x32xf32>
    %415 = arith.addf %412, %414 : vector<2x8x32xf32>
    %416 = vector.shape_cast %415 : vector<2x8x32xf32> to vector<16x32xf32>
    %c1_184 = arith.constant 1 : index
    %c0_185 = arith.constant 0 : index
    %c192_186 = arith.constant 192 : index
    %417 = vector.load %arg5[%c1_184, %c0_185, %c192_186] : memref<2x32x320xf32, #tpu.memory_space<vmem>>, vector<1x32x64xf32>
    %418 = vector.shape_cast %417 : vector<1x32x64xf32> to vector<32x64xf32>
    %cst_187 = arith.constant dense<0.000000e+00> : vector<16x64xf32>
    %419 = tpu.matmul %416, %418, %cst_187 {dimension_numbers = #tpu.dot_dimension_numbers<[1], [0], [0], [1], [0, 0, 1, 1], [], []>} : vector<16x32xf32>, vector<32x64xf32>, vector<16x64xf32> -> vector<16x64xf32>
    %c1_188 = arith.constant 1 : index
    %c0_189 = arith.constant 0 : index
    %c192_190 = arith.constant 192 : index
    %420 = vector.load %arg7[%c1_188, %c0_189, %c192_190] : memref<2x1x544xf32, #tpu.memory_space<vmem>>, vector<1x1x64xf32>
    %421 = vector.shape_cast %420 : vector<1x1x64xf32> to vector<1x64xf32>
    %422 = vector.broadcast %421 : vector<1x64xf32> to vector<16x64xf32>
    %423 = arith.addf %419, %422 : vector<16x64xf32>
    %cst_191 = arith.constant 0.000000e+00 : f32
    %424 = vector.broadcast %cst_191 : f32 to vector<16x64xf32>
    %425 = arith.maximumf %423, %424 : vector<16x64xf32>
    %c1_192 = arith.constant 1 : index
    %c0_193 = arith.constant 0 : index
    %c0_194 = arith.constant 0 : index
    %426 = vector.load %arg6[%c1_192, %c0_193, %c0_194] : memref<2x64x32xf32, #tpu.memory_space<vmem>>, vector<1x64x32xf32>
    %427 = vector.shape_cast %426 : vector<1x64x32xf32> to vector<64x32xf32>
    %cst_195 = arith.constant dense<0.000000e+00> : vector<16x32xf32>
    %428 = tpu.matmul %425, %427, %cst_195 {dimension_numbers = #tpu.dot_dimension_numbers<[1], [0], [0], [1], [0, 0, 1, 1], [], []>} : vector<16x64xf32>, vector<64x32xf32>, vector<16x32xf32> -> vector<16x32xf32>
    %c1_196 = arith.constant 1 : index
    %c0_197 = arith.constant 0 : index
    %c320_198 = arith.constant 320 : index
    %429 = vector.load %arg7[%c1_196, %c0_197, %c320_198] : memref<2x1x544xf32, #tpu.memory_space<vmem>>, vector<1x1x32xf32>
    %430 = vector.shape_cast %429 : vector<1x1x32xf32> to vector<1x32xf32>
    %431 = vector.broadcast %430 : vector<1x32xf32> to vector<16x32xf32>
    %432 = arith.addf %428, %431 : vector<16x32xf32>
    %433 = vector.shape_cast %432 : vector<16x32xf32> to vector<2x8x32xf32>
    %434 = arith.addf %381, %433 : vector<2x8x32xf32>
    %c0_199 = arith.constant 0 : index
    %c256_200 = arith.constant 256 : index
    %435 = vector.load %arg3[%c0_199, %c256_200] : memref<1x320xf32, #tpu.memory_space<vmem>>, vector<1x32xf32>
    %c0_201 = arith.constant 0 : index
    %c288_202 = arith.constant 288 : index
    %436 = vector.load %arg3[%c0_201, %c288_202] : memref<1x320xf32, #tpu.memory_space<vmem>>, vector<1x32xf32>
    %cst_203 = arith.constant dense<0.000000e+00> : vector<2x8xf32>
    %437 = vector.multi_reduction <add>, %434, %cst_203 [2] : vector<2x8x32xf32> to vector<2x8xf32>
    %438 = vector.shape_cast %437 : vector<2x8xf32> to vector<2x8x1xf32>
    %cst_204 = arith.constant 3.200000e+01 : f32
    %439 = vector.broadcast %cst_204 : f32 to vector<2x8x1xf32>
    %440 = arith.divf %438, %439 : vector<2x8x1xf32>
    %441 = vector.broadcast %440 : vector<2x8x1xf32> to vector<2x8x32xf32>
    %442 = arith.subf %434, %441 : vector<2x8x32xf32>
    %443 = arith.mulf %442, %442 : vector<2x8x32xf32>
    %cst_205 = arith.constant dense<0.000000e+00> : vector<2x8xf32>
    %444 = vector.multi_reduction <add>, %443, %cst_205 [2] : vector<2x8x32xf32> to vector<2x8xf32>
    %445 = vector.shape_cast %444 : vector<2x8xf32> to vector<2x8x1xf32>
    %cst_206 = arith.constant 3.200000e+01 : f32
    %446 = vector.broadcast %cst_206 : f32 to vector<2x8x1xf32>
    %447 = arith.divf %445, %446 : vector<2x8x1xf32>
    %448 = vector.broadcast %440 : vector<2x8x1xf32> to vector<2x8x32xf32>
    %449 = arith.subf %434, %448 : vector<2x8x32xf32>
    %cst_207 = arith.constant 9.99999974E-6 : f32
    %450 = vector.broadcast %cst_207 : f32 to vector<2x8x1xf32>
    %451 = arith.addf %447, %450 : vector<2x8x1xf32>
    %452 = math.rsqrt %451 : vector<2x8x1xf32>
    %453 = vector.broadcast %452 : vector<2x8x1xf32> to vector<2x8x32xf32>
    %454 = arith.mulf %449, %453 : vector<2x8x32xf32>
    %455 = vector.shape_cast %435 : vector<1x32xf32> to vector<1x1x32xf32>
    %456 = vector.broadcast %455 : vector<1x1x32xf32> to vector<2x8x32xf32>
    %457 = arith.mulf %454, %456 : vector<2x8x32xf32>
    %458 = vector.shape_cast %436 : vector<1x32xf32> to vector<1x1x32xf32>
    %459 = vector.broadcast %458 : vector<1x1x32xf32> to vector<2x8x32xf32>
    %460 = arith.addf %457, %459 : vector<2x8x32xf32>
    %461 = vector.shape_cast %460 : vector<2x8x32xf32> to vector<16x32xf32>
    %c0_208 = arith.constant 0 : index
    %c0_209 = arith.constant 0 : index
    %462 = vector.load %arg4[%c0_208, %c0_209] : memref<32x128xf32, #tpu.memory_space<vmem>>, vector<32x128xf32>
    %cst_210 = arith.constant dense<0.000000e+00> : vector<16x128xf32>
    %463 = tpu.matmul %461, %462, %cst_210 {dimension_numbers = #tpu.dot_dimension_numbers<[1], [0], [0], [1], [0, 0, 1, 1], [], []>} : vector<16x32xf32>, vector<32x128xf32>, vector<16x128xf32> -> vector<16x128xf32>
    %c0_211 = arith.constant 0 : index
    %c0_212 = arith.constant 0 : index
    %464 = vector.load %arg3[%c0_211, %c0_212] : memref<1x320xf32, #tpu.memory_space<vmem>>, vector<1x128xf32>
    %465 = vector.broadcast %464 : vector<1x128xf32> to vector<16x128xf32>
    %466 = arith.addf %463, %465 : vector<16x128xf32>
    %467 = vector.shape_cast %466 : vector<16x128xf32> to vector<2x8x128xf32>
    %c0_213 = arith.constant 0 : index
    %c16 = arith.constant 16 : index
    %c0_214 = arith.constant 0 : index
    %468 = vector.load %arg8[%c0_213, %c16, %c0_214] : memref<2x24x128xf32, #tpu.memory_space<vmem>>, vector<2x8x128xf32>
    tpu.vector_store %arg8[%c0_213, %c16, %c0_214], %467 {strides = array<i32>} : memref<2x24x128xf32, #tpu.memory_space<vmem>>, vector<2x8x128xf32>,
    return
  }
}

</mosaic_0001>

<bundles_post_ra>
// kernel: medklip_forward.1
= control target key start
LH: loop header
LB: loop body
LE: loop exit
PB: predicated region body
PF: predicated region fallthrough
CT: control target
= control target key end

     0   :  { %vm46_vm0 = vcmask 392192   ;;  %s15190_s21 = smov 32   ;;  %v15191_v18 = vmov 0.0|0.0   ;;  %vm15192_vm1 = vmmov 0   ;;  %v15193_v27 = vmov 0.0   ;;  %s15194_s18 = smov 96   ;;  %s17655_s2 = inlined_call_operand.vmem [shape: f32[208,32], index: 2, kind: input, shape index: {}]   ;;  %s17656_s0 = inlined_call_operand.vmem [shape: f32[2,16,48], index: 0, kind: input, shape index: {}]   ;;  %s17657_s3 = inlined_call_operand.vmem [shape: f32[1,320], index: 3, kind: input, shape index: {}]   ;;  %s17658_s1 = inlined_call_operand.vmem [shape: f32[8,96], index: 1, kind: input, shape index: {}]   ;;  %s17659_s7 = inlined_call_operand.vmem [shape: f32[2,1,544], index: 7, kind: input, shape index: {}]   ;;  %s17660_s5 = inlined_call_operand.vmem [shape: f32[2,32,320], index: 5, kind: input, shape index: {}]   ;;  %s17661_s8 = inlined_call_operand.vmem [shape: f32[2,24,128], index: 8, kind: output, shape index: {}]   ;;  %s17662_s6 = inlined_call_operand.vmem [shape: f32[2,64,32], index: 6, kind: input, shape index: {}]   ;;  %s17663_s4 = inlined_call_operand.vmem [shape: f32[32,128], index: 4, kind: input, shape index: {}]  }
   0x1   :  { %v33_v0 = vld [vmem:[%s17655_s2] sm:$0xff]  ;;  %v34_v1 = vld [vmem:[%s17655_s2 + $0x8] sm:$0xff]  ;;  %v35_v2 = vld [vmem:[%s17655_s2 + $0x10] sm:$0xff]  ;;  %vm377_vm2 = vcmask 785408   ;;  %vm155_vm3 = vcmask 261120   ;;  %s15195_s17 = smov 120  }
   0x2   :  { %v14667_v3 = vpack.c.bf16 %v34_v1, %v33_v0  ;;  %v36_v4 = vld [vmem:[%s17655_s2 + $0x18] sm:$0xff]  ;;  %v37_v6 = vld [vmem:[%s17655_s2 + $0x20] sm:$0xff]  ;;  %v38_v7 = vld [vmem:[%s17655_s2 + $0x28] sm:$0xff]  ;;  %s15197_s19 = smov 104   ;;  %s15198_s20 = smov 64   ;;  %vm1456_vm4 = vcmask 64512  }
   0x3   :  { %v14671_v5 = vpack.c.bf16 %v36_v4, %v35_v2  ;;  %v29_v8 = vld [vmem:[%s17656_s0] sm:$0xff]  ;;  %v14675_v9 = vpack.c.bf16 %v38_v7, %v37_v6  ;;  %v148_v11 = vld [vmem:[%s17655_s2 + $0x30] sm:$0xff]  ;;  %v149_v12 = vld [vmem:[%s17655_s2 + $0x38] sm:$0xff]  ;;  %s15201_s25 = smov 8   ;;  %s15202_s26 = smov 16   ;;  %vm3035_vm5 = vcmask 130048  }
   0x4   :  { %14668 = vmatprep.subr.bf16.mxu0 %v14667_v3  ;;  %14035 = vmatprep.mubr.msk.f32.mxu0 %vm46_vm0, %v29_v8  ;;  %v15274_v10 = vld [vmem:[%s17657_s3 + $0x1] ss:$0 sm:$0xff]  ;;  %v362_v13 = vld [vmem:[%s17655_s2 + $0x70] sm:$0xff]  ;;  %v363_v14 = vld [vmem:[%s17655_s2 + $0x78] sm:$0xff]  ;;  %v14679_v15 = vpack.c.bf16 %v149_v12, %v148_v11  ;;  %s15203_s27 = smov 24   ;;  %vm3038_vm6 = vcmask 195584  }
   0x5   :  { %14670 = vmatpush3.bf16.msra.mxu0 %v14667_v3  ;;  %374 = vrot.lane.b32.xlu0 %v15274_v10, %s15190_s21  ;;  %v30_v16 = vld [vmem:[%s17656_s0 + $0x8] sm:$0xff]  ;;  %v14696_v17 = vpack.c.bf16 %v363_v14, %v362_v13  ;;  %v364_v19 = vld [vmem:[%s17655_s2 + $0x80] sm:$0xff]  ;;  %v31_v21 = vld [vmem:[%s17656_s0 + $0x10] sm:$0xff]  ;;  %vm6777_vm8 = vcmask 523264  }
   0x6   :  { %14672 = vmatprep.subr.bf16.mxu0 %v14671_v5  ;;  %14680 = vmatprep.subr.bf16.mxu1 %v14679_v15  ;;  %v365_v20 = vld [vmem:[%s17655_s2 + $0x88] sm:$0xff]  ;;  %v32_v23 = vld [vmem:[%s17656_s0 + $0x18] sm:$0xff]  ;;  %v366_v24 = vld [vmem:[%s17655_s2 + $0x90] sm:$0xff] }
   0x7   :  { %14682 = vmatpush3.bf16.msra.mxu1 %v14679_v15  ;;  %v14699_v22 = vpack.c.bf16 %v365_v20, %v364_v19  ;;  %v367_v25 = vld [vmem:[%s17655_s2 + $0x98] sm:$0xff]  ;;  %v368_v28 = vld [vmem:[%s17655_s2 + $0xa0] sm:$0xff]  ;;  %v369_v29 = vld [vmem:[%s17655_s2 + $0xa8] sm:$0xff]  ;;  %152 = vrot.lane.b32.xlu1 %v15274_v10, %s15194_s18 }
   0x8   :  { %v14702_v26 = vpack.c.bf16 %v367_v25, %v366_v24  ;;  %v14705_v30 = vpack.c.bf16 %v369_v29, %v368_v28  ;;  %v370_v31 = vld [vmem:[%s17655_s2 + $0xb0] sm:$0xff]  ;;  %v371_v32 = vld [vmem:[%s17655_s2 + $0xb8] sm:$0xff]  ;;  %v372_v34 = vld [vmem:[%s17655_s2 + $0xc0] sm:$0xff] }
   0x9   :  { %14674 = vmatpush3.bf16.msra.mxu0 %v14671_v5  ;;  %v14708_v33 = vpack.c.bf16 %v371_v32, %v370_v31  ;;  %v373_v35 = vld [vmem:[%s17655_s2 + $0xc8] sm:$0xff]  ;;  %v361_v37 = vld [vmem:[%s17658_s1] sm:$0xff]  ;;  %v257_v58 = vld [vmem:[%s17655_s2 + $0x50] sm:$0xff]  ;;  %s15196_s1 = smov 112  }
   0xa   :  { %14676 = vmatprep.subr.bf16.mxu0 %v14675_v9  ;;  %v14711_v36 = vpack.c.bf16 %v373_v35, %v372_v34  ;;  %v150_v38 = vld [vmem:[%s17655_s2 + $0x40] sm:$0xff]  ;;  %v151_v39 = vld [vmem:[%s17655_s2 + $0x48] sm:$0xff]  ;;  %v258_v59 = vld [vmem:[%s17655_s2 + $0x58] sm:$0xff] }
   0xb   :  { %v14683_v40 = vpack.c.bf16 %v151_v39, %v150_v38  ;;  %v14687_v60 = vpack.c.bf16 %v258_v59, %v257_v58  ;;  %v259_v61 = vld [vmem:[%s17655_s2 + $0x60] sm:$0xff]  ;;  %v260_v62 = vld [vmem:[%s17655_s2 + $0x68] sm:$0xff]  ;;  %v15392_v7 = vld [vmem:[%s17660_s5 + $0x18] sm:$0xff] }
   0xc   :  { %v14691_v63 = vpack.c.bf16 %v260_v62, %v259_v61  ;;  %v13426_v5 = vld [vmem:[%s17659_s7 + $0x2] ss:$0 sm:$0xff]  ;;  %v485_v14 = vld [vmem:[%s17660_s5 + $0x30] sm:$0xff]  ;;  %v486_v15 = vld [vmem:[%s17660_s5 + $0x48] sm:$0xff] }
   0xd   :  { %14678 = vmatpush3.bf16.msra.mxu0 %v14675_v9  ;;  %14684 = vmatprep.subr.bf16.mxu1 %v14683_v40  ;;  %v15387_v6 = vld [vmem:[%s17660_s5] sm:$0xff]  ;;  %vm15966_vm7 = vmpackc.low %vm1456_vm4, %vm1456_vm4 }
   0xe   :  { %14695 = vmatprep.subr.bf16.mxu0 %v15191_v18  ;;  %14686 = vmatpush3.bf16.msra.mxu1 %v14683_v40  ;;  %v14713_v8 = vpack.c.bf16 %v15392_v7, %v15387_v6  ;;  %v13428_v40 = vld [vmem:[%s17659_s7] ss:$0 sm:$0xff] }
   0xf   :  { %14688 = vmatprep.subr.bf16.mxu1 %v14687_v60 }
  0x10   :  { %14036 = vmatmul.mubr.msk.f32.vlgmr.msra.gmra.mrb[0].mxu0 %vm46_vm0, %v30_v16 }
  0x11   :  { %14697 = vmatpush3.bf16.msra.mxu0 %v14696_v17  ;;  %14038 = vmatprep.mubr.msk.f32.mxu0 %vm46_vm0, %v31_v21 }
  0x12   :  { %14698 = vmatprep.subr.bf16.mxu0 %v15191_v18 }
  0x14   :  { %14039 = vmatmul.mubr.msk.f32.gmra.mrb[2].mxu0 %vm46_vm0, %v32_v23 }
  0x15   :  { %14700 = vmatpush3.bf16.msra.mxu0 %v14699_v22  ;;  %14093 = vmatprep.mubr.msk.f32.mxu0 %vm15192_vm1, %v15193_v27  ;;  %v14717_v22 = vpack.c.bf16 %v486_v15, %v485_v14 }
  0x16   :  { %14701 = vmatprep.subr.bf16.mxu0 %v15191_v18 }
  0x19   :  { %14703 = vmatpush3.bf16.msra.mxu0 %v14702_v26 }
  0x1a   :  { %14704 = vmatprep.subr.bf16.mxu0 %v15191_v18 }
  0x1d   :  { %14706 = vmatpush3.bf16.msra.mxu0 %v14705_v30 }
  0x1e   :  { %14707 = vmatprep.subr.bf16.mxu0 %v15191_v18 }
  0x21   :  { %14709 = vmatpush3.bf16.msra.mxu0 %v14708_v33  ;;  %v13427_v33 = vld [vmem:[%s17659_s7 + $0x3] ss:$0 sm:$0xff] }
  0x22   :  { %14710 = vmatprep.subr.bf16.mxu0 %v15191_v18 }
  0x25   :  { %14712 = vmatpush3.bf16.msra.mxu0 %v14711_v36 }
  0x26   :  { %14122 = vmatprep.subr.mxu0 %v15193_v27 }
  0x28   :  { %14094 = vmatmul.mubr.msk.f32.vlgmr.msra.gmra.mrb[4].mxu0 %vm377_vm2, %v361_v37 }
  0x29   :  { %14124 = vmatprep.mubr.msk.f32.mxu0 %vm15192_vm1, %v15193_v27 }
  0x77   :  { %v375_v53 = vpop.permute.xlu0 %374 }
  0x79   :  { %v153_v9 = vpop.permute.xlu1 %152 }
  0xe3   :  { %v14037_v41 = vpop.f32.mrb[0].mxu0 }
  0xe4   :  { %v131_v42 = vadd.f32 %v14037_v41, %v15274_v10  ;;  %v125_v43 = vpop.f32.mrb[1].mxu0 }
  0xe5   :  { %v126_v44 = vadd.f32 %v15274_v10, %v125_v43 }
  0xe6   :  { %v145_v45 = vmax.f32 %v131_v42, 0.0 }
  0xe7   :  { %v144_v46 = vmax.f32 %v126_v44, 0.0  ;;  %v14040_v47 = vpop.f32.mrb[2].mxu0 }
  0xe8   :  { %v141_v48 = vadd.f32 %v14040_v47, %v15274_v10  ;;  %v135_v49 = vpop.f32.mrb[3].mxu0 }
  0xe9   :  { %14049 = vmatprep.mubr.msk.f32.mxu1 %vm155_vm3, %v144_v46  ;;  %v136_v50 = vadd.f32 %v15274_v10, %v135_v49 }
  0xea   :  { %14050 = vmatmul.mubr.msk.f32.vlgmr.msra.gmra.mrb[0].mxu1 %vm155_vm3, %v145_v45  ;;  %v147_v51 = vmax.f32 %v141_v48, 0.0 }
  0xeb   :  { %v146_v52 = vmax.f32 %v136_v50, 0.0  ;;  %14690 = vmatpush3.bf16.msra.mxu1 %v14687_v60 }
  0xec   :  { %14692 = vmatprep.subr.bf16.mxu1 %v14691_v63 }
  0xed   :  { %14052 = vmatprep.mubr.msk.f32.mxu1 %vm155_vm3, %v146_v52 }
  0xee   :  { %14053 = vmatmul.mubr.msk.f32.gmra.mrb[2].mxu1 %vm155_vm3, %v147_v51  ;;  %v15199_v51 = vmov 1983009808  }
  0xef   :  { %14694 = vmatpush3.bf16.msra.mxu1 %v14691_v63  ;;  %v595_v52 = vunpack.c.l.s4 %v15199_v51 }
  0xf0   :  { %14714 = vmatprep.subr.bf16.mxu1 %v14713_v8 }
  0xfb   :  { %v447_v54 = vpop.f32.mrb[4].mxu0 }
  0xfc   :  { %v15362_v55 = vadd.f32 %v447_v54, %v375_v53  ;;  %v14095_v56 = vpop.f32.mrb[5].mxu0  ;;  %v597_v53 = vlaneseq  ;;  %v596_v54 = vunpack.c.0.s8 %v595_v52 }
  0xfe   :  { %v453_v57 = vsel %vm155_vm3, %v15362_v55, 0.0  ;;  %v598_v56 = vshrl.u32 %v597_v53, 7 }
  0xff   :  { %454 = vadd.xlane.f32.xlu0 %v453_v57  ;;  %v15200_v57 = vmov 1934713408  }
 0x100   :  { %v627_v58 = vunpack.c.l.s4 %v15200_v57  ;;  %v15458_v61 = vsub.s32 %v596_v54, %v598_v56 }
 0x18c   :  { %v455_v0 = vpop.xlane.xlu0 %454 }
 0x18d   :  { %v457_v1 = vmul.f32 0.03125, %v455_v0  ;;  %v628_v0 = vunpack.c.0.s8 %v627_v58 }
 0x18f   :  { %v458_v2 = vsub.f32 %v15362_v55, %v457_v1 }
 0x191   :  { %v459_v3 = vmul.f32 %v458_v2, %v458_v2 }
 0x193   :  { %v460_v4 = vsel %vm155_vm3, %v459_v3, 0.0 }
 0x194   :  { %461 = vadd.xlane.f32.xlu1 %v460_v4 }
 0x1a5   :  { %472 = vrot.lane.b32.xlu1 %v13426_v5, %s15190_s21  ;;  %v15464_v5 = vsub.s32 %v628_v0, %v598_v56 }
 0x1bd   :  { %v14051_v10 = vpop.f32.mrb[0].mxu1 }
 0x1be   :  { %v240_v11 = vadd.f32 %v14051_v10, %v153_v9  ;;  %v234_v12 = vpop.f32.mrb[1].mxu1 }
 0x1bf   :  { %v235_v13 = vadd.f32 %v234_v12, %v153_v9 }
 0x1c0   :  { %v254_v19 = vmax.f32 %v240_v11, 0.0 }
 0x1c1   :  { %v253_v16 = vmax.f32 %v235_v13, 0.0  ;;  %v14054_v17 = vpop.f32.mrb[2].mxu1 }
 0x1c2   :  { %v250_v20 = vadd.f32 %v14054_v17, %v153_v9  ;;  %v244_v21 = vpop.f32.mrb[3].mxu1 }
 0x1c3   :  { %14063 = vmatprep.mubr.msk.f32.mxu1 %vm155_vm3, %v253_v16  ;;  %v245_v23 = vadd.f32 %v244_v21, %v153_v9 }
 0x1c4   :  { %14064 = vmatmul.mubr.msk.f32.vlgmr.msra.gmra.mrb[4].mxu1 %vm155_vm3, %v254_v19  ;;  %v256_v24 = vmax.f32 %v250_v20, 0.0 }
 0x1c5   :  { %v255_v25 = vmax.f32 %v245_v23, 0.0  ;;  %14716 = vmatpush3.bf16.msra.mxu1 %v14713_v8 }
 0x1c6   :  { %14718 = vmatprep.subr.bf16.mxu1 %v14717_v22 }
 0x1c7   :  { %14066 = vmatprep.mubr.msk.f32.mxu1 %vm155_vm3, %v255_v25 }
 0x1c8   :  { %14067 = vmatmul.mubr.msk.f32.gmra.mrb[6].mxu1 %vm155_vm3, %v256_v24 }
 0x1c9   :  { %14720 = vmatpush3.bf16.msra.mxu1 %v14717_v22 }
 0x1ca   :  { %14107 = vmatprep.subr.mxu1 %v15193_v27 }
 0x221   :  { %v462_v26 = vpop.xlane.xlu1 %461 }
 0x222   :  { %v463_v28 = vmul.f32 0.03125, %v462_v26 }
 0x224   :  { %v464_v29 = vadd.f32 1e-05, %v463_v28 }
 0x225   :  { %v473_v31 = vpop.permute.xlu1 %472 }
 0x226   :  { %15035 = vrsqrt.f32 %v464_v29 }
 0x230   :  { %v15036_v30 = vpop.eup %15035 }
 0x231   :  { %v466_v32 = vmul.f32 %v15036_v30, %v458_v2 }
 0x233   :  { %v475_v34 = vmul.f32 %v473_v31, %v466_v32 }
 0x235   :  { %v482_v35 = vadd.f32 %v13427_v33, %v475_v34 }
 0x237   :  { %14104 = vmatprep.mubr.msk.f32.mxu1 %vm155_vm3, %v482_v35 }
 0x238   :  { %14105 = vmatmul.mubr.msk.f32.vlgmr.msra.gmra.mrb[8].mxu1 %vm155_vm3, %v482_v35 }
 0x239   :  { %14109 = vmatprep.mubr.msk.f32.mxu1 %vm15192_vm1, %v15193_v27 }
 0x297   :  { %v15414_v36 = vpop.f32.mrb[4].mxu1 }
 0x298   :  { %v15416_v37 = vpop.f32.mrb[5].mxu1 }
 0x29b   :  { %v15418_v38 = vpop.f32.mrb[6].mxu1 }
 0x29c   :  { %v15420_v39 = vpop.f32.mrb[7].mxu1 }
 0x30b   :  { %v14106_v41 = vpop.f32.mrb[8].mxu1 }
 0x30c   :  { %v15425_v42 = vadd.f32 %v14106_v41, %v13428_v40  ;;  %v563_v43 = vpop.f32.mrb[9].mxu1 }
 0x30d   :  { %v564_v44 = vadd.f32 %v13428_v40, %v563_v43 }
 0x30e   :  { %576 = vrot.lane.b32.xlu0 %v15425_v42, %s15195_s17 }
 0x30f   :  { %574 = vrot.lane.b32.xlu1 %v564_v44, %s15195_s17 }
 0x313   :  { %580 = vrot.lane.b32.xlu1 %v564_v44, %s15196_s1 }
 0x317   :  { %586 = vrot.lane.b32.xlu1 %v564_v44, %s15197_s19 }
 0x31b   :  { %582 = vrot.lane.b32.xlu1 %v15425_v42, %s15196_s1 }
 0x31f   :  { %588 = vrot.lane.b32.xlu1 %v15425_v42, %s15197_s19 }
 0x323   :  { %864 = vrot.lane.b32.xlu1 %v564_v44, %s15194_s18 }
 0x380   :  { %v15442_v48 = vpop.permute.xlu0 %576 }
 0x381   :  { %v575_v45 = vpop.permute.xlu1 %574 }
 0x382   :  { %868 = vrot.lane.b32.xlu1 %v575_v45, %s15194_s18 }
 0x385   :  { %v581_v46 = vpop.permute.xlu1 %580 }
 0x386   :  { %872 = vrot.lane.b32.xlu1 %v581_v46, %s15194_s18  ;;  %v592_v62 = vcombine.low %v564_v44, %v581_v46  ;;  %v593_v63 = vcombine.high %v564_v44, %v581_v46 }
 0x388   :  { %v600_v3 = vrot.slane %v592_v62, %v15458_v61  ;;  %v607_v4 = vrot.slane %v593_v63, %v15458_v61 }
 0x389   :  { %v587_v47 = vpop.permute.xlu1 %586 }
 0x38a   :  { %866 = vrot.lane.b32.xlu1 %v15425_v42, %s15194_s18  ;;  %876 = vrot.lane.b32.xlu0 %v587_v47, %s15194_s18  ;;  %v608_v59 = vcombine.low %v575_v45, %v587_v47  ;;  %v609_v60 = vcombine.high %v575_v45, %v587_v47 }
 0x38c   :  { %v616_v1 = vrot.slane %v608_v59, %v15458_v61  ;;  %v623_v2 = vrot.slane %v609_v60, %v15458_v61 }
 0x38d   :  { %v15444_v49 = vpop.permute.xlu1 %582 }
 0x38e   :  { %870 = vrot.lane.b32.xlu0 %v15442_v48, %s15194_s18  ;;  %874 = vrot.lane.b32.xlu1 %v15444_v49, %s15194_s18  ;;  %v624_v8 = vcombine.low %v600_v3, %v616_v1  ;;  %v625_v9 = vcombine.high %v600_v3, %v616_v1  ;;  %v640_v10 = vcombine.low %v607_v4, %v623_v2 }
 0x38f   :  { %v641_v11 = vcombine.high %v607_v4, %v623_v2  ;;  %v660_v14 = vcombine.low %v15425_v42, %v15444_v49  ;;  %v661_v15 = vcombine.high %v15425_v42, %v15444_v49 }
 0x390   :  { %v632_v16 = vrot.slane %v624_v8, %v15464_v5  ;;  %v639_v17 = vrot.slane %v625_v9, %v15464_v5  ;;  %v648_v19 = vrot.slane %v640_v10, %v15464_v5 }
 0x391   :  { %v15450_v50 = vpop.permute.xlu1 %588  ;;  %v655_v20 = vrot.slane %v641_v11, %v15464_v5  ;;  %v668_v24 = vrot.slane %v660_v14, %v15458_v61  ;;  %v675_v25 = vrot.slane %v661_v15, %v15458_v61 }
 0x392   :  { %878 = vrot.lane.b32.xlu0 %v15450_v50, %s15194_s18  ;;  %1164 = vrot.lane.b32.xlu1 %v575_v45, %s15198_s20  ;;  %v676_v12 = vcombine.low %v15442_v48, %v15450_v50  ;;  %v677_v13 = vcombine.high %v15442_v48, %v15450_v50  ;;  %v728_v26 = vcombine.low %v632_v16, %v639_v17 }
 0x393   :  { %v13431_v28 = vcombine.high %v632_v16, %v639_v17  ;;  %v744_v29 = vcombine.low %v648_v19, %v655_v20  ;;  %v13432_v30 = vcombine.high %v648_v19, %v655_v20 }
 0x394   :  { %v684_v22 = vrot.slane %v676_v12, %v15458_v61  ;;  %v691_v23 = vrot.slane %v677_v13, %v15458_v61  ;;  %v735_v41 = vrot.slane %v728_v26, %v15458_v61 }
 0x395   :  { %v865_v21 = vpop.permute.xlu1 %864  ;;  %v743_v43 = vrot.slane %v13431_v28, %v15458_v61  ;;  %v759_v45 = vrot.slane %v13432_v30, %v15458_v61 }
 0x396   :  { %1160 = vrot.lane.b32.xlu0 %v564_v44, %s15198_s20  ;;  %1168 = vrot.lane.b32.xlu1 %v581_v46, %s15198_s20  ;;  %v692_v32 = vcombine.low %v668_v24, %v684_v22  ;;  %v693_v33 = vcombine.high %v668_v24, %v684_v22  ;;  %v708_v34 = vcombine.low %v675_v25, %v691_v23 }
 0x397   :  { %v709_v35 = vcombine.high %v675_v25, %v691_v23  ;;  %v751_v44 = vrot.slane %v744_v29, %v15458_v61  ;;  %v760_v58 = vcombine.low %v735_v41, %v743_v43  ;;  %v761_v60 = vcombine.high %v735_v41, %v743_v43 }
 0x398   :  { %v700_v46 = vrot.slane %v692_v32, %v15464_v5  ;;  %v716_v51 = vrot.slane %v708_v34, %v15464_v5 }
 0x399   :  { %v723_v52 = vrot.slane %v709_v35, %v15464_v5  ;;  %v776_v59 = vcombine.low %v751_v44, %v759_v45  ;;  %v777_v62 = vcombine.high %v751_v44, %v759_v45  ;;  %v15495_v13 = vrot.slane %v760_v58, %v15464_v5 }
 0x39a   :  { %1172 = vrot.lane.b32.xlu0 %v587_v47, %s15198_s20  ;;  %v707_v47 = vrot.slane %v693_v33, %v15464_v5  ;;  %v15501_v15 = vrot.slane %v761_v60, %v15464_v5 }
 0x39b   :  { %v812_v3 = vcombine.low %v716_v51, %v723_v52  ;;  %v13434_v4 = vcombine.high %v716_v51, %v723_v52  ;;  %v15498_v14 = vrot.slane %v776_v59, %v15464_v5  ;;  %v15504_v16 = vrot.slane %v777_v62, %v15464_v5 }
 0x39c   :  { %v796_v1 = vcombine.low %v700_v46, %v707_v47  ;;  %v13433_v2 = vcombine.high %v700_v46, %v707_v47 }
 0x39d   :  { %v15513_v25 = vrot.slane %v812_v3, %v15458_v61  ;;  %v15516_v26 = vrot.slane %v13434_v4, %v15458_v61  ;;  %v792_v35 = vcombine.low %v15495_v13, %v15498_v14 }
 0x39e   :  { %v15507_v23 = vrot.slane %v796_v1, %v15458_v61  ;;  %v15510_v24 = vrot.slane %v13433_v2, %v15458_v61 }
 0x3a0   :  { %v828_v52 = vcombine.low %v15507_v23, %v15510_v24 }
 0x3f4   :  { %v869_v31 = vpop.permute.xlu1 %868 }
 0x3f8   :  { %v873_v40 = vpop.permute.xlu1 %872 }
 0x3f9   :  { %v888_v53 = vcombine.low %v865_v21, %v873_v40  ;;  %v889_v54 = vcombine.high %v865_v21, %v873_v40  ;;  %v795_v40 = vcombine.high %v15501_v15, %v15504_v16 }
 0x3fb   :  { %v896_v8 = vrot.slane %v888_v53, %v15458_v61  ;;  %v903_v9 = vrot.slane %v889_v54, %v15458_v61  ;;  %v844_v53 = vcombine.low %v15513_v25, %v15516_v26 }
 0x3fc   :  { %v877_v56 = vpop.permute.xlu0 %876  ;;  %v867_v57 = vpop.permute.xlu1 %866 }
 0x3fd   :  { %v904_v63 = vcombine.low %v869_v31, %v877_v56  ;;  %v905_v0 = vcombine.high %v869_v31, %v877_v56 }
 0x3ff   :  { %v912_v10 = vrot.slane %v904_v63, %v15458_v61  ;;  %v919_v11 = vrot.slane %v905_v0, %v15458_v61 }
 0x400   :  { %v871_v12 = vpop.permute.xlu0 %870  ;;  %v875_v22 = vpop.permute.xlu1 %874 }
 0x401   :  { %v920_v17 = vcombine.low %v896_v8, %v912_v10  ;;  %v921_v19 = vcombine.high %v896_v8, %v912_v10  ;;  %v936_v20 = vcombine.low %v903_v9, %v919_v11  ;;  %v937_v21 = vcombine.high %v903_v9, %v919_v11 }
 0x402   :  { %v956_v32 = vcombine.low %v867_v57, %v875_v22  ;;  %v957_v33 = vcombine.high %v867_v57, %v875_v22 }
 0x403   :  { %v928_v28 = vrot.slane %v920_v17, %v15464_v5  ;;  %v935_v29 = vrot.slane %v921_v19, %v15464_v5  ;;  %v944_v30 = vrot.slane %v936_v20, %v15464_v5  ;;  %v951_v31 = vrot.slane %v937_v21, %v15464_v5 }
 0x404   :  { %v879_v34 = vpop.permute.xlu0 %878  ;;  %v1165_v46 = vpop.permute.xlu1 %1164  ;;  %v964_v59 = vrot.slane %v956_v32, %v15458_v61  ;;  %v971_v60 = vrot.slane %v957_v33, %v15458_v61 }
 0x405   :  { %v1024_v41 = vcombine.low %v928_v28, %v935_v29  ;;  %v13435_v43 = vcombine.high %v928_v28, %v935_v29  ;;  %v1040_v44 = vcombine.low %v944_v30, %v951_v31  ;;  %v13436_v45 = vcombine.high %v944_v30, %v951_v31 }
 0x406   :  { %v972_v47 = vcombine.low %v871_v12, %v879_v34  ;;  %v973_v51 = vcombine.high %v871_v12, %v879_v34 }
 0x407   :  { %v1031_v54 = vrot.slane %v1024_v41, %v15458_v61  ;;  %v1039_v56 = vrot.slane %v13435_v43, %v15458_v61  ;;  %v1047_v57 = vrot.slane %v1040_v44, %v15458_v61  ;;  %v1055_v58 = vrot.slane %v13436_v45, %v15458_v61 }
 0x408   :  { %v980_v62 = vrot.slane %v972_v47, %v15458_v61  ;;  %v987_v63 = vrot.slane %v973_v51, %v15458_v61  ;;  %v1161_v0 = vpop.permute.xlu0 %1160  ;;  %v1169_v8 = vpop.permute.xlu1 %1168 }
 0x409   :  { %v1056_v1 = vcombine.low %v1031_v54, %v1039_v56  ;;  %v1057_v2 = vcombine.high %v1031_v54, %v1039_v56  ;;  %v1072_v3 = vcombine.low %v1047_v57, %v1055_v58  ;;  %v1073_v4 = vcombine.high %v1047_v57, %v1055_v58 }
 0x40a   :  { %v988_v9 = vcombine.low %v964_v59, %v980_v62  ;;  %v989_v10 = vcombine.high %v964_v59, %v980_v62  ;;  %v1004_v11 = vcombine.low %v971_v60, %v987_v63  ;;  %v1005_v12 = vcombine.high %v971_v60, %v987_v63 }
 0x40b   :  { %v1184_v17 = vcombine.low %v1161_v0, %v1169_v8  ;;  %v1185_v19 = vcombine.high %v1161_v0, %v1169_v8  ;;  %v1064_v20 = vrot.slane %v1056_v1, %v15464_v5  ;;  %v1080_v21 = vrot.slane %v1072_v3, %v15464_v5 }
 0x40c   :  { %v996_v22 = vrot.slane %v988_v9, %v15464_v5  ;;  %v1003_v28 = vrot.slane %v989_v10, %v15464_v5  ;;  %v1012_v29 = vrot.slane %v1004_v11, %v15464_v5  ;;  %v1019_v30 = vrot.slane %v1005_v12, %v15464_v5  ;;  %v1173_v31 = vpop.permute.xlu0 %1172 }
 0x40d   :  { %v1192_v32 = vrot.slane %v1184_v17, %v15458_v61  ;;  %v1199_v33 = vrot.slane %v1185_v19, %v15458_v61  ;;  %v1200_v34 = vcombine.low %v1165_v46, %v1173_v31  ;;  %v1201_v41 = vcombine.high %v1165_v46, %v1173_v31 }
 0x40e   :  { %v1092_v43 = vcombine.low %v996_v22, %v1003_v28  ;;  %v13437_v44 = vcombine.high %v996_v22, %v1003_v28  ;;  %v1108_v45 = vcombine.low %v1012_v29, %v1019_v30  ;;  %v13438_v47 = vcombine.high %v1012_v29, %v1019_v30 }
 0x40f   :  { %v1208_v51 = vrot.slane %v1200_v34, %v15458_v61  ;;  %v1215_v54 = vrot.slane %v1201_v41, %v15458_v61  ;;  %v1088_v56 = vcombine.low %v1064_v20, %v1080_v21  ;;  %v1071_v57 = vrot.slane %v1057_v2, %v15464_v5 }
 0x410   :  { %v1099_v58 = vrot.slane %v1092_v43, %v15458_v61  ;;  %v1107_v59 = vrot.slane %v13437_v44, %v15458_v61  ;;  %v1115_v60 = vrot.slane %v1108_v45, %v15458_v61  ;;  %v1123_v62 = vrot.slane %v13438_v47, %v15458_v61 }
 0x411   :  { %v1216_v46 = vcombine.low %v1192_v32, %v1208_v51  ;;  %v1217_v63 = vcombine.high %v1192_v32, %v1208_v51  ;;  %v1232_v0 = vcombine.low %v1199_v33, %v1215_v54  ;;  %v1233_v1 = vcombine.high %v1199_v33, %v1215_v54  ;;  %14108 = vmatpush3.xpose.msk.msra.mxu1 %vm1456_vm4, %v1088_v56 }
 0x412   :  { %v1124_v3 = vcombine.low %v1099_v58, %v1107_v59  ;;  %v1125_v8 = vcombine.high %v1099_v58, %v1107_v59  ;;  %v1140_v9 = vcombine.low %v1115_v60, %v1123_v62  ;;  %v1141_v10 = vcombine.high %v1115_v60, %v1123_v62  ;;  %14112 = vmatprep.subr.mxu1 %v15193_v27 }
 0x413   :  { %v1224_v2 = vrot.slane %v1216_v46, %v15464_v5  ;;  %v1231_v11 = vrot.slane %v1217_v63, %v15464_v5  ;;  %v1240_v12 = vrot.slane %v1232_v0, %v15464_v5  ;;  %v1247_v17 = vrot.slane %v1233_v1, %v15464_v5 }
 0x414   :  { %v1087_v19 = vrot.slane %v1073_v4, %v15464_v5  ;;  %14110 = vmatmul.mubr.msk.f32.vlgmr.msra.gmra.mrb[10].mxu1 %vm1456_vm4, %v792_v35  ;;  %v1089_v22 = vcombine.high %v1064_v20, %v1080_v21  ;;  %v1132_v28 = vrot.slane %v1124_v3, %v15464_v5  ;;  %v1148_v29 = vrot.slane %v1140_v9, %v15464_v5 }
 0x415   :  { %v1320_v30 = vcombine.low %v1224_v2, %v1231_v11  ;;  %v13439_v31 = vcombine.high %v1224_v2, %v1231_v11  ;;  %v1336_v32 = vcombine.low %v1240_v12, %v1247_v17  ;;  %v13440_v33 = vcombine.high %v1240_v12, %v1247_v17  ;;  %14114 = vmatprep.mubr.msk.f32.mxu1 %vm15192_vm1, %v15193_v27 }
 0x416   :  { %v1091_v34 = vcombine.high %v1071_v57, %v1087_v19  ;;  %14113 = vmatpush3.xpose.msk.msra.mxu1 %vm1456_vm4, %v1089_v22  ;;  %v793_v4 = vcombine.high %v15495_v13, %v15498_v14  ;;  %v829_v35 = vcombine.high %v15507_v23, %v15510_v24  ;;  %v845_v20 = vcombine.high %v15513_v25, %v15516_v26 }
 0x417   :  { %14117 = vmatprep.subr.mxu1 %v15193_v27  ;;  %v836_v21 = vrot.slane %v828_v52, %v15464_v5  ;;  %v852_v41 = vrot.slane %v844_v53, %v15464_v5  ;;  %v1327_v13 = vrot.slane %v1320_v30, %v15458_v61  ;;  %v1335_v14 = vrot.slane %v13439_v31, %v15458_v61 }
 0x418   :  { %14123 = vmatpush3.xpose.msk.msra.mxu0 %vm1456_vm4, %v1091_v34  ;;  %v1090_v43 = vcombine.low %v1071_v57, %v1087_v19  ;;  %v1157_v44 = vcombine.high %v1132_v28, %v1148_v29  ;;  %v1343_v45 = vrot.slane %v1336_v32, %v15458_v61  ;;  %v1351_v47 = vrot.slane %v13440_v33, %v15458_v61 }
 0x419   :  { %14115 = vmatmul.mubr.msk.f32.vlgmr.msra.gmra.mrb[12].mxu1 %vm1456_vm4, %v793_v4  ;;  %14132 = vmatprep.subr.mxu0 %v15193_v27  ;;  %v1139_v23 = vrot.slane %v1125_v8, %v15464_v5  ;;  %v1155_v24 = vrot.slane %v1141_v10, %v15464_v5  ;;  %v1352_v25 = vcombine.low %v1327_v13, %v1335_v14 }
 0x41a   :  { %14118 = vmatpush3.xpose.msk.msra.mxu1 %vm1456_vm4, %v1090_v43  ;;  %14119 = vmatprep.mubr.msk.f32.mxu1 %vm15192_vm1, %v15193_v27  ;;  %v1368_v26 = vcombine.low %v1343_v45, %v1351_v47  ;;  %v1353_v52 = vcombine.high %v1327_v13, %v1335_v14  ;;  %v1369_v53 = vcombine.high %v1343_v45, %v1351_v47 }
 0x41b   :  { %14125 = vmatmul.mubr.msk.f32.vlgmr.msra.gmra.mrb[6].mxu0 %vm1456_vm4, %v795_v40  ;;  %v794_v51 = vcombine.low %v15501_v15, %v15504_v16  ;;  %14127 = vmatprep.subr.mxu1 %v15193_v27  ;;  %v1156_v54 = vcombine.low %v1132_v28, %v1148_v29  ;;  %v1360_v56 = vrot.slane %v1352_v25, %v15464_v5 }
 0x41c   :  { %14133 = vmatpush3.xpose.msk.msra.mxu0 %vm1456_vm4, %v1157_v44  ;;  %14134 = vmatprep.mubr.msk.f32.mxu0 %vm15192_vm1, %v15193_v27  ;;  %v1376_v57 = vrot.slane %v1368_v26, %v15464_v5  ;;  %v15609_v58 = vrot.slane %v1353_v52, %v15464_v5  ;;  %v15612_v40 = vrot.slane %v1369_v53, %v15464_v5 }
 0x41d   :  { %14120 = vmatmul.mubr.msk.f32.vlgmr.msra.gmra.mrb[14].mxu1 %vm1456_vm4, %v794_v51  ;;  %v861_v15 = vcombine.high %v836_v21, %v852_v41  ;;  %14142 = vmatprep.subr.mxu0 %v15193_v27  ;;  %v843_v16 = vrot.slane %v829_v35, %v15464_v5  ;;  %v859_v59 = vrot.slane %v845_v20, %v15464_v5 }
 0x41e   :  { %14128 = vmatpush3.xpose.msk.msra.mxu1 %vm1456_vm4, %v1156_v54  ;;  %v1159_v60 = vcombine.high %v1139_v23, %v1155_v24  ;;  %14129 = vmatprep.mubr.msk.f32.mxu1 %vm15192_vm1, %v15193_v27  ;;  %v1386_v62 = vcombine.low %v15609_v58, %v15612_v40  ;;  %v860_v46 = vcombine.low %v836_v21, %v852_v41 }
 0x41f   :  { %14135 = vmatmul.mubr.msk.f32.vlgmr.msra.gmra.mrb[8].mxu0 %vm1456_vm4, %v861_v15  ;;  %14137 = vmatprep.subr.mxu1 %v15193_v27  ;;  %v1387_v63 = vcombine.high %v15609_v58, %v15612_v40  ;;  %v1158_v0 = vcombine.low %v1139_v23, %v1155_v24  ;;  %v1385_v1 = vcombine.high %v1360_v56, %v1376_v57 }
 0x420   :  { %14143 = vmatpush3.xpose.msk.msra.mxu0 %vm1456_vm4, %v1159_v60  ;;  %14144 = vmatprep.mubr.msk.f32.mxu0 %vm15192_vm1, %v15193_v27  ;;  %v863_v3 = vcombine.high %v843_v16, %v859_v59  ;;  %v862_v8 = vcombine.low %v843_v16, %v859_v59  ;;  %v1384_v9 = vcombine.low %v1360_v56, %v1376_v57 }
 0x421   :  { %14130 = vmatmul.mubr.msk.f32.vlgmr.msra.gmra.mrb[16].mxu1 %vm1456_vm4, %v860_v46  ;;  %14152 = vmatprep.subr.mxu0 %v15193_v27 }
 0x422   :  { %14138 = vmatpush3.xpose.msk.msra.mxu1 %vm1456_vm4, %v1158_v0  ;;  %14139 = vmatprep.mubr.msk.f32.mxu1 %vm15192_vm1, %v15193_v27 }
 0x423   :  { %14145 = vmatmul.mubr.msk.f32.vlgmr.msra.gmra.mrb[10].mxu0 %vm1456_vm4, %v863_v3  ;;  %14147 = vmatprep.subr.mxu1 %v15193_v27 }
 0x424   :  { %14153 = vmatpush3.msra.mxu0 %v1385_v1  ;;  %14154 = vmatprep.mubr.msk.f32.mxu0 %vm15192_vm1, %v15193_v27 }
 0x425   :  { %14140 = vmatmul.mubr.msk.f32.vlgmr.msra.gmra.mrb[18].mxu1 %vm1456_vm4, %v862_v8  ;;  %14162 = vmatprep.subr.mxu0 %v15193_v27 }
 0x426   :  { %14148 = vmatpush3.msra.mxu1 %v1384_v9  ;;  %14149 = vmatprep.mubr.msk.f32.mxu1 %vm15192_vm1, %v15193_v27 }
 0x427   :  { %14157 = vmatprep.subr.mxu1 %v15193_v27 }
 0x4e7   :  { %v1529_v10 = vpop.f32.mrb[10].mxu1 }
 0x4e8   :  { %v14111_v2 = vpop.f32.mrb[11].mxu1  ;;  %v2065_v11 = vsel %vm1456_vm4, %v1529_v10, -inf }
 0x4e9   :  { %2066 = vmax.xlane.f32.xlu1 %v2065_v11 }
 0x4ec   :  { %v1605_v12 = vpop.f32.mrb[12].mxu1 }
 0x4ed   :  { %v14116_v17 = vpop.f32.mrb[13].mxu1  ;;  %v2068_v19 = vsel %vm1456_vm4, %v1605_v12, -inf }
 0x4ee   :  { %v1757_v22 = vpop.f32.mrb[6].mxu0  ;;  %2069 = vmax.xlane.f32.xlu0 %v2068_v19 }
 0x4ef   :  { %v14126_v28 = vpop.f32.mrb[7].mxu0  ;;  %v2074_v29 = vsel %vm1456_vm4, %v1757_v22, -inf }
 0x4f0   :  { %2075 = vmax.xlane.f32.xlu1 %v2074_v29  ;;  %v1681_v30 = vpop.f32.mrb[14].mxu1 }
 0x4f1   :  { %v14121_v31 = vpop.f32.mrb[15].mxu1  ;;  %v2071_v32 = vsel %vm1456_vm4, %v1681_v30, -inf }
 0x4f2   :  { %v1909_v33 = vpop.f32.mrb[8].mxu0  ;;  %2072 = vmax.xlane.f32.xlu0 %v2071_v32 }
 0x4f3   :  { %v14136_v34 = vpop.f32.mrb[9].mxu0  ;;  %v2080_v4 = vsel %vm1456_vm4, %v1909_v33, -inf }
 0x4f4   :  { %2081 = vmax.xlane.f32.xlu1 %v2080_v4  ;;  %v1833_v35 = vpop.f32.mrb[16].mxu1 }
 0x4f5   :  { %v14131_v20 = vpop.f32.mrb[17].mxu1  ;;  %v2077_v21 = vsel %vm1456_vm4, %v1833_v35, -inf }
 0x4f6   :  { %v2061_v41 = vpop.f32.mrb[10].mxu0  ;;  %2078 = vmax.xlane.f32.xlu0 %v2077_v21 }
 0x4f7   :  { %v14146_v13 = vpop.f32.mrb[11].mxu0  ;;  %v2086_v14 = vsel %vm1456_vm4, %v2061_v41, -inf }
 0x4f8   :  { %2087 = vmax.xlane.f32.xlu1 %v2086_v14  ;;  %v1985_v43 = vpop.f32.mrb[18].mxu1 }
 0x4f9   :  { %v14141_v44 = vpop.f32.mrb[19].mxu1  ;;  %v2083_v45 = vsel %vm1456_vm4, %v1985_v43, -inf }
 0x4fa   :  { %2084 = vmax.xlane.f32.xlu0 %v2083_v45 }
 0x509   :  { %1166 = vrot.lane.b32.xlu1 %v15442_v48, %s15198_s20 }
 0x510   :  { %1162 = vrot.lane.b32.xlu0 %v15425_v42, %s15198_s20 }
 0x576   :  { %v2067_v47 = vpop.xlane.xlu1 %2066 }
 0x577   :  { %v2089_v23 = vsub.f32 %v1529_v10, %v2067_v47 }
 0x579   :  { %v2097_v24 = vmul.f32 1.442695, %v2089_v23 }
 0x57b   :  { %15037 = vpow2.f32 %v2097_v24  ;;  %v2070_v25 = vpop.xlane.xlu0 %2069 }
 0x57c   :  { %v2090_v26 = vsub.f32 %v1605_v12, %v2070_v25 }
 0x57d   :  { %v2076_v52 = vpop.xlane.xlu1 %2075 }
 0x57e   :  { %v2092_v53 = vsub.f32 %v1757_v22, %v2076_v52  ;;  %v2099_v54 = vmul.f32 1.442695, %v2090_v26 }
 0x57f   :  { %v2073_v51 = vpop.xlane.xlu0 %2072 }
 0x580   :  { %v2103_v56 = vmul.f32 1.442695, %v2092_v53  ;;  %v2091_v57 = vsub.f32 %v1681_v30, %v2073_v51 }
 0x581   :  { %v2082_v15 = vpop.xlane.xlu1 %2081 }
 0x582   :  { %15039 = vpow2.f32 %v2103_v56  ;;  %v2094_v16 = vsub.f32 %v1909_v33, %v2082_v15  ;;  %v2101_v48 = vmul.f32 1.442695, %v2091_v57 }
 0x583   :  { %v2079_v59 = vpop.xlane.xlu0 %2078  ;;  %15041 = vpow2.f32 %v2099_v54 }
 0x584   :  { %v2107_v60 = vmul.f32 1.442695, %v2094_v16  ;;  %v2093_v42 = vsub.f32 %v1833_v35, %v2079_v59 }
 0x585   :  { %v15038_v46 = vpop.eup %15037  ;;  %v2088_v0 = vpop.xlane.xlu1 %2087 }
 0x586   :  { %15043 = vpow2.f32 %v2107_v60  ;;  %v2096_v1 = vsub.f32 %v2061_v41, %v2088_v0  ;;  %v2113_v3 = vsel %vm1456_vm4, %v15038_v46, 0.0  ;;  %v2105_v8 = vmul.f32 1.442695, %v2093_v42 }
 0x587   :  { %v2085_v9 = vpop.xlane.xlu0 %2084  ;;  %2114 = vadd.xlane.f32.xlu0 %v2113_v3  ;;  %15045 = vpow2.f32 %v2101_v48 }
 0x588   :  { %v2111_v10 = vmul.f32 1.442695, %v2096_v1  ;;  %v2095_v2 = vsub.f32 %v1985_v43, %v2085_v9 }
 0x589   :  { %v1167_v13 = vpop.permute.xlu1 %1166 }
 0x58a   :  { %15047 = vpow2.f32 %v2111_v10  ;;  %v2109_v11 = vmul.f32 1.442695, %v2095_v2 }
 0x58b   :  { %15049 = vpow2.f32 %v2105_v8  ;;  %v1163_v21 = vpop.permute.xlu0 %1162 }
 0x58c   :  { %v15657_v12 = vpop.eup %15039  ;;  %15051 = vpow2.f32 %v2109_v11 }
 0x58d   :  { %v2122_v17 = vsel %vm1456_vm4, %v15657_v12, 0.0  ;;  %v15042_v19 = vpop.eup %15041 }
 0x58e   :  { %2123 = vadd.xlane.f32.xlu1 %v2122_v17  ;;  %v2116_v28 = vsel %vm1456_vm4, %v15042_v19, 0.0 }
 0x590   :  { %v15661_v22 = vpop.eup %15043 }
 0x591   :  { %v2128_v29 = vsel %vm1456_vm4, %v15661_v22, 0.0  ;;  %v15046_v30 = vpop.eup %15045 }
 0x592   :  { %2117 = vadd.xlane.f32.xlu1 %v2116_v28  ;;  %2129 = vadd.xlane.f32.xlu0 %v2128_v29  ;;  %v2119_v33 = vsel %vm1456_vm4, %v15046_v30, 0.0 }
 0x594   :  { %v15666_v31 = vpop.eup %15047 }
 0x595   :  { %v15668_v32 = vpop.eup %15049  ;;  %v2134_v34 = vsel %vm1456_vm4, %v15666_v31, 0.0 }
 0x596   :  { %v15673_v4 = vpop.eup %15051  ;;  %2120 = vadd.xlane.f32.xlu0 %v2119_v33  ;;  %2135 = vadd.xlane.f32.xlu1 %v2134_v34  ;;  %v2125_v20 = vsel %vm1456_vm4, %v15668_v32, 0.0 }
 0x597   :  { %v2131_v35 = vsel %vm1456_vm4, %v15673_v4, 0.0 }
 0x59a   :  { %2132 = vadd.xlane.f32.xlu0 %v2131_v35  ;;  %2126 = vadd.xlane.f32.xlu1 %v2125_v20 }
 0x5ab   :  { %1170 = vrot.lane.b32.xlu1 %v15444_v49, %s15198_s20 }
 0x5b0   :  { %1174 = vrot.lane.b32.xlu0 %v15450_v50, %s15198_s20 }
 0x614   :  { %v2115_v41 = vpop.xlane.xlu0 %2114 }
 0x615   :  { %15053 = vrcp.f32 %v2115_v41 }
 0x61b   :  { %v2124_v14 = vpop.xlane.xlu1 %2123 }
 0x61f   :  { %v15054_v43 = vpop.eup %15053  ;;  %v2130_v44 = vpop.xlane.xlu0 %2129 }
 0x620   :  { %v2118_v45 = vpop.xlane.xlu1 %2117  ;;  %v2145_v47 = vmul.f32 %v15054_v43, %v15038_v46 }
 0x621   :  { %15055 = vrcp.f32 %v2118_v45 }
 0x622   :  { %14150 = vmatmul.mubr.msk.f32.vlgmr.msra.gmra.mrb[20].mxu1 %vm1456_vm4, %v2145_v47  ;;  %15057 = vrcp.f32 %v2124_v14 }
 0x623   :  { %v2121_v23 = vpop.xlane.xlu0 %2120  ;;  %14158 = vmatpush3.msra.mxu1 %v1386_v62  ;;  %14159 = vmatprep.mubr.msk.f32.mxu1 %vm15192_vm1, %v15193_v27 }
 0x624   :  { %v2136_v24 = vpop.xlane.xlu1 %2135  ;;  %15059 = vrcp.f32 %v2121_v23  ;;  %14167 = vmatprep.subr.mxu1 %v15193_v27 }
 0x625   :  { %15061 = vrcp.f32 %v2130_v44 }
 0x627   :  { %v2133_v49 = vpop.xlane.xlu0 %2132 }
 0x628   :  { %v2127_v50 = vpop.xlane.xlu1 %2126 }
 0x629   :  { %15063 = vrcp.f32 %v2127_v50 }
 0x62a   :  { %15065 = vrcp.f32 %v2136_v24 }
 0x62b   :  { %v15056_v25 = vpop.eup %15055  ;;  %v1175_v26 = vpop.permute.xlu0 %1174  ;;  %15067 = vrcp.f32 %v2133_v49 }
 0x62c   :  { %v1171_v52 = vpop.permute.xlu1 %1170  ;;  %v1268_v53 = vcombine.low %v1167_v13, %v1175_v26  ;;  %v1269_v51 = vcombine.high %v1167_v13, %v1175_v26  ;;  %v15058_v57 = vpop.eup %15057  ;;  %v2146_v15 = vmul.f32 %v15056_v25, %v15042_v19 }
 0x62d   :  { %v1252_v54 = vcombine.low %v1163_v21, %v1171_v52  ;;  %v1253_v56 = vcombine.high %v1163_v21, %v1171_v52  ;;  %v2148_v8 = vmul.f32 %v15058_v57, %v15657_v12 }
 0x62e   :  { %v15060_v16 = vpop.eup %15059  ;;  %v1276_v62 = vrot.slane %v1268_v53, %v15458_v61  ;;  %v1283_v59 = vrot.slane %v1269_v51, %v15458_v61  ;;  %14155 = vmatmul.mubr.msk.f32.vlgmr.msra.gmra.mrb[12].mxu0 %vm1456_vm4, %v2146_v15 }
 0x62f   :  { %v1260_v48 = vrot.slane %v1252_v54, %v15458_v61  ;;  %v1267_v60 = vrot.slane %v1253_v56, %v15458_v61  ;;  %v2147_v42 = vmul.f32 %v15060_v16, %v15046_v30  ;;  %14163 = vmatpush3.msra.mxu0 %v1387_v63  ;;  %14164 = vmatprep.mubr.msk.f32.mxu0 %vm15192_vm1, %v15193_v27  ;;  %v15062_v30 = vpop.eup %15061 }
 0x630   :  { %14172 = vmatprep.subr.mxu0 %v15193_v27  ;;  %v2150_v49 = vmul.f32 %v15062_v30, %v15661_v22  ;;  %v14975_v22 = vpack.i.bf16 %v15392_v7, %v15387_v6 }
 0x631   :  { %v1284_v46 = vcombine.low %v1260_v48, %v1276_v62  ;;  %v1285_v0 = vcombine.high %v1260_v48, %v1276_v62  ;;  %v1300_v1 = vcombine.low %v1267_v60, %v1283_v59  ;;  %v1301_v3 = vcombine.high %v1267_v60, %v1283_v59  ;;  %14160 = vmatmul.mubr.msk.f32.vlgmr.msra.gmra.mrb[22].mxu1 %vm1456_vm4, %v2147_v42 }
 0x632   :  { %14165 = vmatmul.mubr.msk.f32.vlgmr.msra.gmra.mrb[14].mxu0 %vm1456_vm4, %v2148_v8  ;;  %14169 = vmatprep.mubr.msk.f32.mxu1 %vm15192_vm1, %v15193_v27 }
 0x633   :  { %v1292_v9 = vrot.slane %v1284_v46, %v15464_v5  ;;  %v1299_v10 = vrot.slane %v1285_v0, %v15464_v5  ;;  %v1308_v2 = vrot.slane %v1300_v1, %v15464_v5  ;;  %v1315_v11 = vrot.slane %v1301_v3, %v15464_v5  ;;  %14174 = vmatprep.mubr.msk.f32.mxu0 %vm15192_vm1, %v15193_v27  ;;  %v15064_v21 = vpop.eup %15063 }
 0x634   :  { %v15066_v14 = vpop.eup %15065  ;;  %v2149_v24 = vmul.f32 %v15064_v21, %v15668_v32  ;;  %14976 = vrot.lane.b32.xlu1 %v14975_v22, %s15190_s21 }
 0x635   :  { %v1388_v58 = vcombine.low %v1292_v9, %v1299_v10  ;;  %v13441_v40 = vcombine.high %v1292_v9, %v1299_v10  ;;  %v1404_v63 = vcombine.low %v1308_v2, %v1315_v11  ;;  %v13442_v12 = vcombine.high %v1308_v2, %v1315_v11  ;;  %v15068_v23 = vpop.eup %15067 }
 0x636   :  { %v2151_v26 = vmul.f32 %v15068_v23, %v15673_v4  ;;  %v2152_v32 = vmul.f32 %v15066_v14, %v15666_v31  ;;  %v3043_v4 = vld [vmem:[%s17660_s5 + $0x30] sm:$0xff]  ;;  %v3044_v31 = vld [vmem:[%s17660_s5 + $0x48] sm:$0xff] }
 0x637   :  { %v1395_v17 = vrot.slane %v1388_v58, %v15458_v61  ;;  %v1403_v19 = vrot.slane %v13441_v40, %v15458_v61  ;;  %v1411_v28 = vrot.slane %v1404_v63, %v15458_v61  ;;  %v1419_v29 = vrot.slane %v13442_v12, %v15458_v61 }
 0x638   :  { %v14980_v52 = vpack.i.bf16 %v3044_v31, %v3043_v4 }
 0x639   :  { %v1420_v33 = vcombine.low %v1395_v17, %v1403_v19  ;;  %v1436_v34 = vcombine.low %v1411_v28, %v1419_v29  ;;  %v1421_v35 = vcombine.high %v1395_v17, %v1403_v19  ;;  %v1437_v20 = vcombine.high %v1411_v28, %v1419_v29 }
 0x63a   :  { %14981 = vrot.lane.b32.xlu0 %v14980_v52, %s15190_s21 }
 0x63b   :  { %v1428_v41 = vrot.slane %v1420_v33, %v15464_v5  ;;  %v1444_v13 = vrot.slane %v1436_v34, %v15464_v5  ;;  %v1435_v43 = vrot.slane %v1421_v35, %v15464_v5  ;;  %v1451_v44 = vrot.slane %v1437_v20, %v15464_v5 }
 0x63d   :  { %v1452_v45 = vcombine.low %v1428_v41, %v1444_v13  ;;  %v1453_v47 = vcombine.high %v1428_v41, %v1444_v13  ;;  %v1454_v50 = vcombine.low %v1435_v43, %v1451_v44  ;;  %v1455_v25 = vcombine.high %v1435_v43, %v1451_v44 }
 0x63f   :  { %14168 = vmatpush3.msra.mxu1 %v1452_v45  ;;  %14173 = vmatpush3.msra.mxu0 %v1453_v47 }
 0x640   :  { %14170 = vmatmul.mubr.msk.f32.vlgmr.msra.gmra.mrb[24].mxu1 %vm1456_vm4, %v2149_v24  ;;  %14175 = vmatmul.mubr.msk.f32.vlgmr.msra.gmra.mrb[16].mxu0 %vm1456_vm4, %v2150_v49 }
 0x641   :  { %14177 = vmatprep.subr.mxu1 %v15193_v27  ;;  %14182 = vmatprep.subr.mxu0 %v15193_v27 }
 0x642   :  { %14178 = vmatpush3.msra.mxu1 %v1454_v50  ;;  %14183 = vmatpush3.msra.mxu0 %v1455_v25 }
 0x643   :  { %14179 = vmatprep.mubr.msk.f32.mxu1 %vm15192_vm1, %v15193_v27  ;;  %14184 = vmatprep.mubr.msk.f32.mxu0 %vm15192_vm1, %v15193_v27 }
 0x644   :  { %14180 = vmatmul.mubr.msk.f32.vlgmr.msra.gmra.mrb[26].mxu1 %vm1456_vm4, %v2151_v26  ;;  %14185 = vmatmul.mubr.msk.f32.vlgmr.msra.gmra.mrb[18].mxu0 %vm1456_vm4, %v2152_v32 }
 0x6a6   :  { %v14977_v33 = vpop.permute.xlu1 %14976 }
 0x6a7   :  { %v14979_v20 = vunpack.i.h.bf16 %v14977_v33  ;;  %v14978_v21 = vunpack.i.l.bf16 %v14977_v33 }
 0x6a9   :  { %v14721_v26 = vpack.c.bf16 %v14979_v20, %v14978_v21 }
 0x6ab   :  { %14722 = vmatprep.subr.bf16.mxu1 %v14721_v26 }
 0x6ac   :  { %14724 = vmatpush3.bf16.msra.mxu1 %v14721_v26 }
 0x6f5   :  { %v2222_v53 = vpop.f32.mrb[20].mxu1 }
 0x6f6   :  { %v14151_v51 = vpop.f32.mrb[21].mxu1 }
 0x701   :  { %v2295_v54 = vpop.f32.mrb[12].mxu0 }
 0x702   :  { %v14156_v56 = vpop.f32.mrb[13].mxu0 }
 0x704   :  { %v2368_v57 = vpop.f32.mrb[22].mxu1 }
 0x705   :  { %v2737_v15 = vcombine.low %v2222_v53, %v2368_v57  ;;  %v2738_v6 = vcombine.high %v2222_v53, %v2368_v57  ;;  %v14161_v7 = vpop.f32.mrb[23].mxu1  ;;  %v2441_v16 = vpop.f32.mrb[14].mxu0 }
 0x706   :  { %v2753_v48 = vcombine.low %v2295_v54, %v2441_v16  ;;  %v2754_v60 = vcombine.high %v2295_v54, %v2441_v16  ;;  %v14166_v42 = vpop.f32.mrb[15].mxu0 }
 0x707   :  { %v2745_v62 = vrot.slane %v2737_v15, %v15458_v61  ;;  %v2752_v59 = vrot.slane %v2738_v6, %v15458_v61  ;;  %v14982_v15 = vpop.permute.xlu0 %14981 }
 0x708   :  { %v2761_v46 = vrot.slane %v2753_v48, %v15458_v61  ;;  %v2768_v0 = vrot.slane %v2754_v60, %v15458_v61  ;;  %v14983_v48 = vunpack.i.l.bf16 %v14982_v15 }
 0x70a   :  { %v2769_v1 = vcombine.low %v2745_v62, %v2761_v46  ;;  %v2770_v3 = vcombine.high %v2745_v62, %v2761_v46  ;;  %v2785_v8 = vcombine.low %v2752_v59, %v2768_v0  ;;  %v2786_v9 = vcombine.high %v2752_v59, %v2768_v0 }
 0x70b   :  { %v14984_v59 = vunpack.i.h.bf16 %v14982_v15 }
 0x70c   :  { %v2777_v10 = vrot.slane %v2769_v1, %v15464_v5  ;;  %v2784_v2 = vrot.slane %v2770_v3, %v15464_v5  ;;  %v2793_v11 = vrot.slane %v2785_v8, %v15464_v5  ;;  %v2800_v58 = vrot.slane %v2786_v9, %v15464_v5 }
 0x70d   :  { %v14725_v1 = vpack.c.bf16 %v14984_v59, %v14983_v48  ;;  %v15189_v48 = vld [vmem:[%s17657_s3 + $0x1] ss:$0 sm:$0xff] }
 0x70e   :  { %v2873_v40 = vcombine.low %v2777_v10, %v2784_v2  ;;  %v13467_v63 = vcombine.high %v2777_v10, %v2784_v2  ;;  %v2889_v12 = vcombine.low %v2793_v11, %v2800_v58  ;;  %v13468_v17 = vcombine.high %v2793_v11, %v2800_v58 }
 0x70f   :  { %14726 = vmatprep.subr.bf16.mxu1 %v14725_v1 }
 0x710   :  { %v2880_v19 = vrot.slane %v2873_v40, %v15458_v61  ;;  %v2888_v28 = vrot.slane %v13467_v63, %v15458_v61  ;;  %v2896_v29 = vrot.slane %v2889_v12, %v15458_v61  ;;  %v2904_v30 = vrot.slane %v13468_v17, %v15458_v61  ;;  %14728 = vmatpush3.bf16.msra.mxu1 %v14725_v1 }
 0x712   :  { %v2905_v14 = vcombine.low %v2880_v19, %v2888_v28  ;;  %v2921_v43 = vcombine.low %v2896_v29, %v2904_v30  ;;  %v2906_v44 = vcombine.high %v2880_v19, %v2888_v28  ;;  %v2922_v45 = vcombine.high %v2896_v29, %v2904_v30 }
 0x713   :  { %v2514_v34 = vpop.f32.mrb[24].mxu1  ;;  %v2587_v35 = vpop.f32.mrb[16].mxu0 }
 0x714   :  { %v14171_v41 = vpop.f32.mrb[25].mxu1  ;;  %v14176_v13 = vpop.f32.mrb[17].mxu0  ;;  %v15757_v47 = vrot.slane %v2905_v14, %v15464_v5  ;;  %v15760_v23 = vrot.slane %v2921_v43, %v15464_v5  ;;  %v2920_v24 = vrot.slane %v2906_v44, %v15464_v5  ;;  %v2936_v49 = vrot.slane %v2922_v45, %v15464_v5 }
 0x715   :  { %v13471_v41 = vld [vmem:[%s17659_s7] ss:$0 sm:$0xff] }
 0x716   :  { %v2938_v51 = vcombine.high %v15757_v47, %v15760_v23  ;;  %v2939_v54 = vcombine.low %v2920_v24, %v2936_v49  ;;  %v2940_v56 = vcombine.high %v2920_v24, %v2936_v49  ;;  %v2937_v57 = vcombine.low %v15757_v47, %v15760_v23 }
 0x717   :  { %v2660_v50 = vpop.f32.mrb[26].mxu1  ;;  %v2733_v25 = vpop.f32.mrb[18].mxu0 }
 0x718   :  { %v2805_v32 = vcombine.low %v2514_v34, %v2660_v50  ;;  %v2806_v22 = vcombine.high %v2514_v34, %v2660_v50  ;;  %v2821_v4 = vcombine.low %v2587_v35, %v2733_v25  ;;  %v2822_v31 = vcombine.high %v2587_v35, %v2733_v25  ;;  %v14181_v52 = vpop.f32.mrb[27].mxu1  ;;  %v14186_v53 = vpop.f32.mrb[19].mxu0  ;;  %3011 = vrot.lane.b32.xlu1 %v2938_v51, %s15201_s25 }
 0x719   :  { %v3287_v52 = vld [vmem:[%s17660_s5 + $0x8] sm:$0xff]  ;;  %v3288_v53 = vld [vmem:[%s17660_s5 + $0x20] sm:$0xff] }
 0x71a   :  { %v2813_v6 = vrot.slane %v2805_v32, %v15458_v61  ;;  %v2820_v7 = vrot.slane %v2806_v22, %v15458_v61  ;;  %v2829_v16 = vrot.slane %v2821_v4, %v15458_v61  ;;  %v2836_v62 = vrot.slane %v2822_v31, %v15458_v61 }
 0x71b   :  { %v14737_v51 = vpack.c.bf16 %v3288_v53, %v3287_v52 }
 0x71c   :  { %v2837_v60 = vcombine.low %v2813_v6, %v2829_v16  ;;  %v2838_v42 = vcombine.high %v2813_v6, %v2829_v16  ;;  %v2853_v46 = vcombine.low %v2820_v7, %v2836_v62  ;;  %v2854_v0 = vcombine.high %v2820_v7, %v2836_v62  ;;  %3019 = vrot.lane.b32.xlu1 %v2939_v54, %s15202_s26 }
 0x71d   :  { %14738 = vmatprep.subr.bf16.mxu1 %v14737_v51 }
 0x71e   :  { %v2845_v3 = vrot.slane %v2837_v60, %v15464_v5  ;;  %v2852_v8 = vrot.slane %v2838_v42, %v15464_v5  ;;  %v2861_v9 = vrot.slane %v2853_v46, %v15464_v5  ;;  %v2868_v10 = vrot.slane %v2854_v0, %v15464_v5  ;;  %v3289_v60 = vld [vmem:[%s17660_s5 + $0x38] sm:$0xff]  ;;  %v13474_v46 = vld [vmem:[%s17659_s7 + $0x3] ss:$0 sm:$0xff] }
 0x720   :  { %v2941_v2 = vcombine.low %v2845_v3, %v2852_v8  ;;  %v13469_v11 = vcombine.high %v2845_v3, %v2852_v8  ;;  %v2957_v58 = vcombine.low %v2861_v9, %v2868_v10  ;;  %v13470_v40 = vcombine.high %v2861_v9, %v2868_v10  ;;  %3027 = vrot.lane.b32.xlu1 %v2940_v56, %s15203_s27 }
 0x722   :  { %v2948_v63 = vrot.slane %v2941_v2, %v15458_v61  ;;  %v2956_v12 = vrot.slane %v13469_v11, %v15458_v61  ;;  %v2964_v17 = vrot.slane %v2957_v58, %v15458_v61  ;;  %v2972_v19 = vrot.slane %v13470_v40, %v15458_v61 }
 0x724   :  { %v2973_v28 = vcombine.low %v2948_v63, %v2956_v12  ;;  %v2989_v29 = vcombine.low %v2964_v17, %v2972_v19  ;;  %v2974_v30 = vcombine.high %v2948_v63, %v2956_v12  ;;  %v2990_v33 = vcombine.high %v2964_v17, %v2972_v19  ;;  %3067 = vrot.lane.b32.xlu1 %v13471_v41, %s15190_s21 }
 0x726   :  { %v2981_v34 = vrot.slane %v2973_v28, %v15464_v5  ;;  %v2997_v35 = vrot.slane %v2989_v29, %v15464_v5  ;;  %v2988_v20 = vrot.slane %v2974_v30, %v15464_v5  ;;  %v3004_v21 = vrot.slane %v2990_v33, %v15464_v5  ;;  %v3197_v28 = vld [vmem:[%s17660_s5 + $0x40] sm:$0xff]  ;;  %v3198_v29 = vld [vmem:[%s17660_s5 + $0x58] sm:$0xff] }
 0x727   :  { %v14733_v30 = vpack.c.bf16 %v3198_v29, %v3197_v28 }
 0x728   :  { %v3006_v13 = vcombine.high %v2981_v34, %v2997_v35  ;;  %v3007_v14 = vcombine.low %v2988_v20, %v3004_v21  ;;  %v3008_v43 = vcombine.high %v2988_v20, %v3004_v21  ;;  %v3005_v44 = vcombine.low %v2981_v34, %v2997_v35 }
 0x72a   :  { %3013 = vrot.lane.b32.xlu0 %v3006_v13, %s15201_s25 }
 0x72e   :  { %3021 = vrot.lane.b32.xlu0 %v3007_v14, %s15202_s26 }
 0x732   :  { %3029 = vrot.lane.b32.xlu0 %v3008_v43, %s15203_s27 }
 0x78a   :  { %v3012_v45 = vpop.permute.xlu1 %3011 }
 0x78b   :  { %v3033_v23 = vsel %vm1456_vm4, %v2937_v57, %v3012_v45 }
 0x78e   :  { %v3020_v47 = vpop.permute.xlu1 %3019 }
 0x78f   :  { %v3036_v24 = vsel %vm3035_vm5, %v3033_v23, %v3020_v47 }
 0x792   :  { %v3028_v49 = vpop.permute.xlu1 %3027 }
 0x793   :  { %v3039_v50 = vsel %vm3038_vm6, %v3036_v24, %v3028_v49 }
 0x794   :  { %14195 = vmatprep.mubr.msk.f32.mxu1 %vm155_vm3, %v3039_v50 }
 0x796   :  { %v3068_v54 = vpop.permute.xlu1 %3067 }
 0x79c   :  { %v3014_v25 = vpop.permute.xlu0 %3013 }
 0x79d   :  { %v3034_v32 = vsel %vm1456_vm4, %v3005_v44, %v3014_v25  ;;  %v13478_v25 = vld [vmem:[%s17659_s7 + $0x1] ss:$0 sm:$0xff] }
 0x7a0   :  { %v3022_v26 = vpop.permute.xlu0 %3021 }
 0x7a1   :  { %v3037_v22 = vsel %vm3035_vm5, %v3034_v32, %v3022_v26 }
 0x7a4   :  { %v3030_v4 = vpop.permute.xlu0 %3029 }
 0x7a5   :  { %v3040_v31 = vsel %vm3038_vm6, %v3037_v22, %v3030_v4 }
 0x7a6   :  { %14196 = vmatmul.mubr.msk.f32.vlgmr.msra.gmra.mrb[28].mxu1 %vm155_vm3, %v3040_v31 }
 0x7a7   :  { %14740 = vmatpush3.bf16.msra.mxu1 %v14737_v51 }
 0x879   :  { %v14197_v56 = vpop.f32.mrb[28].mxu1 }
 0x87a   :  { %v3148_v57 = vadd.f32 %v14197_v56, %v3068_v54  ;;  %v3142_v15 = vpop.f32.mrb[29].mxu1 }
 0x87b   :  { %v3143_v6 = vadd.f32 %v3142_v15, %v3068_v54 }
 0x87c   :  { %v15809_v7 = vadd.f32 %v3148_v57, %v15362_v55 }
 0x87d   :  { %v15812_v16 = vadd.f32 %v3143_v6, %v15362_v55  ;;  %v3290_v55 = vld [vmem:[%s17660_s5 + $0x50] sm:$0xff] }
 0x87e   :  { %v3157_v62 = vsel %vm155_vm3, %v15809_v7, 0.0  ;;  %v14741_v42 = vpack.c.bf16 %v3290_v55, %v3289_v60 }
 0x87f   :  { %3158 = vadd.xlane.f32.xlu1 %v3157_v62  ;;  %v3154_v59 = vsel %vm155_vm3, %v15812_v16, 0.0 }
 0x880   :  { %3155 = vadd.xlane.f32.xlu0 %v3154_v59  ;;  %14742 = vmatprep.subr.bf16.mxu1 %v14741_v42 }
 0x881   :  { %14744 = vmatpush3.bf16.msra.mxu1 %v14741_v42 }
 0x882   :  { %14749 = vmatprep.subr.bf16.mxu1 %v15191_v18 }
 0x890   :  { %261 = vrot.lane.b32.xlu1 %v15189_v48, %s15198_s20 }
 0x894   :  { %3190 = vrot.lane.b32.xlu1 %v13474_v46, %s15198_s20 }
 0x90c   :  { %v3159_v0 = vpop.xlane.xlu1 %3158 }
 0x90d   :  { %v3161_v1 = vmul.f32 0.03125, %v3159_v0  ;;  %v3156_v3 = vpop.xlane.xlu0 %3155 }
 0x90e   :  { %v3160_v8 = vmul.f32 0.03125, %v3156_v3 }
 0x90f   :  { %v3163_v9 = vsub.f32 %v15809_v7, %v3161_v1 }
 0x910   :  { %v3162_v10 = vsub.f32 %v15812_v16, %v3160_v8  ;;  %v262_v2 = vpop.permute.xlu1 %261 }
 0x911   :  { %v15836_v11 = vadd.f32 %v15414_v36, %v262_v2  ;;  %v15839_v58 = vadd.f32 %v15416_v37, %v262_v2  ;;  %v3165_v40 = vmul.f32 %v3163_v9, %v3163_v9  ;;  %v15845_v12 = vadd.f32 %v15420_v39, %v262_v2  ;;  %v3195_v39 = vld [vmem:[%s17660_s5 + $0x10] sm:$0xff] }
 0x912   :  { %v3164_v17 = vmul.f32 %v3162_v10, %v3162_v10  ;;  %v15852_v36 = vadd.f32 %v15418_v38, %v262_v2  ;;  %v3196_v38 = vld [vmem:[%s17660_s5 + $0x28] sm:$0xff] }
 0x913   :  { %14217 = vmatprep.mubr.msk.f32.mxu1 %vm155_vm3, %v15839_v58  ;;  %v3169_v63 = vsel %vm155_vm3, %v3165_v40, 0.0  ;;  %v14729_v19 = vpack.c.bf16 %v3196_v38, %v3195_v39 }
 0x914   :  { %14218 = vmatmul.mubr.msk.f32.vlgmr.msra.gmra.mrb[30].mxu1 %vm155_vm3, %v15836_v11  ;;  %3170 = vadd.xlane.f32.xlu0 %v3169_v63  ;;  %v3166_v37 = vsel %vm155_vm3, %v3164_v17, 0.0  ;;  %v3191_v24 = vpop.permute.xlu1 %3190 }
 0x915   :  { %14220 = vmatprep.mubr.msk.f32.mxu1 %vm155_vm3, %v15845_v12  ;;  %14730 = vmatprep.subr.bf16.mxu0 %v14729_v19 }
 0x916   :  { %14732 = vmatpush3.bf16.msra.mxu0 %v14729_v19 }
 0x917   :  { %14734 = vmatprep.subr.bf16.mxu0 %v14733_v30 }
 0x918   :  { %14221 = vmatmul.mubr.msk.f32.gmra.mrb[32].mxu1 %vm155_vm3, %v15852_v36  ;;  %3167 = vadd.xlane.f32.xlu0 %v3166_v37 }
 0x919   :  { %14234 = vmatprep.mubr.msk.f32.mxu1 %vm15192_vm1, %v15193_v27 }
 0x91a   :  { %14736 = vmatpush3.bf16.msra.mxu0 %v14733_v30 }
 0x91b   :  { %14745 = vmatprep.subr.bf16.mxu0 %v15191_v18 }
 0x92e   :  { %3185 = vrot.lane.b32.xlu0 %v13474_v46, %s15194_s18 }
 0x9a1   :  { %v3171_v33 = vpop.xlane.xlu0 %3170 }
 0x9a2   :  { %v3173_v34 = vmul.f32 0.03125, %v3171_v33 }
 0x9a4   :  { %v3175_v35 = vadd.f32 1e-05, %v3173_v34 }
 0x9a5   :  { %v3168_v20 = vpop.xlane.xlu0 %3167 }
 0x9a6   :  { %15069 = vrsqrt.f32 %v3175_v35  ;;  %v3172_v21 = vmul.f32 0.03125, %v3168_v20 }
 0x9a8   :  { %v3174_v41 = vadd.f32 1e-05, %v3172_v21 }
 0x9a9   :  { %v3186_v43 = vpop.permute.xlu0 %3185 }
 0x9aa   :  { %15071 = vrsqrt.f32 %v3174_v41 }
 0x9b0   :  { %v15070_v13 = vpop.eup %15069 }
 0x9b1   :  { %v3179_v14 = vmul.f32 %v15070_v13, %v3163_v9 }
 0x9b3   :  { %v3189_v47 = vmul.f32 %v3186_v43, %v3179_v14 }
 0x9b4   :  { %v15072_v44 = vpop.eup %15071 }
 0x9b5   :  { %v3178_v45 = vmul.f32 %v15072_v44, %v3162_v10  ;;  %v3194_v50 = vadd.f32 %v3191_v24, %v3189_v47 }
 0x9b7   :  { %v3188_v23 = vmul.f32 %v3186_v43, %v3178_v45 }
 0x9b9   :  { %v3193_v49 = vadd.f32 %v3191_v24, %v3188_v23 }
 0x9bb   :  { %14206 = vmatprep.mubr.msk.f32.mxu0 %vm155_vm3, %v3193_v49 }
 0x9bc   :  { %14207 = vmatmul.mubr.msk.f32.vlgmr.msra.gmra.mrb[20].mxu0 %vm155_vm3, %v3194_v50 }
 0x9bd   :  { %14227 = vmatprep.mubr.msk.f32.mxu0 %vm15192_vm1, %v15193_v27 }
 0x9e7   :  { %v14219_v26 = vpop.f32.mrb[30].mxu1 }
 0x9e8   :  { %v15880_v32 = vadd.f32 %v14219_v26, %v13478_v25  ;;  %v3376_v22 = vpop.f32.mrb[31].mxu1 }
 0x9e9   :  { %v15882_v4 = vadd.f32 %v13478_v25, %v3376_v22 }
 0x9ea   :  { %3693 = vrot.lane.b32.xlu0 %v15880_v32, %s15195_s17 }
 0x9eb   :  { %v14222_v31 = vpop.f32.mrb[32].mxu1  ;;  %3691 = vrot.lane.b32.xlu1 %v15882_v4, %s15195_s17 }
 0x9ec   :  { %v3386_v52 = vpop.f32.mrb[33].mxu1  ;;  %v15898_v51 = vadd.f32 %v14222_v31, %v13478_v25 }
 0x9ed   :  { %v15896_v53 = vadd.f32 %v13478_v25, %v3386_v52 }
 0x9ee   :  { %3705 = vrot.lane.b32.xlu0 %v15880_v32, %s15196_s1 }
 0x9ef   :  { %3703 = vrot.lane.b32.xlu1 %v15882_v4, %s15196_s1 }
 0x9f2   :  { %3717 = vrot.lane.b32.xlu0 %v15880_v32, %s15197_s19 }
 0x9f3   :  { %3715 = vrot.lane.b32.xlu1 %v15882_v4, %s15197_s19 }
 0x9f6   :  { %3695 = vrot.lane.b32.xlu0 %v15896_v53, %s15195_s17 }
 0x9f7   :  { %3697 = vrot.lane.b32.xlu1 %v15898_v51, %s15195_s17 }
 0xa5c   :  { %v15904_v54 = vpop.permute.xlu0 %3693 }
 0xa5d   :  { %v15906_v56 = vpop.permute.xlu1 %3691 }
 0xa60   :  { %v15908_v57 = vpop.permute.xlu0 %3705 }
 0xa61   :  { %v15910_v15 = vpop.permute.xlu1 %3703  ;;  %v3795_v6 = vcombine.low %v15880_v32, %v15908_v57  ;;  %v3796_v62 = vcombine.high %v15880_v32, %v15908_v57 }
 0xa62   :  { %v3727_v59 = vcombine.low %v15882_v4, %v15910_v15  ;;  %v3728_v48 = vcombine.high %v15882_v4, %v15910_v15 }
 0xa63   :  { %v3803_v3 = vrot.slane %v3795_v6, %v15458_v61  ;;  %v3810_v8 = vrot.slane %v3796_v62, %v15458_v61 }
 0xa64   :  { %v15920_v60 = vpop.permute.xlu0 %3717  ;;  %v3735_v2 = vrot.slane %v3727_v59, %v15458_v61  ;;  %v3742_v40 = vrot.slane %v3728_v48, %v15458_v61 }
 0xa65   :  { %v3811_v55 = vcombine.low %v15904_v54, %v15920_v60  ;;  %v3812_v42 = vcombine.high %v15904_v54, %v15920_v60  ;;  %v15926_v46 = vpop.permute.xlu1 %3715 }
 0xa66   :  { %v3743_v0 = vcombine.low %v15906_v56, %v15926_v46  ;;  %v3744_v1 = vcombine.high %v15906_v56, %v15926_v46 }
 0xa67   :  { %v3819_v9 = vrot.slane %v3811_v55, %v15458_v61  ;;  %v3826_v10 = vrot.slane %v3812_v42, %v15458_v61 }
 0xa68   :  { %v3751_v63 = vrot.slane %v3743_v0, %v15458_v61  ;;  %v3758_v17 = vrot.slane %v3744_v1, %v15458_v61 }
 0xa69   :  { %v3827_v37 = vcombine.low %v3803_v3, %v3819_v9  ;;  %v3828_v39 = vcombine.high %v3803_v3, %v3819_v9  ;;  %v3843_v38 = vcombine.low %v3810_v8, %v3826_v10  ;;  %v3844_v19 = vcombine.high %v3810_v8, %v3826_v10 }
 0xa6a   :  { %v3759_v28 = vcombine.low %v3735_v2, %v3751_v63  ;;  %v3760_v29 = vcombine.high %v3735_v2, %v3751_v63  ;;  %v3775_v30 = vcombine.low %v3742_v40, %v3758_v17  ;;  %v3776_v33 = vcombine.high %v3742_v40, %v3758_v17 }
 0xa6b   :  { %v3835_v34 = vrot.slane %v3827_v37, %v15464_v5  ;;  %v3842_v35 = vrot.slane %v3828_v39, %v15464_v5  ;;  %v3851_v20 = vrot.slane %v3843_v38, %v15464_v5  ;;  %v3858_v21 = vrot.slane %v3844_v19, %v15464_v5 }
 0xa6c   :  { %v3767_v41 = vrot.slane %v3759_v28, %v15464_v5  ;;  %v3774_v13 = vrot.slane %v3760_v29, %v15464_v5  ;;  %v3783_v14 = vrot.slane %v3775_v30, %v15464_v5  ;;  %v3790_v43 = vrot.slane %v3776_v33, %v15464_v5 }
 0xa6d   :  { %v4067_v44 = vcombine.low %v3835_v34, %v3842_v35  ;;  %v13489_v45 = vcombine.high %v3835_v34, %v3842_v35  ;;  %v4083_v47 = vcombine.low %v3851_v20, %v3858_v21  ;;  %v13490_v23 = vcombine.high %v3851_v20, %v3858_v21 }
 0xa6e   :  { %v3999_v24 = vcombine.low %v3767_v41, %v3774_v13  ;;  %v13487_v49 = vcombine.high %v3767_v41, %v3774_v13  ;;  %v4015_v50 = vcombine.low %v3783_v14, %v3790_v43  ;;  %v13488_v25 = vcombine.high %v3783_v14, %v3790_v43 }
 0xa6f   :  { %v4074_v26 = vrot.slane %v4067_v44, %v15458_v61  ;;  %v4082_v22 = vrot.slane %v13489_v45, %v15458_v61  ;;  %v4090_v31 = vrot.slane %v4083_v47, %v15458_v61  ;;  %v4098_v52 = vrot.slane %v13490_v23, %v15458_v61  ;;  %v13475_v45 = vld [vmem:[%s17659_s7 + $0x2] ss:$0 sm:$0xff] }
 0xa70   :  { %v4006_v6 = vrot.slane %v3999_v24, %v15458_v61  ;;  %v4014_v62 = vrot.slane %v13487_v49, %v15458_v61  ;;  %v4022_v59 = vrot.slane %v4015_v50, %v15458_v61  ;;  %v4030_v48 = vrot.slane %v13488_v25, %v15458_v61  ;;  %v16004_v50 = vpop.permute.xlu0 %3695  ;;  %v16006_v25 = vpop.permute.xlu1 %3697 }
 0xa71   :  { %v4099_v55 = vcombine.low %v4074_v26, %v4082_v22  ;;  %v4100_v42 = vcombine.high %v4074_v26, %v4082_v22  ;;  %v4115_v0 = vcombine.low %v4090_v31, %v4098_v52  ;;  %v4116_v1 = vcombine.high %v4090_v31, %v4098_v52 }
 0xa72   :  { %v4031_v3 = vcombine.low %v4006_v6, %v4014_v62  ;;  %v4032_v8 = vcombine.high %v4006_v6, %v4014_v62  ;;  %v4047_v9 = vcombine.low %v4022_v59, %v4030_v48  ;;  %v4048_v10 = vcombine.high %v4022_v59, %v4030_v48 }
 0xa73   :  { %v4107_v2 = vrot.slane %v4099_v55, %v15464_v5  ;;  %v4123_v40 = vrot.slane %v4115_v0, %v15464_v5  ;;  %v4114_v63 = vrot.slane %v4100_v42, %v15464_v5  ;;  %v4130_v17 = vrot.slane %v4116_v1, %v15464_v5 }
 0xa74   :  { %v4039_v37 = vrot.slane %v4031_v3, %v15464_v5  ;;  %v4055_v39 = vrot.slane %v4047_v9, %v15464_v5  ;;  %v4046_v38 = vrot.slane %v4032_v8, %v15464_v5  ;;  %v4062_v19 = vrot.slane %v4048_v10, %v15464_v5 }
 0xa75   :  { %v4131_v28 = vcombine.low %v4107_v2, %v4123_v40  ;;  %v4132_v29 = vcombine.high %v4107_v2, %v4123_v40  ;;  %v4133_v30 = vcombine.low %v4114_v63, %v4130_v17  ;;  %v4134_v33 = vcombine.high %v4114_v63, %v4130_v17 }
 0xa76   :  { %v4063_v34 = vcombine.low %v4039_v37, %v4055_v39  ;;  %v4064_v35 = vcombine.high %v4039_v37, %v4055_v39  ;;  %v4065_v20 = vcombine.low %v4046_v38, %v4062_v19  ;;  %v4066_v21 = vcombine.high %v4046_v38, %v4062_v19 }
 0xa78   :  { %v14746_v13 = vpack.c.bf16 %v4131_v28, %v4063_v34  ;;  %v14750_v14 = vpack.c.bf16 %v4132_v29, %v4064_v35  ;;  %v15970_v43 = vpack.c.bf16 %v4133_v30, %v4065_v20  ;;  %v15972_v44 = vpack.c.bf16 %v4134_v33, %v4066_v21 }
 0xa7a   :  { %14748 = vmatpush3.bf16.xpose.msk.msra.mxu0 %vm15966_vm7, %v14746_v13  ;;  %14752 = vmatpush3.bf16.xpose.msk.msra.mxu1 %vm15966_vm7, %v14750_v14 }
 0xa7b   :  { %14753 = vmatprep.subr.bf16.mxu0 %v15191_v18  ;;  %14757 = vmatprep.subr.bf16.mxu1 %v15191_v18 }
 0xa8f   :  { %v14208_v47 = vpop.f32.mrb[20].mxu0 }
 0xa90   :  { %v3278_v23 = vpop.f32.mrb[21].mxu0  ;;  %v15992_v49 = vadd.f32 %v14208_v47, %v13475_v45 }
 0xa91   :  { %v3279_v24 = vadd.f32 %v13475_v45, %v3278_v23 }
 0xa93   :  { %3403 = vrot.lane.b32.xlu0 %v3279_v24, %s15196_s1  ;;  %3397 = vrot.lane.b32.xlu1 %v3279_v24, %s15195_s17 }
 0xa97   :  { %3707 = vrot.lane.b32.xlu0 %v15896_v53, %s15196_s1  ;;  %3409 = vrot.lane.b32.xlu1 %v3279_v24, %s15197_s19 }
 0xa9b   :  { %3719 = vrot.lane.b32.xlu0 %v15896_v53, %s15197_s19  ;;  %3709 = vrot.lane.b32.xlu1 %v15898_v51, %s15196_s1 }
 0xa9f   :  { %3399 = vrot.lane.b32.xlu0 %v15992_v49, %s15195_s17  ;;  %3721 = vrot.lane.b32.xlu1 %v15898_v51, %s15197_s19 }
 0xaa3   :  { %3411 = vrot.lane.b32.xlu0 %v15992_v49, %s15197_s19  ;;  %3405 = vrot.lane.b32.xlu1 %v15992_v49, %s15196_s1 }
 0xaa7   :  { %4273 = vrot.lane.b32.xlu0 %v15880_v32, %s15194_s18 }
 0xb05   :  { %v3398_v26 = vpop.permute.xlu1 %3397  ;;  %v3404_v22 = vpop.permute.xlu0 %3403 }
 0xb06   :  { %v3415_v31 = vcombine.low %v3279_v24, %v3404_v22  ;;  %v3416_v52 = vcombine.high %v3279_v24, %v3404_v22 }
 0xb08   :  { %v3423_v32 = vrot.slane %v3415_v31, %v15458_v61  ;;  %v3430_v0 = vrot.slane %v3416_v52, %v15458_v61 }
 0xb09   :  { %v3410_v6 = vpop.permute.xlu1 %3409  ;;  %v16008_v62 = vpop.permute.xlu0 %3707 }
 0xb0a   :  { %v3431_v59 = vcombine.low %v3398_v26, %v3410_v6  ;;  %v3432_v48 = vcombine.high %v3398_v26, %v3410_v6  ;;  %v3863_v55 = vcombine.low %v15896_v53, %v16008_v62  ;;  %v3864_v42 = vcombine.high %v15896_v53, %v16008_v62 }
 0xb0c   :  { %v3439_v1 = vrot.slane %v3431_v59, %v15458_v61  ;;  %v3446_v3 = vrot.slane %v3432_v48, %v15458_v61  ;;  %v3871_v17 = vrot.slane %v3863_v55, %v15458_v61  ;;  %v3878_v37 = vrot.slane %v3864_v42, %v15458_v61 }
 0xb0d   :  { %v16018_v8 = vpop.permute.xlu1 %3709  ;;  %v16020_v9 = vpop.permute.xlu0 %3719 }
 0xb0e   :  { %v3447_v10 = vcombine.low %v3423_v32, %v3439_v1  ;;  %v3448_v2 = vcombine.high %v3423_v32, %v3439_v1  ;;  %v3463_v40 = vcombine.low %v3430_v0, %v3446_v3  ;;  %v3464_v63 = vcombine.high %v3430_v0, %v3446_v3 }
 0xb0f   :  { %v3879_v39 = vcombine.low %v16004_v50, %v16020_v9  ;;  %v3880_v38 = vcombine.high %v16004_v50, %v16020_v9  ;;  %v3931_v33 = vcombine.low %v15898_v51, %v16018_v8  ;;  %v3932_v34 = vcombine.high %v15898_v51, %v16018_v8 }
 0xb10   :  { %v3455_v19 = vrot.slane %v3447_v10, %v15464_v5  ;;  %v3462_v28 = vrot.slane %v3448_v2, %v15464_v5  ;;  %v3471_v29 = vrot.slane %v3463_v40, %v15464_v5  ;;  %v3478_v30 = vrot.slane %v3464_v63, %v15464_v5 }
 0xb11   :  { %v3887_v35 = vrot.slane %v3879_v39, %v15458_v61  ;;  %v3894_v20 = vrot.slane %v3880_v38, %v15458_v61  ;;  %v16038_v21 = vpop.permute.xlu1 %3721  ;;  %v3400_v48 = vpop.permute.xlu0 %3399  ;;  %v3939_v10 = vrot.slane %v3931_v33, %v15458_v61  ;;  %v3946_v2 = vrot.slane %v3932_v34, %v15458_v61 }
 0xb12   :  { %v3551_v13 = vcombine.low %v3455_v19, %v3462_v28  ;;  %v13483_v14 = vcombine.high %v3455_v19, %v3462_v28  ;;  %v3567_v45 = vcombine.low %v3471_v29, %v3478_v30  ;;  %v13484_v47 = vcombine.high %v3471_v29, %v3478_v30 }
 0xb13   :  { %v3895_v23 = vcombine.low %v3871_v17, %v3887_v35  ;;  %v3896_v24 = vcombine.high %v3871_v17, %v3887_v35  ;;  %v3911_v26 = vcombine.low %v3878_v37, %v3894_v20  ;;  %v3912_v22 = vcombine.high %v3878_v37, %v3894_v20 }
 0xb14   :  { %v16041_v31 = vrot.slane %v3551_v13, %v15458_v61  ;;  %v16044_v52 = vrot.slane %v13483_v14, %v15458_v61  ;;  %v16047_v6 = vrot.slane %v3567_v45, %v15458_v61  ;;  %v16050_v59 = vrot.slane %v13484_v47, %v15458_v61 }
 0xb15   :  { %v3903_v55 = vrot.slane %v3895_v23, %v15464_v5  ;;  %v3910_v42 = vrot.slane %v3896_v24, %v15464_v5  ;;  %v3919_v32 = vrot.slane %v3911_v26, %v15464_v5  ;;  %v3926_v0 = vrot.slane %v3912_v22, %v15464_v5  ;;  %v3406_v1 = vpop.permute.xlu1 %3405  ;;  %v3412_v14 = vpop.permute.xlu0 %3411 }
 0xb16   :  { %v3583_v3 = vcombine.low %v16041_v31, %v16044_v52  ;;  %v3947_v39 = vcombine.low %v16006_v25, %v16038_v21  ;;  %v3948_v38 = vcombine.high %v16006_v25, %v16038_v21  ;;  %v3483_v19 = vcombine.low %v15992_v49, %v3406_v1 }
 0xb17   :  { %v4135_v40 = vcombine.low %v3903_v55, %v3910_v42  ;;  %v13491_v63 = vcombine.high %v3903_v55, %v3910_v42  ;;  %v4151_v17 = vcombine.low %v3919_v32, %v3926_v0  ;;  %v13492_v37 = vcombine.high %v3919_v32, %v3926_v0 }
 0xb18   :  { %v3484_v28 = vcombine.high %v15992_v49, %v3406_v1  ;;  %v3584_v29 = vcombine.high %v16041_v31, %v16044_v52  ;;  %v3599_v30 = vcombine.low %v16047_v6, %v16050_v59  ;;  %v3600_v35 = vcombine.high %v16047_v6, %v16050_v59 }
 0xb19   :  { %v16071_v33 = vrot.slane %v4135_v40, %v15458_v61  ;;  %v16074_v34 = vrot.slane %v13491_v63, %v15458_v61  ;;  %v16079_v20 = vrot.slane %v4151_v17, %v15458_v61  ;;  %v3955_v49 = vrot.slane %v3947_v39, %v15458_v61 }
 0xb1a   :  { %v3962_v13 = vrot.slane %v3948_v38, %v15458_v61  ;;  %v16084_v45 = vrot.slane %v13492_v37, %v15458_v61  ;;  %v3491_v23 = vrot.slane %v3483_v19, %v15458_v61  ;;  %v3498_v24 = vrot.slane %v3484_v28, %v15458_v61 }
 0xb1b   :  { %v4167_v47 = vcombine.low %v16071_v33, %v16074_v34  ;;  %v3963_v26 = vcombine.low %v3939_v10, %v3955_v49  ;;  %v3964_v22 = vcombine.high %v3939_v10, %v3955_v49  ;;  %v3499_v6 = vcombine.low %v3400_v48, %v3412_v14 }
 0xb1c   :  { %v3979_v31 = vcombine.low %v3946_v2, %v3962_v13  ;;  %v3980_v52 = vcombine.high %v3946_v2, %v3962_v13  ;;  %v3500_v59 = vcombine.high %v3400_v48, %v3412_v14  ;;  %v3591_v55 = vrot.slane %v3583_v3, %v15464_v5 }
 0xb1d   :  { %v3607_v42 = vrot.slane %v3599_v30, %v15464_v5  ;;  %v3971_v32 = vrot.slane %v3963_v26, %v15464_v5  ;;  %v3978_v0 = vrot.slane %v3964_v22, %v15464_v5  ;;  %v3507_v63 = vrot.slane %v3499_v6, %v15458_v61 }
 0xb1e   :  { %v3987_v1 = vrot.slane %v3979_v31, %v15464_v5  ;;  %v3994_v40 = vrot.slane %v3980_v52, %v15464_v5  ;;  %v3514_v10 = vrot.slane %v3500_v59, %v15458_v61  ;;  %v4183_v52 = vcombine.low %v16079_v20, %v16084_v45 }
 0xb1f   :  { %v3615_v17 = vcombine.low %v3591_v55, %v3607_v42  ;;  %v3616_v2 = vcombine.high %v3591_v55, %v3607_v42  ;;  %v4203_v37 = vcombine.low %v3971_v32, %v3978_v0  ;;  %v13493_v48 = vcombine.high %v3971_v32, %v3978_v0 }
 0xb20   :  { %v4219_v39 = vcombine.low %v3987_v1, %v3994_v40  ;;  %v13494_v3 = vcombine.high %v3987_v1, %v3994_v40  ;;  %v3515_v38 = vcombine.low %v3491_v23, %v3507_v63  ;;  %v3516_v19 = vcombine.high %v3491_v23, %v3507_v63 }
 0xb21   :  { %v3531_v28 = vcombine.low %v3498_v24, %v3514_v10  ;;  %v3532_v30 = vcombine.high %v3498_v24, %v3514_v10  ;;  %14228 = vmatmul.mubr.msk.f32.vlgmr.msra.gmra.mrb[22].mxu0 %vm1456_vm4, %v3615_v17  ;;  %v4210_v49 = vrot.slane %v4203_v37, %v15458_v61  ;;  %v4218_v13 = vrot.slane %v13493_v48, %v15458_v61 }
 0xb22   :  { %v4226_v14 = vrot.slane %v4219_v39, %v15458_v61  ;;  %v4234_v26 = vrot.slane %v13494_v3, %v15458_v61  ;;  %14235 = vmatmul.mubr.msk.f32.vlgmr.msra.gmra.mrb[34].mxu1 %vm1456_vm4, %v3616_v2  ;;  %v3523_v22 = vrot.slane %v3515_v38, %v15464_v5  ;;  %v3530_v31 = vrot.slane %v3516_v19, %v15464_v5 }
 0xb23   :  { %v3539_v23 = vrot.slane %v3531_v28, %v15464_v5  ;;  %v3546_v24 = vrot.slane %v3532_v30, %v15464_v5  ;;  %14756 = vmatpush3.bf16.xpose.msk.msra.mxu0 %vm15966_vm7, %v15970_v43  ;;  %v4235_v6 = vcombine.low %v4210_v49, %v4218_v13  ;;  %14760 = vmatpush3.bf16.xpose.msk.msra.mxu1 %vm15966_vm7, %v15972_v44 }
 0xb24   :  { %v3619_v59 = vcombine.low %v3523_v22, %v3530_v31  ;;  %v13485_v55 = vcombine.high %v3523_v22, %v3530_v31  ;;  %14241 = vmatprep.mubr.msk.f32.mxu0 %vm15192_vm1, %v15193_v27  ;;  %v4251_v0 = vcombine.low %v4226_v14, %v4234_v26  ;;  %14248 = vmatprep.mubr.msk.f32.mxu1 %vm15192_vm1, %v15193_v27 }
 0xb25   :  { %v3635_v42 = vcombine.low %v3539_v23, %v3546_v24  ;;  %v13486_v32 = vcombine.high %v3539_v23, %v3546_v24  ;;  %v3598_v43 = vrot.slane %v3584_v29, %v15464_v5  ;;  %v3614_v1 = vrot.slane %v3600_v35, %v15464_v5  ;;  %14761 = vmatprep.subr.bf16.mxu0 %v15191_v18 }
 0xb26   :  { %14765 = vmatprep.subr.bf16.mxu1 %v15191_v18  ;;  %v4175_v44 = vrot.slane %v4167_v47, %v15464_v5  ;;  %v3626_v40 = vrot.slane %v3619_v59, %v15458_v61  ;;  %v4191_v10 = vrot.slane %v4183_v52, %v15464_v5  ;;  %v4243_v17 = vrot.slane %v4235_v6, %v15464_v5 }
 0xb27   :  { %v3617_v63 = vcombine.low %v3598_v43, %v3614_v1  ;;  %v3634_v2 = vrot.slane %v13485_v55, %v15458_v61  ;;  %v3642_v37 = vrot.slane %v3635_v42, %v15458_v61  ;;  %v3650_v29 = vrot.slane %v13486_v32, %v15458_v61 }
 0xb28   :  { %v3618_v35 = vcombine.high %v3598_v43, %v3614_v1  ;;  %v4236_v48 = vcombine.high %v4210_v49, %v4218_v13  ;;  %v4252_v39 = vcombine.high %v4226_v14, %v4234_v26  ;;  %v4259_v47 = vrot.slane %v4251_v0, %v15464_v5 }
 0xb29   :  { %v4168_v3 = vcombine.high %v16071_v33, %v16074_v34  ;;  %v4184_v38 = vcombine.high %v16079_v20, %v16084_v45  ;;  %v4199_v19 = vcombine.low %v4175_v44, %v4191_v10  ;;  %v4200_v30 = vcombine.high %v4175_v44, %v4191_v10 }
 0xb2a   :  { %14242 = vmatmul.mubr.msk.f32.vlgmr.msra.gmra.mrb[24].mxu0 %vm1456_vm4, %v3617_v63  ;;  %14249 = vmatmul.mubr.msk.f32.vlgmr.msra.gmra.mrb[36].mxu1 %vm1456_vm4, %v3618_v35  ;;  %v4267_v28 = vcombine.low %v4243_v17, %v4259_v47  ;;  %v4268_v49 = vcombine.high %v4243_v17, %v4259_v47  ;;  %v3651_v13 = vcombine.low %v3626_v40, %v3634_v2 }
 0xb2b   :  { %14255 = vmatprep.mubr.msk.f32.mxu0 %vm15192_vm1, %v15193_v27  ;;  %14262 = vmatprep.mubr.msk.f32.mxu1 %vm15192_vm1, %v15193_v27  ;;  %v3667_v14 = vcombine.low %v3642_v37, %v3650_v29  ;;  %v4250_v33 = vrot.slane %v4236_v48, %v15464_v5  ;;  %v4266_v34 = vrot.slane %v4252_v39, %v15464_v5 }
 0xb2c   :  { %v14762_v26 = vpack.c.bf16 %v4267_v28, %v4199_v19  ;;  %v14766_v22 = vpack.c.bf16 %v4268_v49, %v4200_v30  ;;  %v4182_v20 = vrot.slane %v4168_v3, %v15464_v5  ;;  %v4198_v45 = vrot.slane %v4184_v38, %v15464_v5 }
 0xb2d   :  { %v3659_v31 = vrot.slane %v3651_v13, %v15464_v5  ;;  %v3675_v23 = vrot.slane %v3667_v14, %v15464_v5  ;;  %v4269_v24 = vcombine.low %v4250_v33, %v4266_v34  ;;  %v4270_v52 = vcombine.high %v4250_v33, %v4266_v34 }
 0xb2e   :  { %14764 = vmatpush3.bf16.xpose.msk.msra.mxu0 %vm15966_vm7, %v14762_v26  ;;  %14768 = vmatpush3.bf16.xpose.msk.msra.mxu1 %vm15966_vm7, %v14766_v22  ;;  %v4201_v6 = vcombine.low %v4182_v20, %v4198_v45  ;;  %v4202_v59 = vcombine.high %v4182_v20, %v4198_v45  ;;  %v3652_v55 = vcombine.high %v3626_v40, %v3634_v2 }
 0xb2f   :  { %14769 = vmatprep.subr.bf16.mxu0 %v15191_v18  ;;  %14773 = vmatprep.subr.bf16.mxu1 %v15191_v18  ;;  %v3668_v42 = vcombine.high %v3642_v37, %v3650_v29  ;;  %v3683_v32 = vcombine.low %v3659_v31, %v3675_v23  ;;  %v3684_v0 = vcombine.high %v3659_v31, %v3675_v23 }
 0xb30   :  { %v14770_v43 = vpack.c.bf16 %v4269_v24, %v4201_v6  ;;  %v14774_v1 = vpack.c.bf16 %v4270_v52, %v4202_v59  ;;  %v3666_v44 = vrot.slane %v3652_v55, %v15464_v5 }
 0xb31   :  { %v3682_v40 = vrot.slane %v3668_v42, %v15464_v5 }
 0xb33   :  { %v3685_v63 = vcombine.low %v3666_v44, %v3682_v40  ;;  %v3686_v10 = vcombine.high %v3666_v44, %v3682_v40 }
 0xb35   :  { %14256 = vmatmul.mubr.msk.f32.vlgmr.msra.gmra.mrb[26].mxu0 %vm1456_vm4, %v3683_v32  ;;  %14263 = vmatmul.mubr.msk.f32.vlgmr.msra.gmra.mrb[38].mxu1 %vm1456_vm4, %v3684_v0 }
 0xb36   :  { %14772 = vmatpush3.bf16.xpose.msk.msra.mxu0 %vm15966_vm7, %v14770_v43  ;;  %14776 = vmatpush3.bf16.xpose.msk.msra.mxu1 %vm15966_vm7, %v14774_v1 }
 0xb37   :  { %14269 = vmatprep.mubr.msk.f32.mxu0 %vm15192_vm1, %v15193_v27  ;;  %14276 = vmatprep.mubr.msk.f32.mxu1 %vm15192_vm1, %v15193_v27 }
 0xb38   :  { %14777 = vmatprep.subr.bf16.mxu0 %v15191_v18  ;;  %14783 = vmatprep.subr.bf16.mxu1 %v15191_v18 }
 0xb3d   :  { %14270 = vmatmul.mubr.msk.f32.vlgmr.msra.gmra.mrb[28].mxu0 %vm1456_vm4, %v3685_v63  ;;  %14277 = vmatmul.mubr.msk.f32.vlgmr.msra.gmra.mrb[40].mxu1 %vm1456_vm4, %v3686_v10 }
 0xb3e   :  { %14283 = vmatprep.mubr.msk.f32.mxu0 %vm15192_vm1, %v15193_v27  ;;  %14297 = vmatprep.mubr.msk.f32.mxu1 %vm15192_vm1, %v15193_v27 }
 0xbf4   :  { %v4938_v17 = vpop.f32.mrb[22].mxu0 }
 0xbf5   :  { %v5017_v2 = vpop.f32.mrb[34].mxu1  ;;  %v14229_v37 = vpop.f32.mrb[23].mxu0  ;;  %v5495_v29 = vsel %vm3035_vm5, %v4938_v17, -inf }
 0xbf6   :  { %v14236_v35 = vpop.f32.mrb[35].mxu1  ;;  %v5498_v48 = vsel %vm3035_vm5, %v5017_v2, -inf  ;;  %5496 = vmax.xlane.f32.xlu1 %v5495_v29 }
 0xbf7   :  { %5499 = vmax.xlane.f32.xlu0 %v5498_v48 }
 0xbfd   :  { %v5096_v39 = vpop.f32.mrb[24].mxu0  ;;  %v16176_v47 = vpop.f32.mrb[36].mxu1 }
 0xbfe   :  { %v14243_v3 = vpop.f32.mrb[25].mxu0  ;;  %v5501_v38 = vsel %vm3035_vm5, %v5096_v39, -inf  ;;  %v14250_v19 = vpop.f32.mrb[37].mxu1 }
 0xbff   :  { %5502 = vmax.xlane.f32.xlu0 %v5501_v38 }
 0xc07   :  { %4271 = vrot.lane.b32.xlu1 %v15882_v4, %s15194_s18  ;;  %v5504_v4 = vsel %vm3035_vm5, %v16176_v47, -inf }
 0xc08   :  { %v5254_v28 = vpop.f32.mrb[26].mxu0  ;;  %v16181_v30 = vpop.f32.mrb[38].mxu1 }
 0xc09   :  { %v14257_v49 = vpop.f32.mrb[27].mxu0  ;;  %v14264_v13 = vpop.f32.mrb[39].mxu1  ;;  %v5507_v14 = vsel %vm3035_vm5, %v5254_v28, -inf  ;;  %v5510_v45 = vsel %vm3035_vm5, %v16181_v30, -inf }
 0xc0a   :  { %5508 = vmax.xlane.f32.xlu0 %v5507_v14 }
 0xc10   :  { %v5412_v26 = vpop.f32.mrb[28].mxu0  ;;  %v16184_v22 = vpop.f32.mrb[40].mxu1 }
 0xc11   :  { %v14271_v33 = vpop.f32.mrb[29].mxu0  ;;  %v14278_v34 = vpop.f32.mrb[41].mxu1  ;;  %v5513_v20 = vsel %vm3035_vm5, %v5412_v26, -inf  ;;  %v5516_v31 = vsel %vm3035_vm5, %v16184_v22, -inf }
 0xc12   :  { %5514 = vmax.xlane.f32.xlu0 %v5513_v20 }
 0xc28   :  { %4287 = vrot.lane.b32.xlu0 %v15910_v15, %s15194_s18 }
 0xc2b   :  { %5505 = vmax.xlane.f32.xlu1 %v5504_v4 }
 0xc2c   :  { %4295 = vrot.lane.b32.xlu0 %v15926_v46, %s15194_s18 }
 0xc2f   :  { %5511 = vmax.xlane.f32.xlu1 %v5510_v45 }
 0xc30   :  { %4275 = vrot.lane.b32.xlu0 %v15896_v53, %s15194_s18  ;;  %v16221_v53 = vpop.permute.xlu0 %4273 }
 0xc33   :  { %5517 = vmax.xlane.f32.xlu1 %v5516_v31 }
 0xc34   :  { %4285 = vrot.lane.b32.xlu0 %v16006_v25, %s15194_s18 }
 0xc38   :  { %4293 = vrot.lane.b32.xlu0 %v16018_v8, %s15194_s18 }
 0xc3c   :  { %4301 = vrot.lane.b32.xlu0 %v16038_v21, %s15194_s18 }
 0xc44   :  { %4279 = vrot.lane.b32.xlu1 %v15906_v56, %s15194_s18 }
 0xc48   :  { %4281 = vrot.lane.b32.xlu1 %v15904_v54, %s15194_s18 }
 0xc4c   :  { %4289 = vrot.lane.b32.xlu1 %v15908_v57, %s15194_s18 }
 0xc50   :  { %4297 = vrot.lane.b32.xlu1 %v15920_v60, %s15194_s18 }
 0xc54   :  { %4277 = vrot.lane.b32.xlu1 %v15898_v51, %s15194_s18 }
 0xc58   :  { %4283 = vrot.lane.b32.xlu1 %v16004_v50, %s15194_s18 }
 0xc5c   :  { %4291 = vrot.lane.b32.xlu1 %v16008_v62, %s15194_s18 }
 0xc60   :  { %4299 = vrot.lane.b32.xlu1 %v16020_v9, %s15194_s18 }
 0xc83   :  { %v5497_v54 = vpop.xlane.xlu1 %5496 }
 0xc84   :  { %v5519_v56 = vsub.f32 %v4938_v17, %v5497_v54  ;;  %v5500_v57 = vpop.xlane.xlu0 %5499 }
 0xc85   :  { %v5520_v15 = vsub.f32 %v5017_v2, %v5500_v57 }
 0xc86   :  { %v5527_v46 = vmul.f32 1.442695, %v5519_v56 }
 0xc87   :  { %v5529_v60 = vmul.f32 1.442695, %v5520_v15  ;;  %v4272_v52 = vpop.permute.xlu1 %4271 }
 0xc88   :  { %15073 = vpow2.f32 %v5527_v46 }
 0xc89   :  { %15075 = vpow2.f32 %v5529_v60 }
 0xc8c   :  { %v5503_v51 = vpop.xlane.xlu0 %5502 }
 0xc8d   :  { %v5521_v25 = vsub.f32 %v5096_v39, %v5503_v51 }
 0xc8f   :  { %v5531_v8 = vmul.f32 1.442695, %v5521_v25 }
 0xc91   :  { %15077 = vpow2.f32 %v5531_v8 }
 0xc92   :  { %v16223_v50 = vpop.eup %15073 }
 0xc93   :  { %v5543_v62 = vsel %vm3035_vm5, %v16223_v50, 0.0  ;;  %v16227_v9 = vpop.eup %15075 }
 0xc94   :  { %5544 = vadd.xlane.f32.xlu0 %v5543_v62  ;;  %v5546_v21 = vsel %vm3035_vm5, %v16227_v9, 0.0 }
 0xc97   :  { %v5509_v6 = vpop.xlane.xlu0 %5508 }
 0xc98   :  { %5547 = vadd.xlane.f32.xlu0 %v5546_v21  ;;  %v5523_v59 = vsub.f32 %v5254_v28, %v5509_v6 }
 0xc9a   :  { %v5535_v0 = vmul.f32 1.442695, %v5523_v59 }
 0xc9b   :  { %v16231_v23 = vpop.eup %15077 }
 0xc9c   :  { %v5549_v24 = vsel %vm3035_vm5, %v16231_v23, 0.0 }
 0xc9d   :  { %5550 = vadd.xlane.f32.xlu1 %v5549_v24 }
 0xc9f   :  { %v5515_v55 = vpop.xlane.xlu0 %5514 }
 0xca0   :  { %v5525_v43 = vsub.f32 %v5412_v26, %v5515_v55 }
 0xca2   :  { %v5539_v10 = vmul.f32 1.442695, %v5525_v43 }
 0xca3   :  { %v4288_v63 = vpop.permute.xlu0 %4287 }
 0xca4   :  { %v4319_v29 = vcombine.low %v4272_v52, %v4288_v63  ;;  %v4320_v35 = vcombine.high %v4272_v52, %v4288_v63 }
 0xca6   :  { %v4327_v28 = vrot.slane %v4319_v29, %v15458_v61 }
 0xca7   :  { %v4296_v39 = vpop.permute.xlu0 %4295 }
 0xcb8   :  { %v5506_v42 = vpop.xlane.xlu1 %5505 }
 0xcb9   :  { %v5522_v32 = vsub.f32 %v16176_v47, %v5506_v42 }
 0xcbb   :  { %v5533_v1 = vmul.f32 1.442695, %v5522_v32 }
 0xcbc   :  { %v5512_v44 = vpop.xlane.xlu1 %5511 }
 0xcbd   :  { %15079 = vpow2.f32 %v5533_v1  ;;  %v5524_v40 = vsub.f32 %v16181_v30, %v5512_v44  ;;  %v4334_v30 = vrot.slane %v4320_v35, %v15458_v61 }
 0xcbe   :  { %15081 = vpow2.f32 %v5535_v0 }
 0xcbf   :  { %v5537_v17 = vmul.f32 1.442695, %v5524_v40 }
 0xcc0   :  { %v5518_v2 = vpop.xlane.xlu1 %5517 }
 0xcc1   :  { %15083 = vpow2.f32 %v5537_v17  ;;  %v5526_v37 = vsub.f32 %v16184_v22, %v5518_v2 }
 0xcc2   :  { %15085 = vpow2.f32 %v5539_v10 }
 0xcc3   :  { %v5541_v48 = vmul.f32 1.442695, %v5526_v37 }
 0xcc4   :  { %v4280_v47 = vpop.permute.xlu1 %4279 }
 0xcc5   :  { %15087 = vpow2.f32 %v5541_v48  ;;  %v4335_v3 = vcombine.low %v4280_v47, %v4296_v39  ;;  %v4336_v38 = vcombine.high %v4280_v47, %v4296_v39 }
 0xcc7   :  { %v16238_v19 = vpop.eup %15079  ;;  %v4343_v49 = vrot.slane %v4335_v3, %v15458_v61  ;;  %v4350_v13 = vrot.slane %v4336_v38, %v15458_v61 }
 0xcc8   :  { %v4282_v14 = vpop.permute.xlu1 %4281  ;;  %v5552_v26 = vsel %vm3035_vm5, %v16238_v19, 0.0  ;;  %v16246_v22 = vpop.eup %15081 }
 0xcc9   :  { %v4351_v33 = vcombine.low %v4327_v28, %v4343_v49  ;;  %v4352_v34 = vcombine.high %v4327_v28, %v4343_v49  ;;  %v4367_v20 = vcombine.low %v4334_v30, %v4350_v13  ;;  %v4368_v4 = vcombine.high %v4334_v30, %v4350_v13  ;;  %5553 = vadd.xlane.f32.xlu0 %v5552_v26 }
 0xcca   :  { %v5555_v60 = vsel %vm3035_vm5, %v16246_v22, 0.0 }
 0xccb   :  { %v16248_v45 = vpop.eup %15083  ;;  %v4359_v31 = vrot.slane %v4351_v33, %v15464_v5  ;;  %v4366_v54 = vrot.slane %v4352_v34, %v15464_v5  ;;  %v4375_v56 = vrot.slane %v4367_v20, %v15464_v5  ;;  %v4382_v57 = vrot.slane %v4368_v4, %v15464_v5 }
 0xccc   :  { %v4290_v15 = vpop.permute.xlu1 %4289  ;;  %v5558_v46 = vsel %vm3035_vm5, %v16248_v45, 0.0  ;;  %v16258_v51 = vpop.eup %15085 }
 0xccd   :  { %v4591_v25 = vcombine.low %v4359_v31, %v4366_v54  ;;  %v13495_v8 = vcombine.high %v4359_v31, %v4366_v54  ;;  %v4607_v62 = vcombine.low %v4375_v56, %v4382_v57  ;;  %v13496_v21 = vcombine.high %v4375_v56, %v4382_v57  ;;  %5559 = vadd.xlane.f32.xlu1 %v5558_v46 }
 0xcce   :  { %v4387_v24 = vcombine.low %v16221_v53, %v4290_v15  ;;  %v4388_v52 = vcombine.high %v16221_v53, %v4290_v15  ;;  %5556 = vadd.xlane.f32.xlu0 %v5555_v60  ;;  %v5561_v1 = vsel %vm3035_vm5, %v16258_v51, 0.0 }
 0xccf   :  { %v16262_v6 = vpop.eup %15087  ;;  %v4598_v59 = vrot.slane %v4591_v25, %v15458_v61  ;;  %v4606_v55 = vrot.slane %v13495_v8, %v15458_v61  ;;  %v4614_v42 = vrot.slane %v4607_v62, %v15458_v61  ;;  %v4622_v32 = vrot.slane %v13496_v21, %v15458_v61 }
 0xcd0   :  { %v4298_v0 = vpop.permute.xlu1 %4297  ;;  %v5564_v43 = vsel %vm3035_vm5, %v16262_v6, 0.0  ;;  %v4395_v2 = vrot.slane %v4387_v24, %v15458_v61  ;;  %v4402_v37 = vrot.slane %v4388_v52, %v15458_v61 }
 0xcd1   :  { %v4403_v44 = vcombine.low %v4282_v14, %v4298_v0  ;;  %v4404_v53 = vcombine.high %v4282_v14, %v4298_v0  ;;  %5562 = vadd.xlane.f32.xlu1 %v5561_v1  ;;  %v4623_v40 = vcombine.low %v4598_v59, %v4606_v55  ;;  %v4639_v63 = vcombine.low %v4614_v42, %v4622_v32 }
 0xcd2   :  { %5565 = vadd.xlane.f32.xlu0 %v5564_v43  ;;  %v4624_v10 = vcombine.high %v4598_v59, %v4606_v55  ;;  %v4640_v17 = vcombine.high %v4614_v42, %v4622_v32 }
 0xcd3   :  { %v4411_v29 = vrot.slane %v4403_v44, %v15458_v61  ;;  %v4418_v35 = vrot.slane %v4404_v53, %v15458_v61  ;;  %v4631_v48 = vrot.slane %v4623_v40, %v15464_v5  ;;  %v4647_v39 = vrot.slane %v4639_v63, %v15464_v5 }
 0xcd4   :  { %v4638_v47 = vrot.slane %v4624_v10, %v15464_v5  ;;  %v4654_v3 = vrot.slane %v4640_v17, %v15464_v5  ;;  %v4278_v17 = vpop.permute.xlu1 %4277 }
 0xcd5   :  { %v4419_v38 = vcombine.low %v4395_v2, %v4411_v29  ;;  %v4420_v28 = vcombine.high %v4395_v2, %v4411_v29  ;;  %v4435_v30 = vcombine.low %v4402_v37, %v4418_v35  ;;  %v4436_v49 = vcombine.high %v4402_v37, %v4418_v35  ;;  %v4276_v2 = vpop.permute.xlu0 %4275 }
 0xcd6   :  { %v4656_v34 = vcombine.high %v4631_v48, %v4647_v39  ;;  %v4658_v20 = vcombine.high %v4638_v47, %v4654_v3  ;;  %v4655_v24 = vcombine.low %v4631_v48, %v4647_v39  ;;  %v4657_v44 = vcombine.low %v4638_v47, %v4654_v3 }
 0xcd7   :  { %v4427_v13 = vrot.slane %v4419_v38, %v15464_v5  ;;  %v4434_v14 = vrot.slane %v4420_v28, %v15464_v5  ;;  %v4443_v26 = vrot.slane %v4435_v30, %v15464_v5  ;;  %v4450_v33 = vrot.slane %v4436_v49, %v15464_v5 }
 0xcd8   :  { %v4284_v37 = vpop.permute.xlu1 %4283 }
 0xcd9   :  { %v4659_v4 = vcombine.low %v4427_v13, %v4434_v14  ;;  %v13497_v31 = vcombine.high %v4427_v13, %v4434_v14  ;;  %v4675_v54 = vcombine.low %v4443_v26, %v4450_v33  ;;  %v13498_v56 = vcombine.high %v4443_v26, %v4450_v33  ;;  %v4286_v29 = vpop.permute.xlu0 %4285 }
 0xcdb   :  { %v4666_v57 = vrot.slane %v4659_v4, %v15458_v61  ;;  %v4674_v15 = vrot.slane %v13497_v31, %v15458_v61  ;;  %v4682_v46 = vrot.slane %v4675_v54, %v15458_v61  ;;  %v4690_v60 = vrot.slane %v13498_v56, %v15458_v61 }
 0xcdc   :  { %v4292_v35 = vpop.permute.xlu1 %4291 }
 0xcdd   :  { %v4691_v25 = vcombine.low %v4666_v57, %v4674_v15  ;;  %v4707_v8 = vcombine.low %v4682_v46, %v4690_v60  ;;  %v4692_v59 = vcombine.high %v4666_v57, %v4674_v15  ;;  %v4708_v55 = vcombine.high %v4682_v46, %v4690_v60  ;;  %v4294_v48 = vpop.permute.xlu0 %4293 }
 0xcde   :  { %v4523_v3 = vcombine.low %v4278_v17, %v4294_v48  ;;  %v4524_v30 = vcombine.high %v4278_v17, %v4294_v48  ;;  %v4455_v49 = vcombine.low %v4276_v2, %v4292_v35  ;;  %v4456_v13 = vcombine.high %v4276_v2, %v4292_v35 }
 0xcdf   :  { %v4699_v62 = vrot.slane %v4691_v25, %v15464_v5  ;;  %v4715_v21 = vrot.slane %v4707_v8, %v15464_v5  ;;  %v4706_v0 = vrot.slane %v4692_v59, %v15464_v5  ;;  %v4722_v43 = vrot.slane %v4708_v55, %v15464_v5 }
 0xce0   :  { %v4300_v39 = vpop.permute.xlu1 %4299  ;;  %v4538_v4 = vrot.slane %v4524_v30, %v15458_v61  ;;  %v4463_v31 = vrot.slane %v4455_v49, %v15458_v61  ;;  %v4470_v54 = vrot.slane %v4456_v13, %v15458_v61 }
 0xce1   :  { %v4723_v52 = vcombine.low %v4699_v62, %v4715_v21  ;;  %v4724_v42 = vcombine.high %v4699_v62, %v4715_v21  ;;  %v4725_v53 = vcombine.low %v4706_v0, %v4722_v43  ;;  %v4726_v40 = vcombine.high %v4706_v0, %v4722_v43  ;;  %v4302_v38 = vpop.permute.xlu0 %4301 }
 0xce2   :  { %v4471_v28 = vcombine.low %v4284_v37, %v4300_v39  ;;  %v4472_v47 = vcombine.high %v4284_v37, %v4300_v39  ;;  %v4539_v14 = vcombine.low %v4286_v29, %v4302_v38  ;;  %v4540_v26 = vcombine.high %v4286_v29, %v4302_v38 }
 0xce3   :  { %v14778_v32 = vpack.c.bf16 %v4723_v52, %v4655_v24  ;;  %v16292_v1 = vpack.c.bf16 %v4724_v42, %v4656_v34  ;;  %v14784_v63 = vpack.c.bf16 %v4725_v53, %v4657_v44  ;;  %v16295_v10 = vpack.c.bf16 %v4726_v40, %v4658_v20 }
 0xce4   :  { %v4479_v33 = vrot.slane %v4471_v28, %v15458_v61  ;;  %v4486_v34 = vrot.slane %v4472_v47, %v15458_v61  ;;  %v4531_v20 = vrot.slane %v4523_v3, %v15458_v61  ;;  %v4547_v56 = vrot.slane %v4539_v14, %v15458_v61 }
 0xce5   :  { %14779 = vmatpush3.bf16.msra.mxu0 %v14778_v32  ;;  %14785 = vmatpush3.bf16.msra.mxu1 %v14784_v63  ;;  %v4554_v57 = vrot.slane %v4540_v26, %v15458_v61 }
 0xce6   :  { %14780 = vmatprep.subr.bf16.mxu0 %v15191_v18  ;;  %14789 = vmatprep.subr.bf16.mxu1 %v15191_v18  ;;  %v4487_v15 = vcombine.low %v4463_v31, %v4479_v33  ;;  %v4488_v46 = vcombine.high %v4463_v31, %v4479_v33  ;;  %v4503_v60 = vcombine.low %v4470_v54, %v4486_v34 }
 0xce7   :  { %v4504_v25 = vcombine.high %v4470_v54, %v4486_v34  ;;  %v4555_v8 = vcombine.low %v4531_v20, %v4547_v56  ;;  %v4556_v62 = vcombine.high %v4531_v20, %v4547_v56  ;;  %v4571_v21 = vcombine.low %v4538_v4, %v4554_v57 }
 0xce8   :  { %v4572_v24 = vcombine.high %v4538_v4, %v4554_v57  ;;  %v4495_v52 = vrot.slane %v4487_v15, %v15464_v5  ;;  %v4502_v59 = vrot.slane %v4488_v46, %v15464_v5  ;;  %v4511_v55 = vrot.slane %v4503_v60, %v15464_v5 }
 0xce9   :  { %v4518_v42 = vrot.slane %v4504_v25, %v15464_v5  ;;  %v4563_v32 = vrot.slane %v4555_v8, %v15464_v5  ;;  %v4570_v0 = vrot.slane %v4556_v62, %v15464_v5  ;;  %v4579_v43 = vrot.slane %v4571_v21, %v15464_v5 }
 0xcea   :  { %v4586_v44 = vrot.slane %v4572_v24, %v15464_v5  ;;  %v4727_v40 = vcombine.low %v4495_v52, %v4502_v59  ;;  %v13499_v63 = vcombine.high %v4495_v52, %v4502_v59 }
 0xceb   :  { %v4743_v17 = vcombine.low %v4511_v55, %v4518_v42  ;;  %v13500_v2 = vcombine.high %v4511_v55, %v4518_v42  ;;  %v4795_v37 = vcombine.low %v4563_v32, %v4570_v0  ;;  %v13501_v29 = vcombine.high %v4563_v32, %v4570_v0 }
 0xcec   :  { %v4811_v35 = vcombine.low %v4579_v43, %v4586_v44  ;;  %v13502_v48 = vcombine.high %v4579_v43, %v4586_v44  ;;  %v4734_v38 = vrot.slane %v4727_v40, %v15458_v61  ;;  %v4742_v28 = vrot.slane %v13499_v63, %v15458_v61 }
 0xced   :  { %v4750_v47 = vrot.slane %v4743_v17, %v15458_v61  ;;  %v4758_v3 = vrot.slane %v13500_v2, %v15458_v61  ;;  %v4802_v30 = vrot.slane %v4795_v37, %v15458_v61  ;;  %v4810_v49 = vrot.slane %v13501_v29, %v15458_v61 }
 0xcee   :  { %v4818_v13 = vrot.slane %v4811_v35, %v15458_v61  ;;  %v4826_v14 = vrot.slane %v13502_v48, %v15458_v61  ;;  %v4759_v33 = vcombine.low %v4734_v38, %v4742_v28  ;;  %v4760_v24 = vcombine.high %v4734_v38, %v4742_v28 }
 0xcef   :  { %v4775_v34 = vcombine.low %v4750_v47, %v4758_v3  ;;  %v4827_v31 = vcombine.low %v4802_v30, %v4810_v49  ;;  %v4776_v59 = vcombine.high %v4750_v47, %v4758_v3 }
 0xcf0   :  { %v4843_v54 = vcombine.low %v4818_v13, %v4826_v14  ;;  %v4767_v56 = vrot.slane %v4759_v33, %v15464_v5  ;;  %v4844_v42 = vcombine.high %v4818_v13, %v4826_v14  ;;  %v4774_v43 = vrot.slane %v4760_v24, %v15464_v5 }
 0xcf1   :  { %v4783_v57 = vrot.slane %v4775_v34, %v15464_v5  ;;  %v4790_v63 = vrot.slane %v4776_v59, %v15464_v5 }
 0xcf2   :  { %v4851_v60 = vrot.slane %v4843_v54, %v15464_v5  ;;  %v4858_v35 = vrot.slane %v4844_v42, %v15464_v5 }
 0xcf3   :  { %v4791_v25 = vcombine.low %v4767_v56, %v4783_v57  ;;  %v4792_v40 = vcombine.high %v4767_v56, %v4783_v57  ;;  %v4794_v28 = vcombine.high %v4774_v43, %v4790_v63  ;;  %v4793_v3 = vcombine.low %v4774_v43, %v4790_v63 }
 0xd21   :  { %v5545_v53 = vpop.xlane.xlu0 %5544 }
 0xd22   :  { %15089 = vrcp.f32 %v5545_v53 }
 0xd25   :  { %v5548_v39 = vpop.xlane.xlu0 %5547 }
 0xd26   :  { %15091 = vrcp.f32 %v5548_v39 }
 0xd2a   :  { %v5551_v26 = vpop.xlane.xlu1 %5550 }
 0xd2b   :  { %15093 = vrcp.f32 %v5551_v26 }
 0xd2c   :  { %v15090_v20 = vpop.eup %15089 }
 0xd2d   :  { %v5568_v4 = vmul.f32 %v15090_v20, %v16223_v50  ;;  %v4835_v50 = vrot.slane %v4827_v31, %v15464_v5 }
 0xd2f   :  { %14284 = vmatmul.mubr.msk.f32.vlgmr.msra.gmra.mrb[30].mxu0 %vm3035_vm5, %v5568_v4  ;;  %v4859_v8 = vcombine.low %v4835_v50, %v4851_v60  ;;  %v6581_v32 = vsel %vm3035_vm5, %v5568_v4, 0.0  ;;  %v4860_v37 = vcombine.high %v4835_v50, %v4851_v60 }
 0xd30   :  { %v15092_v15 = vpop.eup %15091  ;;  %14782 = vmatpush3.bf16.msra.mxu0 %v16292_v1  ;;  %14290 = vmatprep.mubr.msk.f32.mxu0 %vm15192_vm1, %v15193_v27 }
 0xd31   :  { %14786 = vmatprep.subr.bf16.mxu0 %v15191_v18  ;;  %v5570_v46 = vmul.f32 %v15092_v15, %v16227_v9  ;;  %v14790_v21 = vpack.c.bf16 %v4859_v8, %v4791_v25  ;;  %v14793_v38 = vpack.c.bf16 %v4860_v37, %v4792_v40 }
 0xd33   :  { %14291 = vmatmul.mubr.msk.f32.vlgmr.msra.gmra.mrb[32].mxu0 %vm3035_vm5, %v5570_v46  ;;  %v6582_v55 = vsel %vm3035_vm5, %v5570_v46, 0.0 }
 0xd34   :  { %14788 = vmatpush3.bf16.msra.mxu0 %v16295_v10  ;;  %14304 = vmatprep.mubr.msk.f32.mxu0 %vm15192_vm1, %v15193_v27  ;;  %v6583_v44 = vadd.f32 %v6582_v55, %v6581_v32 }
 0xd35   :  { %v15094_v1 = vpop.eup %15093  ;;  %14792 = vmatprep.subr.bf16.mxu0 %v15191_v18 }
 0xd36   :  { %v5572_v62 = vmul.f32 %v15094_v1, %v16231_v23  ;;  %v4828_v23 = vcombine.high %v4802_v30, %v4810_v49 }
 0xd38   :  { %14298 = vmatmul.mubr.msk.f32.vlgmr.msra.gmra.mrb[42].mxu1 %vm3035_vm5, %v5572_v62  ;;  %v6584_v17 = vsel %vm3035_vm5, %v5572_v62, 0.0  ;;  %v4842_v29 = vrot.slane %v4828_v23, %v15464_v5  ;;  %v6472_v62 = vld [vmem:[%s17660_s5 + $0x58] sm:$0xff] }
 0xd39   :  { %14791 = vmatpush3.bf16.msra.mxu1 %v14790_v21  ;;  %14311 = vmatprep.mubr.msk.f32.mxu1 %vm15192_vm1, %v15193_v27  ;;  %v6585_v39 = vadd.f32 %v6584_v17, %v6583_v44  ;;  %v6469_v21 = vld [vmem:[%s17660_s5 + $0x10] sm:$0xff] }
 0xd3a   :  { %14795 = vmatprep.subr.bf16.mxu1 %v15191_v18  ;;  %v4862_v13 = vcombine.high %v4842_v29, %v4858_v35  ;;  %v4861_v26 = vcombine.low %v4842_v29, %v4858_v35 }
 0xd3c   :  { %v14799_v20 = vpack.c.bf16 %v4862_v13, %v4794_v28  ;;  %v14796_v31 = vpack.c.bf16 %v4861_v26, %v4793_v3 }
 0xd56   :  { %v5554_v9 = vpop.xlane.xlu0 %5553 }
 0xd57   :  { %15095 = vrcp.f32 %v5554_v9 }
 0xd5a   :  { %v5560_v10 = vpop.xlane.xlu1 %5559 }
 0xd5b   :  { %15097 = vrcp.f32 %v5560_v10  ;;  %v5557_v52 = vpop.xlane.xlu0 %5556  ;;  %v6470_v10 = vld [vmem:[%s17660_s5 + $0x28] sm:$0xff] }
 0xd5c   :  { %15099 = vrcp.f32 %v5557_v52  ;;  %v14985_v24 = vpack.i.bf16 %v6470_v10, %v6469_v21 }
 0xd5e   :  { %v5563_v0 = vpop.xlane.xlu1 %5562  ;;  %14986 = vrot.lane.b32.xlu0 %v14985_v24, %s15194_s18 }
 0xd5f   :  { %15101 = vrcp.f32 %v5563_v0  ;;  %v5566_v53 = vpop.xlane.xlu0 %5565 }
 0xd60   :  { %15103 = vrcp.f32 %v5566_v53 }
 0xd61   :  { %v15096_v2 = vpop.eup %15095 }
 0xd62   :  { %v5574_v48 = vmul.f32 %v15096_v2, %v16238_v19 }
 0xd64   :  { %14305 = vmatmul.mubr.msk.f32.vlgmr.msra.gmra.mrb[34].mxu0 %vm3035_vm5, %v5574_v48  ;;  %v6586_v47 = vsel %vm3035_vm5, %v5574_v48, 0.0 }
 0xd65   :  { %v15098_v30 = vpop.eup %15097  ;;  %v6587_v49 = vadd.f32 %v6586_v47, %v6585_v39  ;;  %14794 = vmatpush3.bf16.msra.mxu0 %v14793_v38  ;;  %14318 = vmatprep.mubr.msk.f32.mxu0 %vm15192_vm1, %v15193_v27 }
 0xd66   :  { %v15100_v14 = vpop.eup %15099  ;;  %14798 = vmatprep.subr.bf16.mxu0 %v15191_v18  ;;  %v5578_v19 = vmul.f32 %v15098_v30, %v16248_v45 }
 0xd67   :  { %v6596_v33 = vmul.f32 0.25, %v6587_v49  ;;  %v5576_v34 = vmul.f32 %v15100_v14, %v16246_v22 }
 0xd68   :  { %14319 = vmatmul.mubr.msk.f32.vlgmr.msra.gmra.mrb[36].mxu0 %vm3035_vm5, %v5578_v19  ;;  %v6589_v4 = vsel %vm3035_vm5, %v5578_v19, 0.0 }
 0xd69   :  { %v15102_v54 = vpop.eup %15101  ;;  %v6598_v56 = vsel %vm3035_vm5, %v6596_v33, 0.0  ;;  %14312 = vmatmul.mubr.msk.f32.vlgmr.msra.gmra.mrb[44].mxu1 %vm3035_vm5, %v5576_v34  ;;  %v6588_v57 = vsel %vm3035_vm5, %v5576_v34, 0.0  ;;  %14800 = vmatpush3.bf16.msra.mxu0 %v14799_v20 }
 0xd6a   :  { %v15104_v15 = vpop.eup %15103  ;;  %14797 = vmatpush3.bf16.msra.mxu1 %v14796_v31  ;;  %14325 = vmatprep.mubr.msk.f32.mxu1 %vm15192_vm1, %v15193_v27  ;;  %v5580_v22 = vmul.f32 %v15102_v54, %v16258_v51  ;;  %6600 = vst [vmem:[%s17661_s8] sm:$0xff] %v6598_v56  ;;  %v6590_v45 = vadd.f32 %v6589_v4, %v6588_v57 }
 0xd6b   :  { %14332 = vmatprep.mubr.msk.f32.mxu0 %vm15192_vm1, %v15193_v27  ;;  %v5582_v46 = vmul.f32 %v15104_v15, %v16262_v6  ;;  %v6471_v6 = vld [vmem:[%s17660_s5 + $0x40] sm:$0xff] }
 0xd6c   :  { %v6591_v50 = vsel %vm3035_vm5, %v5580_v22, 0.0  ;;  %v14990_v9 = vpack.i.bf16 %v6472_v62, %v6471_v6 }
 0xd6d   :  { %14326 = vmatmul.mubr.msk.f32.vlgmr.msra.gmra.mrb[46].mxu1 %vm3035_vm5, %v5580_v22  ;;  %v6592_v60 = vadd.f32 %v6591_v50, %v6590_v45  ;;  %14333 = vmatmul.mubr.msk.f32.vlgmr.msra.gmra.mrb[38].mxu0 %vm3035_vm5, %v5582_v46  ;;  %v6593_v25 = vsel %vm3035_vm5, %v5582_v46, 0.0 }
 0xd6e   :  { %14991 = vrot.lane.b32.xlu1 %v14990_v9, %s15194_s18 }
 0xd6f   :  { %v6594_v51 = vadd.f32 %v6593_v25, %v6592_v60 }
 0xd71   :  { %v6597_v1 = vmul.f32 0.25, %v6594_v51 }
 0xd73   :  { %v6599_v8 = vsel %vm3035_vm5, %v6597_v1, 0.0 }
 0xd74   :  { %6601 = vst [vmem:[%s17661_s8 + $0x18] sm:$0xff] %v6599_v8 }
 0xe02   :  { %v5652_v52 = vpop.f32.mrb[30].mxu0 }
 0xe03   :  { %v14285_v59 = vpop.f32.mrb[31].mxu0 }
 0xe06   :  { %v5725_v55 = vpop.f32.mrb[32].mxu0 }
 0xe07   :  { %v14292_v23 = vpop.f32.mrb[33].mxu0 }
 0xe0b   :  { %v5798_v42 = vpop.f32.mrb[42].mxu1 }
 0xe0c   :  { %v6167_v32 = vcombine.low %v5652_v52, %v5798_v42  ;;  %v6168_v0 = vcombine.high %v5652_v52, %v5798_v42  ;;  %v14299_v43 = vpop.f32.mrb[43].mxu1 }
 0xe0e   :  { %v6175_v17 = vrot.slane %v6167_v32, %v15458_v61  ;;  %v6182_v2 = vrot.slane %v6168_v0, %v15458_v61 }
 0xe37   :  { %v5871_v44 = vpop.f32.mrb[34].mxu0 }
 0xe38   :  { %v6183_v53 = vcombine.low %v5725_v55, %v5871_v44  ;;  %v6184_v40 = vcombine.high %v5725_v55, %v5871_v44  ;;  %v14306_v63 = vpop.f32.mrb[35].mxu0 }
 0xe39   :  { %v14992_v63 = vpop.permute.xlu1 %14991 }
 0xe3a   :  { %v6191_v37 = vrot.slane %v6183_v53, %v15458_v61  ;;  %v6198_v29 = vrot.slane %v6184_v40, %v15458_v61 }
 0xe3b   :  { %v6017_v35 = vpop.f32.mrb[36].mxu0 }
 0xe3c   :  { %v6199_v48 = vcombine.low %v6175_v17, %v6191_v37  ;;  %v6200_v39 = vcombine.high %v6175_v17, %v6191_v37  ;;  %v6215_v38 = vcombine.low %v6182_v2, %v6198_v29  ;;  %v6216_v28 = vcombine.high %v6182_v2, %v6198_v29  ;;  %v5944_v47 = vpop.f32.mrb[44].mxu1  ;;  %v14320_v3 = vpop.f32.mrb[37].mxu0 }
 0xe3d   :  { %v14313_v30 = vpop.f32.mrb[45].mxu1  ;;  %v14987_v17 = vpop.permute.xlu0 %14986 }
 0xe3e   :  { %v6207_v49 = vrot.slane %v6199_v48, %v15464_v5  ;;  %v6214_v13 = vrot.slane %v6200_v39, %v15464_v5  ;;  %v6223_v14 = vrot.slane %v6215_v38, %v15464_v5  ;;  %v6230_v19 = vrot.slane %v6216_v28, %v15464_v5 }
 0xe3f   :  { %v14989_v3 = vunpack.i.h.bf16 %v14987_v17  ;;  %v14988_v30 = vunpack.i.l.bf16 %v14987_v17  ;;  %v6648_v17 = vld [vmem:[%s17660_s5 + $0x8] sm:$0xff] }
 0xe40   :  { %v6303_v26 = vcombine.low %v6207_v49, %v6214_v13  ;;  %v13535_v33 = vcombine.high %v6207_v49, %v6214_v13  ;;  %v6319_v34 = vcombine.low %v6223_v14, %v6230_v19  ;;  %v13536_v20 = vcombine.high %v6223_v14, %v6230_v19  ;;  %v6090_v4 = vpop.f32.mrb[46].mxu1  ;;  %v6163_v31 = vpop.f32.mrb[38].mxu0 }
 0xe41   :  { %v6235_v54 = vcombine.low %v5944_v47, %v6090_v4  ;;  %v6236_v56 = vcombine.high %v5944_v47, %v6090_v4  ;;  %v6251_v57 = vcombine.low %v6017_v35, %v6163_v31  ;;  %v6252_v15 = vcombine.high %v6017_v35, %v6163_v31  ;;  %v14327_v22 = vpop.f32.mrb[47].mxu1  ;;  %v14334_v45 = vpop.f32.mrb[39].mxu0 }
 0xe42   :  { %v6310_v46 = vrot.slane %v6303_v26, %v15458_v61  ;;  %v6318_v50 = vrot.slane %v13535_v33, %v15458_v61  ;;  %v6326_v60 = vrot.slane %v6319_v34, %v15458_v61  ;;  %v6334_v25 = vrot.slane %v13536_v20, %v15458_v61 }
 0xe43   :  { %v6243_v51 = vrot.slane %v6235_v54, %v15458_v61  ;;  %v6250_v1 = vrot.slane %v6236_v56, %v15458_v61  ;;  %v6259_v8 = vrot.slane %v6251_v57, %v15458_v61  ;;  %v6266_v6 = vrot.slane %v6252_v15, %v15458_v61 }
 0xe44   :  { %v6335_v62 = vcombine.low %v6310_v46, %v6318_v50  ;;  %v6351_v21 = vcombine.low %v6326_v60, %v6334_v25  ;;  %v6336_v9 = vcombine.high %v6310_v46, %v6318_v50  ;;  %v6352_v10 = vcombine.high %v6326_v60, %v6334_v25  ;;  %v13539_v25 = vld [vmem:[%s17659_s7 + $0x2] ss:$0 sm:$0xff] }
 0xe45   :  { %v6267_v24 = vcombine.low %v6243_v51, %v6259_v8  ;;  %v6268_v52 = vcombine.high %v6243_v51, %v6259_v8  ;;  %v6283_v59 = vcombine.low %v6250_v1, %v6266_v6  ;;  %v6284_v55 = vcombine.high %v6250_v1, %v6266_v6 }
 0xe46   :  { %v6343_v23 = vrot.slane %v6335_v62, %v15464_v5  ;;  %v6359_v42 = vrot.slane %v6351_v21, %v15464_v5  ;;  %v6350_v32 = vrot.slane %v6336_v9, %v15464_v5  ;;  %v6366_v0 = vrot.slane %v6352_v10, %v15464_v5 }
 0xe47   :  { %v6275_v43 = vrot.slane %v6267_v24, %v15464_v5  ;;  %v6282_v44 = vrot.slane %v6268_v52, %v15464_v5  ;;  %v6291_v53 = vrot.slane %v6283_v59, %v15464_v5  ;;  %v6298_v40 = vrot.slane %v6284_v55, %v15464_v5 }
 0xe48   :  { %v6368_v2 = vcombine.high %v6343_v23, %v6359_v42  ;;  %v6369_v37 = vcombine.low %v6350_v32, %v6366_v0  ;;  %v6370_v29 = vcombine.high %v6350_v32, %v6366_v0  ;;  %v14994_v35 = vunpack.i.h.bf16 %v14992_v63 }
 0xe49   :  { %v6371_v48 = vcombine.low %v6275_v43, %v6282_v44  ;;  %v13537_v39 = vcombine.high %v6275_v43, %v6282_v44  ;;  %v6387_v38 = vcombine.low %v6291_v53, %v6298_v40  ;;  %v13538_v28 = vcombine.high %v6291_v53, %v6298_v40 }
 0xe4a   :  { %6441 = vrot.lane.b32.xlu1 %v6368_v2, %s15201_s25  ;;  %v14993_v47 = vunpack.i.l.bf16 %v14992_v63  ;;  %v6367_v49 = vcombine.low %v6343_v23, %v6359_v42  ;;  %v14801_v33 = vpack.c.bf16 %v14989_v3, %v14988_v30 }
 0xe4b   :  { %v6378_v13 = vrot.slane %v6371_v48, %v15458_v61  ;;  %v6386_v14 = vrot.slane %v13537_v39, %v15458_v61  ;;  %v6394_v19 = vrot.slane %v6387_v38, %v15458_v61  ;;  %v6402_v26 = vrot.slane %v13538_v28, %v15458_v61 }
 0xe4c   :  { %v14805_v34 = vpack.c.bf16 %v14994_v35, %v14993_v47  ;;  %14802 = vmatprep.subr.bf16.mxu1 %v14801_v33 }
 0xe4d   :  { %v6403_v20 = vcombine.low %v6378_v13, %v6386_v14  ;;  %v6419_v4 = vcombine.low %v6394_v19, %v6402_v26  ;;  %v6404_v31 = vcombine.high %v6378_v13, %v6386_v14  ;;  %v6420_v54 = vcombine.high %v6394_v19, %v6402_v26  ;;  %14804 = vmatpush3.bf16.msra.mxu1 %v14801_v33  ;;  %v6651_v13 = vld [vmem:[%s17660_s5 + $0x50] sm:$0xff] }
 0xe4e   :  { %6449 = vrot.lane.b32.xlu1 %v6369_v37, %s15202_s26  ;;  %14806 = vmatprep.subr.bf16.mxu1 %v14805_v34 }
 0xe4f   :  { %v6411_v56 = vrot.slane %v6403_v20, %v15464_v5  ;;  %v6427_v57 = vrot.slane %v6419_v4, %v15464_v5  ;;  %v6418_v15 = vrot.slane %v6404_v31, %v15464_v5  ;;  %v6434_v22 = vrot.slane %v6420_v54, %v15464_v5  ;;  %v13544_v20 = vld [vmem:[%s17659_s7 + $0x1] ss:$0 sm:$0xff]  ;;  %v6761_v31 = vld [vmem:[%s17662_s6 + $0x8] sm:$0xff]  ;;  %v6762_v54 = vld [vmem:[%s17662_s6 + $0x10] sm:$0xff] }
 0xe50   :  { %v6760_v4 = vld [vmem:[%s17662_s6] sm:$0xff] }
 0xe51   :  { %v6436_v45 = vcombine.high %v6411_v56, %v6427_v57  ;;  %v6437_v46 = vcombine.low %v6418_v15, %v6434_v22  ;;  %v6438_v50 = vcombine.high %v6418_v15, %v6434_v22  ;;  %v6435_v60 = vcombine.low %v6411_v56, %v6427_v57  ;;  %14808 = vmatpush3.bf16.msra.mxu1 %v14805_v34  ;;  %v6763_v57 = vld [vmem:[%s17662_s6 + $0x18] sm:$0xff]  ;;  %v6764_v22 = vld [vmem:[%s17662_s6 + $0x20] sm:$0xff] }
 0xe52   :  { %6457 = vrot.lane.b32.xlu1 %v6370_v29, %s15203_s27  ;;  %v14817_v56 = vpack.c.bf16 %v6761_v31, %v6760_v4  ;;  %v14821_v15 = vpack.c.bf16 %v6763_v57, %v6762_v54  ;;  %v16537_v57 = vld [vmem:[%s17660_s5 + $0x78] sm:$0xff] }
 0xe53   :  { %6443 = vrot.lane.b32.xlu0 %v6436_v45, %s15201_s25  ;;  %v6765_v45 = vld [vmem:[%s17662_s6 + $0x28] sm:$0xff] }
 0xe54   :  { %14818 = vmatprep.subr.bf16.mxu1 %v14817_v56 }
 0xe56   :  { %6495 = vrot.lane.b32.xlu1 %v13539_v25, %s15194_s18 }
 0xe57   :  { %6451 = vrot.lane.b32.xlu0 %v6437_v46, %s15202_s26  ;;  %v14825_v46 = vpack.c.bf16 %v6765_v45, %v6764_v22  ;;  %v13556_v45 = vld [vmem:[%s17660_s5 + $0x90] sm:$0xff] }
 0xe5b   :  { %6459 = vrot.lane.b32.xlu0 %v6438_v50, %s15203_s27 }
 0xebc   :  { %v6442_v51 = vpop.permute.xlu1 %6441 }
 0xebd   :  { %v6463_v8 = vsel %vm1456_vm4, %v6367_v49, %v6442_v51  ;;  %v6650_v49 = vld [vmem:[%s17660_s5 + $0x38] sm:$0xff] }
 0xebe   :  { %v15000_v14 = vpack.i.bf16 %v6651_v13, %v6650_v49 }
 0xec0   :  { %v6450_v1 = vpop.permute.xlu1 %6449 }
 0xec1   :  { %v6465_v6 = vsel %vm3035_vm5, %v6463_v8, %v6450_v1 }
 0xec4   :  { %v6458_v62 = vpop.permute.xlu1 %6457 }
 0xec5   :  { %v6467_v21 = vsel %vm3038_vm6, %v6465_v6, %v6458_v62  ;;  %v6444_v9 = vpop.permute.xlu0 %6443 }
 0xec6   :  { %14343 = vmatprep.mubr.msk.f32.mxu1 %vm155_vm3, %v6467_v21  ;;  %v6464_v24 = vsel %vm1456_vm4, %v6435_v60, %v6444_v9 }
 0xec8   :  { %v6496_v23 = vpop.permute.xlu1 %6495 }
 0xec9   :  { %v6452_v10 = vpop.permute.xlu0 %6451 }
 0xeca   :  { %v6466_v52 = vsel %vm3035_vm5, %v6464_v24, %v6452_v10 }
 0xecd   :  { %v6460_v59 = vpop.permute.xlu0 %6459 }
 0xece   :  { %v6468_v55 = vsel %vm3038_vm6, %v6466_v52, %v6460_v59 }
 0xecf   :  { %14344 = vmatmul.mubr.msk.f32.vlgmr.msra.gmra.mrb[48].mxu1 %vm155_vm3, %v6468_v55 }
 0xed0   :  { %14820 = vmatpush3.bf16.msra.mxu1 %v14817_v56  ;;  %v16532_v56 = vld [vmem:[%s17660_s5 + $0x60] sm:$0xff] }
 0xed1   :  { %14822 = vmatprep.subr.bf16.mxu1 %v14821_v15  ;;  %v14833_v22 = vpack.c.bf16 %v16537_v57, %v16532_v56 }
 0xed4   :  { %14824 = vmatpush3.bf16.msra.mxu1 %v14821_v15  ;;  %v13552_v15 = vld [vmem:[%s17659_s7 + $0x7] ss:$0 sm:$0xff] }
 0xed5   :  { %14826 = vmatprep.subr.bf16.mxu1 %v14825_v46 }
 0xed8   :  { %14828 = vmatpush3.bf16.msra.mxu1 %v14825_v46  ;;  %v13557_v46 = vld [vmem:[%s17660_s5 + $0xa8] sm:$0xff] }
 0xfa2   :  { %v14345_v42 = vpop.f32.mrb[48].mxu1 }
 0xfa3   :  { %v6576_v32 = vadd.f32 %v14345_v42, %v6496_v23  ;;  %v6570_v0 = vpop.f32.mrb[49].mxu1  ;;  %v13543_v42 = vld [vmem:[%s17659_s7 + $0x4] ss:$0 sm:$0xff] }
 0xfa4   :  { %v6571_v43 = vadd.f32 %v6570_v0, %v6496_v23 }
 0xfa5   :  { %v16445_v44 = vadd.f32 %v6576_v32, %v15809_v7  ;;  %v6649_v7 = vld [vmem:[%s17660_s5 + $0x20] sm:$0xff] }
 0xfa6   :  { %v16448_v53 = vadd.f32 %v6571_v43, %v15812_v16  ;;  %v14995_v2 = vpack.i.bf16 %v6649_v7, %v6648_v17  ;;  %v13542_v16 = vld [vmem:[%s17659_s7 + $0x3] ss:$0 sm:$0xff] }
 0xfa7   :  { %v6607_v40 = vsel %vm155_vm3, %v16445_v44, 0.0 }
 0xfa8   :  { %6608 = vadd.xlane.f32.xlu1 %v6607_v40  ;;  %v6604_v63 = vsel %vm155_vm3, %v16448_v53, 0.0  ;;  %v6766_v40 = vld [vmem:[%s17662_s6 + $0x30] sm:$0xff] }
 0xfa9   :  { %6605 = vadd.xlane.f32.xlu0 %v6604_v63  ;;  %v6767_v63 = vld [vmem:[%s17662_s6 + $0x38] sm:$0xff] }
 0xfaa   :  { %v14829_v17 = vpack.c.bf16 %v6767_v63, %v6766_v40 }
 0xfac   :  { %14830 = vmatprep.subr.bf16.mxu1 %v14829_v17 }
 0xfad   :  { %14832 = vmatpush3.bf16.msra.mxu1 %v14829_v17 }
 0xfae   :  { %14397 = vmatprep.subr.mxu1 %v15193_v27 }
 0xfb9   :  { %14996 = vrot.lane.b32.xlu1 %v14995_v2, %s15198_s20 }
 0xfbd   :  { %6635 = vrot.lane.b32.xlu1 %v13542_v16, %s15190_s21 }
 0xfc1   :  { %6674 = vrot.lane.b32.xlu1 %v13544_v20, %s15198_s20 }
0x1035   :  { %v6609_v37 = vpop.xlane.xlu1 %6608 }
0x1036   :  { %v6611_v29 = vmul.f32 0.03125, %v6609_v37  ;;  %v6606_v35 = vpop.xlane.xlu0 %6605 }
0x1037   :  { %v6610_v48 = vmul.f32 0.03125, %v6606_v35 }
0x1038   :  { %v6613_v39 = vsub.f32 %v16445_v44, %v6611_v29 }
0x1039   :  { %v6612_v38 = vsub.f32 %v16448_v53, %v6610_v48  ;;  %v14997_v19 = vpop.permute.xlu1 %14996 }
0x103a   :  { %v6615_v28 = vmul.f32 %v6613_v39, %v6613_v39  ;;  %v14999_v26 = vunpack.i.h.bf16 %v14997_v19  ;;  %v14998_v33 = vunpack.i.l.bf16 %v14997_v19 }
0x103b   :  { %v6614_v3 = vmul.f32 %v6612_v38, %v6612_v38 }
0x103c   :  { %v6619_v47 = vsel %vm155_vm3, %v6615_v28, 0.0  ;;  %v14809_v34 = vpack.c.bf16 %v14999_v26, %v14998_v33 }
0x103d   :  { %6620 = vadd.xlane.f32.xlu0 %v6619_v47  ;;  %v6616_v30 = vsel %vm155_vm3, %v6614_v3, 0.0  ;;  %v6636_v52 = vpop.permute.xlu1 %6635 }
0x103e   :  { %14810 = vmatprep.subr.bf16.mxu0 %v14809_v34 }
0x103f   :  { %14812 = vmatpush3.bf16.msra.mxu0 %v14809_v34 }
0x1041   :  { %6617 = vadd.xlane.f32.xlu0 %v6616_v30  ;;  %v6675_v7 = vpop.permute.xlu1 %6674 }
0x1057   :  { %15001 = vrot.lane.b32.xlu0 %v15000_v14, %s15198_s20 }
0x105b   :  { %6774 = vrot.lane.b32.xlu0 %v13539_v25, %s15198_s20 }
0x10ca   :  { %v6621_v50 = vpop.xlane.xlu0 %6620 }
0x10cb   :  { %v6623_v60 = vmul.f32 0.03125, %v6621_v50  ;;  %v14837_v50 = vpack.c.bf16 %v13557_v46, %v13556_v45 }
0x10cd   :  { %v6625_v25 = vadd.f32 1e-05, %v6623_v60 }
0x10ce   :  { %v6618_v51 = vpop.xlane.xlu0 %6617 }
0x10cf   :  { %15105 = vrsqrt.f32 %v6625_v25  ;;  %v6622_v1 = vmul.f32 0.03125, %v6618_v51 }
0x10d1   :  { %v6624_v8 = vadd.f32 1e-05, %v6622_v1 }
0x10d2   :  { %v15002_v6 = vpop.permute.xlu0 %15001 }
0x10d3   :  { %15107 = vrsqrt.f32 %v6624_v8  ;;  %v15004_v62 = vunpack.i.h.bf16 %v15002_v6  ;;  %v15003_v21 = vunpack.i.l.bf16 %v15002_v6 }
0x10d5   :  { %v14813_v9 = vpack.c.bf16 %v15004_v62, %v15003_v21 }
0x10d7   :  { %14814 = vmatprep.subr.bf16.mxu0 %v14813_v9 }
0x10d8   :  { %14816 = vmatpush3.bf16.msra.mxu0 %v14813_v9 }
0x10d9   :  { %v15106_v10 = vpop.eup %15105  ;;  %14834 = vmatprep.subr.bf16.mxu0 %v14833_v22 }
0x10da   :  { %v6629_v24 = vmul.f32 %v15106_v10, %v6613_v39  ;;  %v6775_v39 = vpop.permute.xlu0 %6774 }
0x10dc   :  { %v6639_v23 = vmul.f32 %v6636_v52, %v6629_v24 }
0x10dd   :  { %v15108_v59 = vpop.eup %15107 }
0x10de   :  { %v6628_v55 = vmul.f32 %v15108_v59, %v6612_v38  ;;  %v6647_v43 = vadd.f32 %v13543_v42, %v6639_v23 }
0x10e0   :  { %v6638_v32 = vmul.f32 %v6636_v52, %v6628_v55  ;;  %v13553_v52 = vld [vmem:[%s17659_s7 + $0x8] ss:$0 sm:$0xff] }
0x10e2   :  { %v6646_v0 = vadd.f32 %v13543_v42, %v6638_v32  ;;  %v13559_v32 = vld [vmem:[%s17659_s7 + $0x5] ss:$0 sm:$0xff] }
0x10e4   :  { %14354 = vmatprep.mubr.msk.f32.mxu0 %vm155_vm3, %v6646_v0 }
0x10e5   :  { %14355 = vmatmul.mubr.msk.f32.vlgmr.msra.gmra.mrb[40].mxu0 %vm155_vm3, %v6647_v43 }
0x10e6   :  { %14836 = vmatpush3.bf16.msra.mxu0 %v14833_v22 }
0x10e7   :  { %14838 = vmatprep.subr.bf16.mxu0 %v14837_v50 }
0x10ea   :  { %14840 = vmatpush3.bf16.msra.mxu0 %v14837_v50 }
0x10eb   :  { %14387 = vmatprep.subr.mxu0 %v15193_v27 }
0x11b8   :  { %v14356_v2 = vpop.f32.mrb[40].mxu0 }
0x11b9   :  { %v6755_v16 = vadd.f32 %v14356_v2, %v6675_v7  ;;  %v6749_v37 = vpop.f32.mrb[41].mxu0 }
0x11ba   :  { %v6750_v29 = vadd.f32 %v6749_v37, %v6675_v7 }
0x11bb   :  { %v6759_v48 = vmax.f32 %v6755_v16, 0.0 }
0x11bc   :  { %v6758_v35 = vmax.f32 %v6750_v29, 0.0 }
0x11be   :  { %14373 = vmatprep.mubr.msk.f32.mxu1 %vm6777_vm8, %v6758_v35 }
0x11bf   :  { %14374 = vmatmul.mubr.msk.f32.vlgmr.msra.gmra.mrb[50].mxu1 %vm6777_vm8, %v6759_v48 }
0x11c0   :  { %14399 = vmatprep.mubr.msk.f32.mxu1 %vm15192_vm1, %v15193_v27 }
0x1292   :  { %v14375_v38 = vpop.f32.mrb[50].mxu1 }
0x1293   :  { %v6856_v28 = vadd.f32 %v14375_v38, %v6775_v39  ;;  %v6850_v47 = vpop.f32.mrb[51].mxu1 }
0x1294   :  { %v6851_v3 = vadd.f32 %v6850_v47, %v6775_v39 }
0x1295   :  { %v16516_v30 = vadd.f32 %v6856_v28, %v16445_v44 }
0x1296   :  { %v16519_v49 = vadd.f32 %v6851_v3, %v16448_v53 }
0x1297   :  { %v6867_v13 = vsel %vm155_vm3, %v16516_v30, 0.0 }
0x1298   :  { %6868 = vadd.xlane.f32.xlu0 %v6867_v13  ;;  %v6864_v14 = vsel %vm155_vm3, %v16519_v49, 0.0 }
0x1299   :  { %6865 = vadd.xlane.f32.xlu1 %v6864_v14 }
0x1325   :  { %v6869_v19 = vpop.xlane.xlu0 %6868 }
0x1326   :  { %v6871_v26 = vmul.f32 0.03125, %v6869_v19  ;;  %v6866_v33 = vpop.xlane.xlu1 %6865 }
0x1327   :  { %v6870_v34 = vmul.f32 0.03125, %v6866_v33 }
0x1328   :  { %v6873_v20 = vsub.f32 %v16516_v30, %v6871_v26 }
0x1329   :  { %v6872_v44 = vsub.f32 %v16519_v49, %v6870_v34 }
0x132a   :  { %v6875_v4 = vmul.f32 %v6873_v20, %v6873_v20 }
0x132b   :  { %v6874_v31 = vmul.f32 %v6872_v44, %v6872_v44 }
0x132c   :  { %v6879_v53 = vsel %vm155_vm3, %v6875_v4, 0.0 }
0x132d   :  { %6880 = vadd.xlane.f32.xlu1 %v6879_v53  ;;  %v6876_v54 = vsel %vm155_vm3, %v6874_v31, 0.0 }
0x132e   :  { %6877 = vadd.xlane.f32.xlu0 %v6876_v54 }
0x1344   :  { %6895 = vrot.lane.b32.xlu0 %v13552_v15, %s15190_s21 }
0x13ba   :  { %v6881_v60 = vpop.xlane.xlu1 %6880 }
0x13bb   :  { %v6883_v25 = vmul.f32 0.03125, %v6881_v60  ;;  %v6878_v51 = vpop.xlane.xlu0 %6877 }
0x13bc   :  { %v6882_v1 = vmul.f32 0.03125, %v6878_v51 }
0x13bd   :  { %v6885_v8 = vadd.f32 1e-05, %v6883_v25 }
0x13be   :  { %v6884_v6 = vadd.f32 1e-05, %v6882_v1 }
0x13bf   :  { %15109 = vrsqrt.f32 %v6885_v8  ;;  %v6896_v21 = vpop.permute.xlu0 %6895 }
0x13c0   :  { %15111 = vrsqrt.f32 %v6884_v6 }
0x13c9   :  { %v15110_v62 = vpop.eup %15109 }
0x13ca   :  { %v15112_v9 = vpop.eup %15111  ;;  %v6889_v10 = vmul.f32 %v15110_v62, %v6873_v20 }
0x13cb   :  { %v6888_v24 = vmul.f32 %v15112_v9, %v6872_v44 }
0x13cc   :  { %v6899_v59 = vmul.f32 %v6896_v21, %v6889_v10 }
0x13cd   :  { %v6898_v55 = vmul.f32 %v6896_v21, %v6888_v24 }
0x13ce   :  { %v6907_v42 = vadd.f32 %v13553_v52, %v6899_v59 }
0x13cf   :  { %v6906_v23 = vadd.f32 %v13553_v52, %v6898_v55 }
0x13d1   :  { %14384 = vmatprep.mubr.msk.f32.mxu0 %vm155_vm3, %v6906_v23 }
0x13d2   :  { %14385 = vmatmul.mubr.msk.f32.vlgmr.msra.gmra.mrb[42].mxu0 %vm155_vm3, %v6907_v42 }
0x13d3   :  { %14389 = vmatprep.mubr.msk.f32.mxu0 %vm15192_vm1, %v15193_v27 }
0x14a5   :  { %v14386_v0 = vpop.f32.mrb[42].mxu0 }
0x14a6   :  { %v6992_v43 = vpop.f32.mrb[43].mxu0  ;;  %v16564_v63 = vadd.f32 %v14386_v0, %v13559_v32 }
0x14a7   :  { %v6993_v40 = vadd.f32 %v13559_v32, %v6992_v43 }
0x14a9   :  { %7015 = vrot.lane.b32.xlu0 %v6993_v40, %s15197_s19  ;;  %7003 = vrot.lane.b32.xlu1 %v6993_v40, %s15195_s17 }
0x14ad   :  { %7011 = vrot.lane.b32.xlu0 %v16564_v63, %s15196_s1  ;;  %7009 = vrot.lane.b32.xlu1 %v6993_v40, %s15196_s1 }
0x14b1   :  { %7293 = vrot.lane.b32.xlu0 %v6993_v40, %s15194_s18  ;;  %7005 = vrot.lane.b32.xlu1 %v16564_v63, %s15195_s17 }
0x14b5   :  { %7017 = vrot.lane.b32.xlu1 %v16564_v63, %s15197_s19 }
0x151b   :  { %v16574_v17 = vpop.permute.xlu1 %7003  ;;  %v16578_v7 = vpop.permute.xlu0 %7015 }
0x151c   :  { %7297 = vrot.lane.b32.xlu1 %v16574_v17, %s15194_s18  ;;  %v7037_v39 = vcombine.low %v16574_v17, %v16578_v7  ;;  %v7038_v38 = vcombine.high %v16574_v17, %v16578_v7 }
0x151e   :  { %v7045_v3 = vrot.slane %v7037_v39, %v15458_v61  ;;  %v7052_v13 = vrot.slane %v7038_v38, %v15458_v61 }
0x151f   :  { %v16580_v2 = vpop.permute.xlu1 %7009  ;;  %v16594_v29 = vpop.permute.xlu0 %7011 }
0x1520   :  { %7305 = vrot.lane.b32.xlu1 %v16578_v7, %s15194_s18  ;;  %7301 = vrot.lane.b32.xlu0 %v16580_v2, %s15194_s18  ;;  %v7021_v35 = vcombine.low %v6993_v40, %v16580_v2  ;;  %v7022_v48 = vcombine.high %v6993_v40, %v16580_v2  ;;  %v7089_v45 = vcombine.low %v16564_v63, %v16594_v29 }
0x1521   :  { %v7090_v50 = vcombine.high %v16564_v63, %v16594_v29 }
0x1522   :  { %v7029_v28 = vrot.slane %v7021_v35, %v15458_v61  ;;  %v7036_v47 = vrot.slane %v7022_v48, %v15458_v61  ;;  %v7097_v62 = vrot.slane %v7089_v45, %v15458_v61 }
0x1523   :  { %v16586_v16 = vpop.permute.xlu1 %7005  ;;  %v7294_v21 = vpop.permute.xlu0 %7293  ;;  %v7104_v10 = vrot.slane %v7090_v50, %v15458_v61 }
0x1524   :  { %7299 = vrot.lane.b32.xlu1 %v16586_v16, %s15194_s18  ;;  %7295 = vrot.lane.b32.xlu0 %v16564_v63, %s15194_s18  ;;  %v7053_v14 = vcombine.low %v7029_v28, %v7045_v3  ;;  %v7054_v19 = vcombine.high %v7029_v28, %v7045_v3  ;;  %v7069_v26 = vcombine.low %v7036_v47, %v7052_v13 }
0x1525   :  { %v7070_v33 = vcombine.high %v7036_v47, %v7052_v13 }
0x1526   :  { %v7061_v34 = vrot.slane %v7053_v14, %v15464_v5  ;;  %v7068_v20 = vrot.slane %v7054_v19, %v15464_v5  ;;  %v7077_v44 = vrot.slane %v7069_v26, %v15464_v5 }
0x1527   :  { %v16592_v37 = vpop.permute.xlu1 %7017  ;;  %v7084_v4 = vrot.slane %v7070_v33, %v15464_v5 }
0x1528   :  { %7307 = vrot.lane.b32.xlu1 %v16592_v37, %s15194_s18  ;;  %7303 = vrot.lane.b32.xlu0 %v16594_v29, %s15194_s18  ;;  %v7105_v31 = vcombine.low %v16586_v16, %v16592_v37  ;;  %v7157_v53 = vcombine.low %v7061_v34, %v7068_v20  ;;  %v13562_v54 = vcombine.high %v7061_v34, %v7068_v20 }
0x1529   :  { %v7173_v15 = vcombine.low %v7077_v44, %v7084_v4  ;;  %v13563_v22 = vcombine.high %v7077_v44, %v7084_v4  ;;  %v7106_v46 = vcombine.high %v16586_v16, %v16592_v37 }
0x152a   :  { %v7113_v60 = vrot.slane %v7105_v31, %v15458_v61  ;;  %v7164_v51 = vrot.slane %v7157_v53, %v15458_v61  ;;  %v7172_v1 = vrot.slane %v13562_v54, %v15458_v61 }
0x152b   :  { %v7180_v8 = vrot.slane %v7173_v15, %v15458_v61  ;;  %v7188_v6 = vrot.slane %v13563_v22, %v15458_v61  ;;  %v7120_v9 = vrot.slane %v7106_v46, %v15458_v61 }
0x152c   :  { %7589 = vrot.lane.b32.xlu1 %v6993_v40, %s15198_s20  ;;  %v7121_v24 = vcombine.low %v7097_v62, %v7113_v60  ;;  %v7122_v52 = vcombine.high %v7097_v62, %v7113_v60  ;;  %v7189_v55 = vcombine.low %v7164_v51, %v7172_v1  ;;  %v7190_v39 = vcombine.high %v7164_v51, %v7172_v1 }
0x152d   :  { %v7205_v23 = vcombine.low %v7180_v8, %v7188_v6  ;;  %v7137_v42 = vcombine.low %v7104_v10, %v7120_v9  ;;  %v7138_v32 = vcombine.high %v7104_v10, %v7120_v9  ;;  %v7206_v38 = vcombine.high %v7180_v8, %v7188_v6 }
0x152e   :  { %v7129_v28 = vrot.slane %v7121_v24, %v15464_v5  ;;  %v7136_v47 = vrot.slane %v7122_v52, %v15464_v5  ;;  %v16640_v44 = vrot.slane %v7189_v55, %v15464_v5  ;;  %v16646_v46 = vrot.slane %v7190_v39, %v15464_v5 }
0x152f   :  { %v7145_v33 = vrot.slane %v7137_v42, %v15464_v5  ;;  %v7152_v34 = vrot.slane %v7138_v32, %v15464_v5  ;;  %v16643_v4 = vrot.slane %v7205_v23, %v15464_v5  ;;  %v16649_v50 = vrot.slane %v7206_v38, %v15464_v5 }
0x1530   :  { %v7225_v22 = vcombine.low %v7129_v28, %v7136_v47  ;;  %v13564_v45 = vcombine.high %v7129_v28, %v7136_v47 }
0x1531   :  { %v7241_v6 = vcombine.low %v7145_v33, %v7152_v34  ;;  %v13565_v62 = vcombine.high %v7145_v33, %v7152_v34 }
0x1532   :  { %v16664_v28 = vrot.slane %v7225_v22, %v15458_v61  ;;  %v16667_v47 = vrot.slane %v13564_v45, %v15458_v61 }
0x158e   :  { %v7298_v25 = vpop.permute.xlu1 %7297 }
0x1592   :  { %v7306_v59 = vpop.permute.xlu1 %7305  ;;  %v7302_v0 = vpop.permute.xlu0 %7301 }
0x1593   :  { %v7333_v43 = vcombine.low %v7298_v25, %v7306_v59  ;;  %v7334_v40 = vcombine.high %v7298_v25, %v7306_v59  ;;  %v7317_v35 = vcombine.low %v7294_v21, %v7302_v0  ;;  %v7318_v48 = vcombine.high %v7294_v21, %v7302_v0 }
0x1595   :  { %v7341_v3 = vrot.slane %v7333_v43, %v15458_v61  ;;  %v7348_v13 = vrot.slane %v7334_v40, %v15458_v61  ;;  %v7325_v14 = vrot.slane %v7317_v35, %v15458_v61  ;;  %v7332_v19 = vrot.slane %v7318_v48, %v15458_v61 }
0x1596   :  { %v7300_v26 = vpop.permute.xlu1 %7299  ;;  %v7296_v20 = vpop.permute.xlu0 %7295 }
0x1597   :  { %v7349_v31 = vcombine.low %v7325_v14, %v7341_v3  ;;  %v7350_v53 = vcombine.high %v7325_v14, %v7341_v3  ;;  %v7365_v54 = vcombine.low %v7332_v19, %v7348_v13  ;;  %v7366_v15 = vcombine.high %v7332_v19, %v7348_v13 }
0x1599   :  { %v7357_v60 = vrot.slane %v7349_v31, %v15464_v5  ;;  %v7364_v25 = vrot.slane %v7350_v53, %v15464_v5  ;;  %v7373_v51 = vrot.slane %v7365_v54, %v15464_v5  ;;  %v7380_v1 = vrot.slane %v7366_v15, %v15464_v5 }
0x159a   :  { %v7308_v8 = vpop.permute.xlu1 %7307  ;;  %v7304_v21 = vpop.permute.xlu0 %7303 }
0x159b   :  { %v7401_v9 = vcombine.low %v7300_v26, %v7308_v8  ;;  %v7402_v10 = vcombine.high %v7300_v26, %v7308_v8  ;;  %v7453_v24 = vcombine.low %v7357_v60, %v7364_v25  ;;  %v13566_v52 = vcombine.high %v7357_v60, %v7364_v25 }
0x159c   :  { %v7469_v59 = vcombine.low %v7373_v51, %v7380_v1  ;;  %v13567_v55 = vcombine.high %v7373_v51, %v7380_v1  ;;  %v7385_v23 = vcombine.low %v7296_v20, %v7304_v21  ;;  %v7386_v42 = vcombine.high %v7296_v20, %v7304_v21 }
0x159d   :  { %v7409_v32 = vrot.slane %v7401_v9, %v15458_v61  ;;  %v7416_v0 = vrot.slane %v7402_v10, %v15458_v61  ;;  %v7460_v43 = vrot.slane %v7453_v24, %v15458_v61  ;;  %v7468_v40 = vrot.slane %v13566_v52, %v15458_v61 }
0x159e   :  { %v7476_v35 = vrot.slane %v7469_v59, %v15458_v61  ;;  %v7484_v48 = vrot.slane %v13567_v55, %v15458_v61  ;;  %v7393_v39 = vrot.slane %v7385_v23, %v15458_v61  ;;  %v7400_v38 = vrot.slane %v7386_v42, %v15458_v61 }
0x159f   :  { %v7485_v3 = vcombine.low %v7460_v43, %v7468_v40  ;;  %v7486_v13 = vcombine.high %v7460_v43, %v7468_v40  ;;  %v7248_v8 = vrot.slane %v7241_v6, %v15458_v61  ;;  %v7256_v21 = vrot.slane %v13565_v62, %v15458_v61 }
0x15a0   :  { %v7501_v14 = vcombine.low %v7476_v35, %v7484_v48  ;;  %v7502_v19 = vcombine.high %v7476_v35, %v7484_v48  ;;  %v7417_v26 = vcombine.low %v7393_v39, %v7409_v32  ;;  %v7418_v33 = vcombine.high %v7393_v39, %v7409_v32 }
0x15a1   :  { %v7433_v34 = vcombine.low %v7400_v38, %v7416_v0  ;;  %v7434_v20 = vcombine.high %v7400_v38, %v7416_v0  ;;  %v7493_v31 = vrot.slane %v7485_v3, %v15464_v5  ;;  %v7500_v54 = vrot.slane %v7486_v13, %v15464_v5 }
0x15a2   :  { %v7509_v53 = vrot.slane %v7501_v14, %v15464_v5  ;;  %v7516_v15 = vrot.slane %v7502_v19, %v15464_v5  ;;  %v7425_v22 = vrot.slane %v7417_v26, %v15464_v5  ;;  %v7432_v45 = vrot.slane %v7418_v33, %v15464_v5 }
0x15a3   :  { %v7441_v60 = vrot.slane %v7433_v34, %v15464_v5  ;;  %v7448_v25 = vrot.slane %v7434_v20, %v15464_v5  ;;  %v7221_v59 = vcombine.low %v16640_v44, %v16643_v4  ;;  %v7223_v62 = vcombine.low %v16646_v46, %v16649_v50 }
0x15a4   :  { %v7517_v51 = vcombine.low %v7493_v31, %v7509_v53  ;;  %v7519_v1 = vcombine.low %v7500_v54, %v7516_v15  ;;  %v7521_v9 = vcombine.low %v7425_v22, %v7432_v45  ;;  %v13568_v10 = vcombine.high %v7425_v22, %v7432_v45 }
0x15a5   :  { %v7537_v24 = vcombine.low %v7441_v60, %v7448_v25  ;;  %v13569_v52 = vcombine.high %v7441_v60, %v7448_v25  ;;  %v7518_v32 = vcombine.high %v7493_v31, %v7509_v53  ;;  %v7257_v0 = vcombine.low %v16664_v28, %v16667_v47 }
0x15a6   :  { %14388 = vmatpush3.xpose.msk.msra.mxu0 %vm1456_vm4, %v7517_v51  ;;  %14398 = vmatpush3.xpose.msk.msra.mxu1 %vm1456_vm4, %v7519_v1  ;;  %v7528_v55 = vrot.slane %v7521_v9, %v15458_v61  ;;  %v7536_v23 = vrot.slane %v13568_v10, %v15458_v61  ;;  %v7273_v43 = vcombine.low %v7248_v8, %v7256_v21 }
0x15a7   :  { %v7544_v42 = vrot.slane %v7537_v24, %v15458_v61  ;;  %v7552_v6 = vrot.slane %v13569_v52, %v15458_v61  ;;  %14392 = vmatprep.subr.mxu0 %v15193_v27  ;;  %14407 = vmatprep.subr.mxu1 %v15193_v27  ;;  %v7222_v38 = vcombine.high %v16640_v44, %v16643_v4 }
0x15a8   :  { %v7553_v40 = vcombine.low %v7528_v55, %v7536_v23  ;;  %v7554_v35 = vcombine.high %v7528_v55, %v7536_v23  ;;  %v7258_v14 = vcombine.high %v16664_v28, %v16667_v47  ;;  %v7520_v19 = vcombine.high %v7500_v54, %v7516_v15 }
0x15a9   :  { %v7569_v48 = vcombine.low %v7544_v42, %v7552_v6  ;;  %v7570_v39 = vcombine.high %v7544_v42, %v7552_v6  ;;  %14390 = vmatmul.mubr.msk.f32.vlgmr.msra.gmra.mrb[44].mxu0 %vm1456_vm4, %v7221_v59  ;;  %14400 = vmatmul.mubr.msk.f32.vlgmr.msra.gmra.mrb[52].mxu1 %vm1456_vm4, %v7223_v62  ;;  %v7265_v26 = vrot.slane %v7257_v0, %v15464_v5 }
0x15aa   :  { %14393 = vmatpush3.xpose.msk.msra.mxu0 %vm1456_vm4, %v7518_v32  ;;  %14394 = vmatprep.mubr.msk.f32.mxu0 %vm15192_vm1, %v15193_v27  ;;  %v7561_v3 = vrot.slane %v7553_v40, %v15464_v5  ;;  %v7281_v44 = vrot.slane %v7273_v43, %v15464_v5  ;;  %v7274_v4 = vcombine.high %v7248_v8, %v7256_v21 }
0x15ab   :  { %14402 = vmatprep.subr.mxu0 %v15193_v27  ;;  %v7577_v13 = vrot.slane %v7569_v48, %v15464_v5  ;;  %14409 = vmatprep.mubr.msk.f32.mxu1 %vm15192_vm1, %v15193_v27  ;;  %v7568_v34 = vrot.slane %v7554_v35, %v15464_v5  ;;  %v7584_v20 = vrot.slane %v7570_v39, %v15464_v5 }
0x15ac   :  { %v7224_v28 = vcombine.high %v16646_v46, %v16649_v50  ;;  %v7289_v47 = vcombine.low %v7265_v26, %v7281_v44  ;;  %v7272_v53 = vrot.slane %v7258_v14, %v15464_v5  ;;  %v7288_v54 = vrot.slane %v7274_v4, %v15464_v5 }
0x15ad   :  { %14395 = vmatmul.mubr.msk.f32.vlgmr.msra.gmra.mrb[46].mxu0 %vm1456_vm4, %v7222_v38  ;;  %v7585_v33 = vcombine.low %v7561_v3, %v7577_v13  ;;  %v7586_v31 = vcombine.high %v7561_v3, %v7577_v13  ;;  %v7587_v15 = vcombine.low %v7568_v34, %v7584_v20  ;;  %v7290_v46 = vcombine.high %v7265_v26, %v7281_v44  ;;  %v7590_v3 = vpop.permute.xlu1 %7589 }
0x15ae   :  { %14403 = vmatpush3.xpose.msk.msra.mxu0 %vm1456_vm4, %v7520_v19  ;;  %14404 = vmatprep.mubr.msk.f32.mxu0 %vm15192_vm1, %v15193_v27  ;;  %v7291_v50 = vcombine.low %v7272_v53, %v7288_v54  ;;  %v7588_v22 = vcombine.high %v7568_v34, %v7584_v20  ;;  %v7292_v45 = vcombine.high %v7272_v53, %v7288_v54 }
0x15af   :  { %14408 = vmatpush3.xpose.msk.msra.mxu1 %vm1456_vm4, %v7585_v33  ;;  %14412 = vmatprep.subr.mxu0 %v15193_v27 }
0x15b0   :  { %14417 = vmatprep.subr.mxu1 %v15193_v27 }
0x15b1   :  { %14405 = vmatmul.mubr.msk.f32.vlgmr.msra.gmra.mrb[48].mxu0 %vm1456_vm4, %v7224_v28 }
0x15b2   :  { %14410 = vmatmul.mubr.msk.f32.vlgmr.msra.gmra.mrb[54].mxu1 %vm1456_vm4, %v7289_v47  ;;  %14413 = vmatpush3.xpose.msk.msra.mxu0 %vm1456_vm4, %v7586_v31 }
0x15b3   :  { %14418 = vmatpush3.xpose.msk.msra.mxu1 %vm1456_vm4, %v7587_v15  ;;  %14414 = vmatprep.mubr.msk.f32.mxu0 %vm15192_vm1, %v15193_v27 }
0x15b4   :  { %14419 = vmatprep.mubr.msk.f32.mxu1 %vm15192_vm1, %v15193_v27  ;;  %14422 = vmatprep.subr.mxu0 %v15193_v27 }
0x15b5   :  { %14415 = vmatmul.mubr.msk.f32.vlgmr.msra.gmra.mrb[50].mxu0 %vm1456_vm4, %v7290_v46  ;;  %14427 = vmatprep.subr.mxu1 %v15193_v27 }
0x15b6   :  { %14420 = vmatmul.mubr.msk.f32.vlgmr.msra.gmra.mrb[56].mxu1 %vm1456_vm4, %v7291_v50  ;;  %14423 = vmatpush3.xpose.msk.msra.mxu0 %vm1456_vm4, %v7588_v22 }
0x15b7   :  { %14424 = vmatprep.mubr.msk.f32.mxu0 %vm15192_vm1, %v15193_v27  ;;  %14432 = vmatprep.subr.mxu0 %v15193_v27 }
0x15b8   :  { %14429 = vmatprep.mubr.msk.f32.mxu1 %vm15192_vm1, %v15193_v27 }
0x15b9   :  { %14425 = vmatmul.mubr.msk.f32.vlgmr.msra.gmra.mrb[52].mxu0 %vm1456_vm4, %v7292_v45 }
0x15ba   :  { %14434 = vmatprep.mubr.msk.f32.mxu0 %vm15192_vm1, %v15193_v27 }
0x167c   :  { %v7957_v60 = vpop.f32.mrb[44].mxu0  ;;  %v8109_v25 = vpop.f32.mrb[52].mxu1 }
0x167d   :  { %v14391_v51 = vpop.f32.mrb[45].mxu0  ;;  %v8493_v1 = vsel %vm1456_vm4, %v7957_v60, -inf  ;;  %v14401_v8 = vpop.f32.mrb[53].mxu1  ;;  %v8499_v10 = vsel %vm1456_vm4, %v8109_v25, -inf }
0x167e   :  { %8494 = vmax.xlane.f32.xlu0 %v8493_v1 }
0x1680   :  { %v8033_v21 = vpop.f32.mrb[46].mxu0 }
0x1681   :  { %v14396_v9 = vpop.f32.mrb[47].mxu0  ;;  %v8496_v24 = vsel %vm1456_vm4, %v8033_v21, -inf }
0x1682   :  { %8500 = vmax.xlane.f32.xlu0 %v8499_v10  ;;  %8497 = vmax.xlane.f32.xlu1 %v8496_v24 }
0x1684   :  { %v8185_v52 = vpop.f32.mrb[48].mxu0 }
0x1685   :  { %v8261_v59 = vpop.f32.mrb[54].mxu1  ;;  %v14406_v55 = vpop.f32.mrb[49].mxu0  ;;  %v8502_v23 = vsel %vm1456_vm4, %v8185_v52, -inf }
0x1686   :  { %v14411_v42 = vpop.f32.mrb[55].mxu1  ;;  %8503 = vmax.xlane.f32.xlu0 %v8502_v23  ;;  %v8505_v6 = vsel %vm1456_vm4, %v8261_v59, -inf }
0x1687   :  { %8506 = vmax.xlane.f32.xlu1 %v8505_v6 }
0x1688   :  { %v8337_v62 = vpop.f32.mrb[50].mxu0 }
0x1689   :  { %v8413_v32 = vpop.f32.mrb[56].mxu1  ;;  %v14416_v0 = vpop.f32.mrb[51].mxu0  ;;  %v8508_v43 = vsel %vm1456_vm4, %v8337_v62, -inf }
0x168a   :  { %v14421_v40 = vpop.f32.mrb[57].mxu1  ;;  %8509 = vmax.xlane.f32.xlu0 %v8508_v43  ;;  %v8511_v35 = vsel %vm1456_vm4, %v8413_v32, -inf }
0x168b   :  { %8512 = vmax.xlane.f32.xlu1 %v8511_v35 }
0x168c   :  { %v8489_v48 = vpop.f32.mrb[52].mxu0 }
0x168d   :  { %v14426_v39 = vpop.f32.mrb[53].mxu0  ;;  %v8514_v38 = vsel %vm1456_vm4, %v8489_v48, -inf }
0x168e   :  { %8515 = vmax.xlane.f32.xlu0 %v8514_v38 }
0x169c   :  { %7597 = vrot.lane.b32.xlu1 %v16580_v2, %s15198_s20 }
0x16a0   :  { %7601 = vrot.lane.b32.xlu1 %v16578_v7, %s15198_s20 }
0x16a4   :  { %7591 = vrot.lane.b32.xlu1 %v16564_v63, %s15198_s20  ;;  %7593 = vrot.lane.b32.xlu0 %v16574_v17, %s15198_s20 }
0x170b   :  { %v8495_v13 = vpop.xlane.xlu0 %8494 }
0x170c   :  { %v8517_v14 = vsub.f32 %v7957_v60, %v8495_v13 }
0x170e   :  { %v8525_v19 = vmul.f32 1.442695, %v8517_v14 }
0x170f   :  { %v8501_v26 = vpop.xlane.xlu0 %8500  ;;  %v8498_v44 = vpop.xlane.xlu1 %8497 }
0x1710   :  { %15113 = vpow2.f32 %v8525_v19  ;;  %v8519_v4 = vsub.f32 %v8109_v25, %v8501_v26  ;;  %v8518_v33 = vsub.f32 %v8033_v21, %v8498_v44 }
0x1712   :  { %v8529_v34 = vmul.f32 1.442695, %v8519_v4  ;;  %v8527_v2 = vmul.f32 1.442695, %v8518_v33 }
0x1713   :  { %v8504_v20 = vpop.xlane.xlu0 %8503 }
0x1714   :  { %15115 = vpow2.f32 %v8529_v34  ;;  %v8520_v7 = vsub.f32 %v8185_v52, %v8504_v20  ;;  %v8507_v28 = vpop.xlane.xlu1 %8506 }
0x1715   :  { %15117 = vpow2.f32 %v8527_v2  ;;  %v8521_v63 = vsub.f32 %v8261_v59, %v8507_v28 }
0x1716   :  { %v8531_v47 = vmul.f32 1.442695, %v8520_v7 }
0x1717   :  { %v8533_v31 = vmul.f32 1.442695, %v8521_v63  ;;  %v8510_v17 = vpop.xlane.xlu0 %8509 }
0x1718   :  { %v8522_v53 = vsub.f32 %v8337_v62, %v8510_v17  ;;  %v8513_v54 = vpop.xlane.xlu1 %8512 }
0x1719   :  { %15119 = vpow2.f32 %v8533_v31  ;;  %v8523_v15 = vsub.f32 %v8413_v32, %v8513_v54 }
0x171a   :  { %v16759_v46 = vpop.eup %15113  ;;  %v8535_v50 = vmul.f32 1.442695, %v8522_v53  ;;  %15121 = vpow2.f32 %v8531_v47 }
0x171b   :  { %v8516_v22 = vpop.xlane.xlu0 %8515  ;;  %v8541_v45 = vsel %vm1456_vm4, %v16759_v46, 0.0  ;;  %v8537_v60 = vmul.f32 1.442695, %v8523_v15 }
0x171c   :  { %15123 = vpow2.f32 %v8535_v50  ;;  %v8524_v25 = vsub.f32 %v8489_v48, %v8516_v22  ;;  %v7598_v51 = vpop.permute.xlu1 %7597  ;;  %8542 = vadd.xlane.f32.xlu1 %v8541_v45 }
0x171d   :  { %v7613_v21 = vcombine.low %v7590_v3, %v7598_v51  ;;  %v7614_v9 = vcombine.high %v7590_v3, %v7598_v51  ;;  %15125 = vpow2.f32 %v8537_v60 }
0x171e   :  { %v16763_v1 = vpop.eup %15115  ;;  %v8539_v52 = vmul.f32 1.442695, %v8524_v25 }
0x171f   :  { %v16765_v8 = vpop.eup %15117  ;;  %v7594_v10 = vpop.permute.xlu0 %7593  ;;  %v8547_v24 = vsel %vm1456_vm4, %v16763_v1, 0.0  ;;  %v7621_v62 = vrot.slane %v7613_v21, %v15458_v61  ;;  %v7628_v32 = vrot.slane %v7614_v9, %v15458_v61 }
0x1720   :  { %v7602_v59 = vpop.permute.xlu1 %7601  ;;  %8548 = vadd.xlane.f32.xlu1 %v8547_v24  ;;  %v8544_v55 = vsel %vm1456_vm4, %v16765_v8, 0.0  ;;  %15127 = vpow2.f32 %v8539_v52 }
0x1721   :  { %v7629_v23 = vcombine.low %v7594_v10, %v7602_v59  ;;  %v7630_v42 = vcombine.high %v7594_v10, %v7602_v59  ;;  %8545 = vadd.xlane.f32.xlu0 %v8544_v55 }
0x1723   :  { %v16771_v6 = vpop.eup %15119  ;;  %v7637_v0 = vrot.slane %v7629_v23, %v15458_v61  ;;  %v7644_v43 = vrot.slane %v7630_v42, %v15458_v61 }
0x1724   :  { %v8553_v40 = vsel %vm1456_vm4, %v16771_v6, 0.0  ;;  %v16779_v35 = vpop.eup %15121  ;;  %v7592_v55 = vpop.permute.xlu1 %7591 }
0x1725   :  { %v7645_v48 = vcombine.low %v7621_v62, %v7637_v0  ;;  %v7646_v39 = vcombine.high %v7621_v62, %v7637_v0  ;;  %v7661_v38 = vcombine.low %v7628_v32, %v7644_v43  ;;  %v7662_v3 = vcombine.high %v7628_v32, %v7644_v43  ;;  %8554 = vadd.xlane.f32.xlu0 %v8553_v40 }
0x1726   :  { %v16781_v13 = vpop.eup %15123  ;;  %v8550_v33 = vsel %vm1456_vm4, %v16779_v35, 0.0 }
0x1727   :  { %v7653_v14 = vrot.slane %v7645_v48, %v15464_v5  ;;  %v7660_v19 = vrot.slane %v7646_v39, %v15464_v5  ;;  %v7669_v26 = vrot.slane %v7661_v38, %v15464_v5  ;;  %v7676_v44 = vrot.slane %v7662_v3, %v15464_v5  ;;  %v16791_v28 = vpop.eup %15125 }
0x1728   :  { %v8556_v4 = vsel %vm1456_vm4, %v16781_v13, 0.0  ;;  %v8559_v53 = vsel %vm1456_vm4, %v16791_v28, 0.0 }
0x1729   :  { %v7749_v34 = vcombine.low %v7653_v14, %v7660_v19  ;;  %v13570_v2 = vcombine.high %v7653_v14, %v7660_v19  ;;  %v7765_v20 = vcombine.low %v7669_v26, %v7676_v44  ;;  %v13571_v7 = vcombine.high %v7669_v26, %v7676_v44  ;;  %8557 = vadd.xlane.f32.xlu1 %v8556_v4 }
0x172a   :  { %8551 = vadd.xlane.f32.xlu0 %v8550_v33  ;;  %v16799_v50 = vpop.eup %15127 }
0x172b   :  { %v7756_v63 = vrot.slane %v7749_v34, %v15458_v61  ;;  %v7764_v47 = vrot.slane %v13570_v2, %v15458_v61  ;;  %v7772_v31 = vrot.slane %v7765_v20, %v15458_v61  ;;  %v7780_v17 = vrot.slane %v13571_v7, %v15458_v61 }
0x172c   :  { %v8562_v9 = vsel %vm1456_vm4, %v16799_v50, 0.0 }
0x172d   :  { %v7781_v54 = vcombine.low %v7756_v63, %v7764_v47  ;;  %v7782_v15 = vcombine.high %v7756_v63, %v7764_v47  ;;  %v7797_v22 = vcombine.low %v7772_v31, %v7780_v17  ;;  %v7798_v45 = vcombine.high %v7772_v31, %v7780_v17 }
0x172e   :  { %8560 = vadd.xlane.f32.xlu0 %v8559_v53 }
0x172f   :  { %v7789_v60 = vrot.slane %v7781_v54, %v15464_v5  ;;  %v7796_v25 = vrot.slane %v7782_v15, %v15464_v5  ;;  %v7805_v51 = vrot.slane %v7797_v22, %v15464_v5  ;;  %v7812_v21 = vrot.slane %v7798_v45, %v15464_v5 }
0x1731   :  { %v7813_v10 = vcombine.low %v7789_v60, %v7805_v51  ;;  %v7814_v24 = vcombine.high %v7789_v60, %v7805_v51  ;;  %v7815_v52 = vcombine.low %v7796_v25, %v7812_v21  ;;  %v7816_v59 = vcombine.high %v7796_v25, %v7812_v21 }
0x1732   :  { %8563 = vadd.xlane.f32.xlu0 %v8562_v9 }
0x1733   :  { %14428 = vmatpush3.msra.mxu1 %v7813_v10  ;;  %14433 = vmatpush3.msra.mxu0 %v7814_v24 }
0x1734   :  { %14437 = vmatprep.subr.mxu1 %v15193_v27  ;;  %14442 = vmatprep.subr.mxu0 %v15193_v27 }
0x173a   :  { %7599 = vrot.lane.b32.xlu1 %v16594_v29, %s15198_s20 }
0x173e   :  { %7603 = vrot.lane.b32.xlu1 %v16592_v37, %s15198_s20 }
0x1748   :  { %7595 = vrot.lane.b32.xlu0 %v16586_v16, %s15198_s20 }
0x17a9   :  { %v8543_v23 = vpop.xlane.xlu1 %8542 }
0x17aa   :  { %15129 = vrcp.f32 %v8543_v23 }
0x17ad   :  { %v8549_v42 = vpop.xlane.xlu1 %8548 }
0x17ae   :  { %v8546_v62 = vpop.xlane.xlu0 %8545  ;;  %15131 = vrcp.f32 %v8549_v42 }
0x17af   :  { %15133 = vrcp.f32 %v8546_v62 }
0x17b2   :  { %v8555_v32 = vpop.xlane.xlu0 %8554 }
0x17b4   :  { %v15130_v0 = vpop.eup %15129 }
0x17b5   :  { %v8573_v43 = vmul.f32 %v15130_v0, %v16759_v46 }
0x17b6   :  { %v8558_v48 = vpop.xlane.xlu1 %8557 }
0x17b7   :  { %v8552_v40 = vpop.xlane.xlu0 %8551  ;;  %14430 = vmatmul.mubr.msk.f32.vlgmr.msra.gmra.mrb[58].mxu1 %vm1456_vm4, %v8573_v43 }
0x17b8   :  { %v15132_v29 = vpop.eup %15131  ;;  %15135 = vrcp.f32 %v8552_v40  ;;  %14438 = vmatpush3.msra.mxu1 %v7815_v52  ;;  %14439 = vmatprep.mubr.msk.f32.mxu1 %vm15192_vm1, %v15193_v27 }
0x17b9   :  { %v15134_v16 = vpop.eup %15133  ;;  %v8575_v37 = vmul.f32 %v15132_v29, %v16763_v1  ;;  %14447 = vmatprep.subr.mxu1 %v15193_v27  ;;  %15137 = vrcp.f32 %v8555_v32 }
0x17ba   :  { %v8574_v39 = vmul.f32 %v15134_v16, %v16765_v8  ;;  %v7600_v46 = vpop.permute.xlu1 %7599  ;;  %15139 = vrcp.f32 %v8558_v48 }
0x17bb   :  { %v8561_v38 = vpop.xlane.xlu0 %8560  ;;  %14440 = vmatmul.mubr.msk.f32.vlgmr.msra.gmra.mrb[60].mxu1 %vm1456_vm4, %v8575_v37  ;;  %v7681_v14 = vcombine.low %v7592_v55, %v7600_v46  ;;  %v7682_v19 = vcombine.high %v7592_v55, %v7600_v46 }
0x17bc   :  { %14435 = vmatmul.mubr.msk.f32.vlgmr.msra.gmra.mrb[54].mxu0 %vm1456_vm4, %v8574_v39  ;;  %14449 = vmatprep.mubr.msk.f32.mxu1 %vm15192_vm1, %v15193_v27  ;;  %15141 = vrcp.f32 %v8561_v38 }
0x17bd   :  { %14443 = vmatpush3.msra.mxu0 %v7816_v59  ;;  %14444 = vmatprep.mubr.msk.f32.mxu0 %vm15192_vm1, %v15193_v27  ;;  %v7689_v34 = vrot.slane %v7681_v14, %v15458_v61  ;;  %v7696_v2 = vrot.slane %v7682_v19, %v15458_v61 }
0x17be   :  { %14452 = vmatprep.subr.mxu0 %v15193_v27  ;;  %v7604_v26 = vpop.permute.xlu1 %7603 }
0x17bf   :  { %v8564_v1 = vpop.xlane.xlu0 %8563 }
0x17c0   :  { %15143 = vrcp.f32 %v8564_v1 }
0x17c2   :  { %v15136_v3 = vpop.eup %15135 }
0x17c3   :  { %v8576_v8 = vmul.f32 %v15136_v3, %v16779_v35  ;;  %v7596_v44 = vpop.permute.xlu0 %7595  ;;  %v15138_v24 = vpop.eup %15137 }
0x17c4   :  { %v7697_v4 = vcombine.low %v7596_v44, %v7604_v26  ;;  %v7698_v33 = vcombine.high %v7596_v44, %v7604_v26  ;;  %v15140_v42 = vpop.eup %15139  ;;  %v8577_v39 = vmul.f32 %v15138_v24, %v16771_v6  ;;  %v15005_v6 = vpack.i.bf16 %v16537_v57, %v16532_v56 }
0x17c5   :  { %14445 = vmatmul.mubr.msk.f32.vlgmr.msra.gmra.mrb[56].mxu0 %vm1456_vm4, %v8576_v8  ;;  %v8578_v37 = vmul.f32 %v15140_v42, %v16781_v13  ;;  %v13604_v13 = vld [vmem:[%s17660_s5 + $0x90] sm:$0xff] }
0x17c6   :  { %v7705_v20 = vrot.slane %v7697_v4, %v15458_v61  ;;  %v7712_v7 = vrot.slane %v7698_v33, %v15458_v61  ;;  %14454 = vmatprep.mubr.msk.f32.mxu0 %vm15192_vm1, %v15193_v27  ;;  %v15142_v0 = vpop.eup %15141  ;;  %15006 = vrot.lane.b32.xlu0 %v15005_v6, %s15190_s21 }
0x17c7   :  { %v8579_v1 = vmul.f32 %v15142_v0, %v16791_v28  ;;  %v13605_v28 = vld [vmem:[%s17660_s5 + $0xa8] sm:$0xff] }
0x17c8   :  { %v7713_v35 = vcombine.low %v7689_v34, %v7705_v20  ;;  %v7714_v63 = vcombine.high %v7689_v34, %v7705_v20  ;;  %v7729_v47 = vcombine.low %v7696_v2, %v7712_v7  ;;  %v7730_v31 = vcombine.high %v7696_v2, %v7712_v7 }
0x17ca   :  { %v7721_v17 = vrot.slane %v7713_v35, %v15464_v5  ;;  %v7728_v53 = vrot.slane %v7714_v63, %v15464_v5  ;;  %v7737_v54 = vrot.slane %v7729_v47, %v15464_v5  ;;  %v7744_v15 = vrot.slane %v7730_v31, %v15464_v5  ;;  %v15144_v16 = vpop.eup %15143 }
0x17cb   :  { %v8580_v3 = vmul.f32 %v15144_v16, %v16799_v50  ;;  %v15010_v50 = vpack.i.bf16 %v13605_v28, %v13604_v13 }
0x17cc   :  { %v7817_v22 = vcombine.low %v7721_v17, %v7728_v53  ;;  %v13572_v45 = vcombine.high %v7721_v17, %v7728_v53  ;;  %v7833_v60 = vcombine.low %v7737_v54, %v7744_v15  ;;  %v13573_v25 = vcombine.high %v7737_v54, %v7744_v15 }
0x17cd   :  { %15011 = vrot.lane.b32.xlu1 %v15010_v50, %s15190_s21 }
0x17ce   :  { %v7824_v51 = vrot.slane %v7817_v22, %v15458_v61  ;;  %v7832_v21 = vrot.slane %v13572_v45, %v15458_v61  ;;  %v7840_v9 = vrot.slane %v7833_v60, %v15458_v61  ;;  %v7848_v10 = vrot.slane %v13573_v25, %v15458_v61 }
0x17d0   :  { %v7849_v52 = vcombine.low %v7824_v51, %v7832_v21  ;;  %v7865_v59 = vcombine.low %v7840_v9, %v7848_v10  ;;  %v7850_v55 = vcombine.high %v7824_v51, %v7832_v21  ;;  %v7866_v23 = vcombine.high %v7840_v9, %v7848_v10 }
0x17d2   :  { %v7857_v62 = vrot.slane %v7849_v52, %v15464_v5  ;;  %v7873_v32 = vrot.slane %v7865_v59, %v15464_v5  ;;  %v7864_v43 = vrot.slane %v7850_v55, %v15464_v5  ;;  %v7880_v40 = vrot.slane %v7866_v23, %v15464_v5 }
0x17d4   :  { %v7881_v48 = vcombine.low %v7857_v62, %v7873_v32  ;;  %v7882_v29 = vcombine.high %v7857_v62, %v7873_v32  ;;  %v7883_v38 = vcombine.low %v7864_v43, %v7880_v40  ;;  %v7884_v46 = vcombine.high %v7864_v43, %v7880_v40 }
0x17d6   :  { %14448 = vmatpush3.msra.mxu1 %v7881_v48  ;;  %14453 = vmatpush3.msra.mxu0 %v7882_v29 }
0x17d7   :  { %14450 = vmatmul.mubr.msk.f32.vlgmr.msra.gmra.mrb[62].mxu1 %vm1456_vm4, %v8577_v39  ;;  %14455 = vmatmul.mubr.msk.f32.vlgmr.msra.gmra.mrb[58].mxu0 %vm1456_vm4, %v8578_v37 }
0x17d8   :  { %14457 = vmatprep.subr.mxu1 %v15193_v27  ;;  %14462 = vmatprep.subr.mxu0 %v15193_v27 }
0x17d9   :  { %14458 = vmatpush3.msra.mxu1 %v7883_v38  ;;  %14463 = vmatpush3.msra.mxu0 %v7884_v46 }
0x17da   :  { %14459 = vmatprep.mubr.msk.f32.mxu1 %vm15192_vm1, %v15193_v27  ;;  %14464 = vmatprep.mubr.msk.f32.mxu0 %vm15192_vm1, %v15193_v27 }
0x17db   :  { %14460 = vmatmul.mubr.msk.f32.vlgmr.msra.gmra.mrb[64].mxu1 %vm1456_vm4, %v8579_v1  ;;  %14465 = vmatmul.mubr.msk.f32.vlgmr.msra.gmra.mrb[60].mxu0 %vm1456_vm4, %v8580_v3 }
0x1838   :  { %v15007_v33 = vpop.permute.xlu0 %15006 }
0x1839   :  { %v15009_v2 = vunpack.i.h.bf16 %v15007_v33  ;;  %v15008_v20 = vunpack.i.l.bf16 %v15007_v33 }
0x183b   :  { %v14841_v47 = vpack.c.bf16 %v15009_v2, %v15008_v20 }
0x183d   :  { %14842 = vmatprep.subr.bf16.mxu1 %v14841_v47 }
0x183e   :  { %14844 = vmatpush3.bf16.msra.mxu1 %v14841_v47 }
0x188a   :  { %v8650_v14 = vpop.f32.mrb[58].mxu1 }
0x188b   :  { %v14431_v19 = vpop.f32.mrb[59].mxu1 }
0x188e   :  { %v8796_v8 = vpop.f32.mrb[60].mxu1 }
0x188f   :  { %v8723_v26 = vpop.f32.mrb[54].mxu0  ;;  %v9165_v44 = vcombine.low %v8650_v14, %v8796_v8  ;;  %v9166_v4 = vcombine.high %v8650_v14, %v8796_v8  ;;  %v14441_v56 = vpop.f32.mrb[61].mxu1 }
0x1890   :  { %v14436_v57 = vpop.f32.mrb[55].mxu0 }
0x1891   :  { %v9173_v31 = vrot.slane %v9165_v44, %v15458_v61  ;;  %v9180_v17 = vrot.slane %v9166_v4, %v15458_v61  ;;  %v15012_v57 = vpop.permute.xlu1 %15011 }
0x1898   :  { %v8869_v34 = vpop.f32.mrb[56].mxu0 }
0x1899   :  { %v9181_v7 = vcombine.low %v8723_v26, %v8869_v34  ;;  %v9182_v35 = vcombine.high %v8723_v26, %v8869_v34  ;;  %v14446_v63 = vpop.f32.mrb[57].mxu0 }
0x189b   :  { %v9189_v53 = vrot.slane %v9181_v7, %v15458_v61  ;;  %v9196_v54 = vrot.slane %v9182_v35, %v15458_v61  ;;  %v15014_v7 = vunpack.i.h.bf16 %v15012_v57  ;;  %v15013_v35 = vunpack.i.l.bf16 %v15012_v57 }
0x189d   :  { %v9197_v15 = vcombine.low %v9173_v31, %v9189_v53  ;;  %v9198_v22 = vcombine.high %v9173_v31, %v9189_v53  ;;  %v9213_v45 = vcombine.low %v9180_v17, %v9196_v54  ;;  %v9214_v60 = vcombine.high %v9180_v17, %v9196_v54 }
0x189e   :  { %v14845_v53 = vpack.c.bf16 %v15014_v7, %v15013_v35 }
0x189f   :  { %v9205_v25 = vrot.slane %v9197_v15, %v15464_v5  ;;  %v9212_v51 = vrot.slane %v9198_v22, %v15464_v5  ;;  %v9221_v21 = vrot.slane %v9213_v45, %v15464_v5  ;;  %v9228_v9 = vrot.slane %v9214_v60, %v15464_v5 }
0x18a0   :  { %14846 = vmatprep.subr.bf16.mxu1 %v14845_v53 }
0x18a1   :  { %v9301_v10 = vcombine.low %v9205_v25, %v9212_v51  ;;  %v13598_v24 = vcombine.high %v9205_v25, %v9212_v51  ;;  %v9317_v52 = vcombine.low %v9221_v21, %v9228_v9  ;;  %v13599_v59 = vcombine.high %v9221_v21, %v9228_v9  ;;  %14848 = vmatpush3.bf16.msra.mxu1 %v14845_v53 }
0x18a3   :  { %v9308_v55 = vrot.slane %v9301_v10, %v15458_v61  ;;  %v9316_v23 = vrot.slane %v13598_v24, %v15458_v61  ;;  %v9324_v42 = vrot.slane %v9317_v52, %v15458_v61  ;;  %v9332_v62 = vrot.slane %v13599_v59, %v15458_v61 }
0x18a5   :  { %v9333_v32 = vcombine.low %v9308_v55, %v9316_v23  ;;  %v9349_v0 = vcombine.low %v9324_v42, %v9332_v62  ;;  %v9334_v43 = vcombine.high %v9308_v55, %v9316_v23  ;;  %v9350_v40 = vcombine.high %v9324_v42, %v9332_v62  ;;  %v13620_v62 = vld [vmem:[%s17660_s5 + $0x68] sm:$0xff] }
0x18a7   :  { %v16886_v48 = vrot.slane %v9333_v32, %v15464_v5  ;;  %v16889_v29 = vrot.slane %v9349_v0, %v15464_v5  ;;  %v9348_v16 = vrot.slane %v9334_v43, %v15464_v5  ;;  %v9364_v37 = vrot.slane %v9350_v40, %v15464_v5  ;;  %v13621_v32 = vld [vmem:[%s17660_s5 + $0x80] sm:$0xff] }
0x18a9   :  { %v9366_v39 = vcombine.high %v16886_v48, %v16889_v29  ;;  %v9367_v38 = vcombine.low %v9348_v16, %v9364_v37  ;;  %v9368_v46 = vcombine.high %v9348_v16, %v9364_v37  ;;  %v9365_v1 = vcombine.low %v16886_v48, %v16889_v29 }
0x18aa   :  { %v8942_v3 = vpop.f32.mrb[62].mxu1  ;;  %v9015_v6 = vpop.f32.mrb[58].mxu0  ;;  %v14857_v37 = vpack.c.bf16 %v13621_v32, %v13620_v62  ;;  %v13615_v62 = vld [vmem:[%s17660_s5 + $0xb8] sm:$0xff] }
0x18ab   :  { %9439 = vrot.lane.b32.xlu0 %v9366_v39, %s15201_s25  ;;  %v14451_v13 = vpop.f32.mrb[63].mxu1  ;;  %v14456_v28 = vpop.f32.mrb[59].mxu0 }
0x18ac   :  { %14858 = vmatprep.subr.bf16.mxu1 %v14857_v37 }
0x18ae   :  { %v9088_v50 = vpop.f32.mrb[64].mxu1  ;;  %v9161_v14 = vpop.f32.mrb[60].mxu0 }
0x18af   :  { %v9233_v19 = vcombine.low %v8942_v3, %v9088_v50  ;;  %v9234_v8 = vcombine.high %v8942_v3, %v9088_v50  ;;  %v9249_v26 = vcombine.low %v9015_v6, %v9161_v14  ;;  %v9250_v44 = vcombine.high %v9015_v6, %v9161_v14  ;;  %9447 = vrot.lane.b32.xlu0 %v9367_v38, %s15202_s26  ;;  %v14461_v4 = vpop.f32.mrb[65].mxu1  ;;  %v14466_v56 = vpop.f32.mrb[61].mxu0  ;;  %v13607_v6 = vld [vmem:[%s17659_s7 + $0x5] ss:$0 sm:$0xff] }
0x18b0   :  { %v13622_v4 = vld [vmem:[%s17660_s5 + $0x98] sm:$0xff]  ;;  %v13623_v56 = vld [vmem:[%s17660_s5 + $0xb0] sm:$0xff] }
0x18b1   :  { %v9241_v33 = vrot.slane %v9233_v19, %v15458_v61  ;;  %v9248_v34 = vrot.slane %v9234_v8, %v15458_v61  ;;  %v9257_v2 = vrot.slane %v9249_v26, %v15458_v61  ;;  %v9264_v20 = vrot.slane %v9250_v44, %v15458_v61 }
0x18b2   :  { %v14861_v57 = vpack.c.bf16 %v13623_v56, %v13622_v4 }
0x18b3   :  { %v9265_v63 = vcombine.low %v9241_v33, %v9257_v2  ;;  %v9266_v47 = vcombine.high %v9241_v33, %v9257_v2  ;;  %v9281_v31 = vcombine.low %v9248_v34, %v9264_v20  ;;  %v9282_v17 = vcombine.high %v9248_v34, %v9264_v20  ;;  %9455 = vrot.lane.b32.xlu0 %v9368_v46, %s15203_s27 }
0x18b5   :  { %v9273_v54 = vrot.slane %v9265_v63, %v15464_v5  ;;  %v9280_v15 = vrot.slane %v9266_v47, %v15464_v5  ;;  %v9289_v22 = vrot.slane %v9281_v31, %v15464_v5  ;;  %v9296_v45 = vrot.slane %v9282_v17, %v15464_v5 }
0x18b7   :  { %v9369_v60 = vcombine.low %v9273_v54, %v9280_v15  ;;  %v13600_v25 = vcombine.high %v9273_v54, %v9280_v15  ;;  %v9385_v51 = vcombine.low %v9289_v22, %v9296_v45  ;;  %v13601_v21 = vcombine.high %v9289_v22, %v9296_v45  ;;  %9493 = vrot.lane.b32.xlu0 %v13607_v6, %s15190_s21 }
0x18b9   :  { %v9376_v9 = vrot.slane %v9369_v60, %v15458_v61  ;;  %v9384_v10 = vrot.slane %v13600_v25, %v15458_v61  ;;  %v9392_v24 = vrot.slane %v9385_v51, %v15458_v61  ;;  %v9400_v52 = vrot.slane %v13601_v21, %v15458_v61  ;;  %v13611_v21 = vld [vmem:[%s17659_s7 + $0x8] ss:$0 sm:$0xff] }
0x18bb   :  { %v9401_v59 = vcombine.low %v9376_v9, %v9384_v10  ;;  %v9417_v55 = vcombine.low %v9392_v24, %v9400_v52  ;;  %v9402_v23 = vcombine.high %v9376_v9, %v9384_v10  ;;  %v9418_v42 = vcombine.high %v9392_v24, %v9400_v52  ;;  %v13625_v9 = vld [vmem:[%s17659_s7 + $0x6] ss:$0 sm:$0xff] }
0x18bd   :  { %v9409_v0 = vrot.slane %v9401_v59, %v15464_v5  ;;  %v9425_v43 = vrot.slane %v9417_v55, %v15464_v5  ;;  %v9416_v40 = vrot.slane %v9402_v23, %v15464_v5  ;;  %v9432_v16 = vrot.slane %v9418_v42, %v15464_v5  ;;  %v13612_v59 = vld [vmem:[%s17660_s5 + $0x70] sm:$0xff]  ;;  %v13613_v55 = vld [vmem:[%s17660_s5 + $0x88] sm:$0xff]  ;;  %v13614_v42 = vld [vmem:[%s17660_s5 + $0xa0] sm:$0xff] }
0x18be   :  { %v14849_v23 = vpack.c.bf16 %v13613_v55, %v13612_v59 }
0x18bf   :  { %v9434_v39 = vcombine.high %v9409_v0, %v9425_v43  ;;  %v9435_v38 = vcombine.low %v9416_v40, %v9432_v16  ;;  %v9436_v46 = vcombine.high %v9416_v40, %v9432_v16  ;;  %v9433_v3 = vcombine.low %v9409_v0, %v9425_v43 }
0x18c0   :  { %14850 = vmatprep.subr.bf16.mxu0 %v14849_v23  ;;  %v14853_v0 = vpack.c.bf16 %v13615_v62, %v13614_v42 }
0x18c1   :  { %9441 = vrot.lane.b32.xlu1 %v9434_v39, %s15201_s25  ;;  %14852 = vmatpush3.bf16.msra.mxu0 %v14849_v23 }
0x18c2   :  { %14854 = vmatprep.subr.bf16.mxu0 %v14853_v0 }
0x18c5   :  { %9449 = vrot.lane.b32.xlu1 %v9435_v38, %s15202_s26  ;;  %14856 = vmatpush3.bf16.msra.mxu0 %v14853_v0 }
0x18c6   :  { %14865 = vmatprep.subr.bf16.mxu0 %v15191_v18 }
0x18c9   :  { %9457 = vrot.lane.b32.xlu1 %v9436_v46, %s15203_s27 }
0x191d   :  { %v9440_v13 = vpop.permute.xlu0 %9439 }
0x191e   :  { %v9461_v50 = vsel %vm1456_vm4, %v9365_v1, %v9440_v13 }
0x1921   :  { %v9448_v28 = vpop.permute.xlu0 %9447 }
0x1922   :  { %v9463_v14 = vsel %vm3035_vm5, %v9461_v50, %v9448_v28 }
0x1925   :  { %v9456_v19 = vpop.permute.xlu0 %9455 }
0x1926   :  { %v9465_v8 = vsel %vm3038_vm6, %v9463_v14, %v9456_v19 }
0x1927   :  { %14475 = vmatprep.mubr.msk.f32.mxu1 %vm155_vm3, %v9465_v8 }
0x1929   :  { %v9494_v34 = vpop.permute.xlu0 %9493 }
0x1933   :  { %v9442_v26 = vpop.permute.xlu1 %9441 }
0x1934   :  { %v9462_v48 = vsel %vm1456_vm4, %v9433_v3, %v9442_v26 }
0x1937   :  { %v9450_v44 = vpop.permute.xlu1 %9449 }
0x1938   :  { %v9464_v29 = vsel %vm3035_vm5, %v9462_v48, %v9450_v44 }
0x193b   :  { %v9458_v1 = vpop.permute.xlu1 %9457 }
0x193c   :  { %v9466_v33 = vsel %vm3038_vm6, %v9464_v29, %v9458_v1 }
0x193d   :  { %14476 = vmatmul.mubr.msk.f32.vlgmr.msra.gmra.mrb[66].mxu1 %vm155_vm3, %v9466_v33 }
0x193e   :  { %14860 = vmatpush3.bf16.msra.mxu1 %v14857_v37  ;;  %14497 = vmatprep.mubr.msk.f32.mxu1 %vm155_vm3, %v15839_v58 }
0x193f   :  { %14862 = vmatprep.subr.bf16.mxu1 %v14861_v57 }
0x1942   :  { %14864 = vmatpush3.bf16.msra.mxu1 %v14861_v57 }
0x1943   :  { %14869 = vmatprep.subr.bf16.mxu1 %v15191_v18 }
0x1945   :  { %14498 = vmatmul.mubr.msk.f32.vlgmr.msra.gmra.mrb[68].mxu1 %vm155_vm3, %v15836_v11 }
0x1946   :  { %14500 = vmatprep.mubr.msk.f32.mxu1 %vm155_vm3, %v15845_v12 }
0x1949   :  { %14501 = vmatmul.mubr.msk.f32.gmra.mrb[70].mxu1 %vm155_vm3, %v15852_v36 }
0x194a   :  { %14514 = vmatprep.mubr.msk.f32.mxu1 %vm15192_vm1, %v15193_v27 }
0x1a10   :  { %v14477_v2 = vpop.f32.mrb[66].mxu1 }
0x1a11   :  { %v9574_v20 = vadd.f32 %v14477_v2, %v9494_v34  ;;  %v9568_v58 = vpop.f32.mrb[67].mxu1 }
0x1a12   :  { %v9569_v7 = vadd.f32 %v9568_v58, %v9494_v34 }
0x1a13   :  { %v16958_v35 = vadd.f32 %v9574_v20, %v16516_v30 }
0x1a14   :  { %v16961_v63 = vadd.f32 %v9569_v7, %v16519_v49 }
0x1a15   :  { %v9583_v11 = vsel %vm155_vm3, %v16958_v35, 0.0 }
0x1a16   :  { %9584 = vadd.xlane.f32.xlu0 %v9583_v11  ;;  %v9580_v12 = vsel %vm155_vm3, %v16961_v63, 0.0 }
0x1a17   :  { %9581 = vadd.xlane.f32.xlu1 %v9580_v12 }
0x1a18   :  { %v14499_v36 = vpop.f32.mrb[68].mxu1 }
0x1a19   :  { %v9790_v47 = vpop.f32.mrb[69].mxu1  ;;  %v16983_v24 = vadd.f32 %v14499_v36, %v13625_v9 }
0x1a1a   :  { %v16978_v10 = vadd.f32 %v13625_v9, %v9790_v47 }
0x1a1c   :  { %v14502_v31 = vpop.f32.mrb[70].mxu1 }
0x1a1d   :  { %v9800_v17 = vpop.f32.mrb[71].mxu1  ;;  %v16991_v52 = vadd.f32 %v14502_v31, %v13625_v9 }
0x1a1e   :  { %v17011_v32 = vadd.f32 %v13625_v9, %v9800_v17 }
0x1aa3   :  { %v9585_v53 = vpop.xlane.xlu0 %9584 }
0x1aa4   :  { %v9587_v54 = vmul.f32 0.03125, %v9585_v53  ;;  %v9582_v15 = vpop.xlane.xlu1 %9581 }
0x1aa5   :  { %v9586_v30 = vmul.f32 0.03125, %v9582_v15 }
0x1aa6   :  { %v9589_v22 = vsub.f32 %v16958_v35, %v9587_v54 }
0x1aa7   :  { %v9588_v49 = vsub.f32 %v16961_v63, %v9586_v30 }
0x1aa8   :  { %v9591_v45 = vmul.f32 %v9589_v22, %v9589_v22 }
0x1aa9   :  { %v9590_v60 = vmul.f32 %v9588_v49, %v9588_v49 }
0x1aaa   :  { %v9595_v25 = vsel %vm155_vm3, %v9591_v45, 0.0 }
0x1aab   :  { %9596 = vadd.xlane.f32.xlu1 %v9595_v25  ;;  %v9592_v51 = vsel %vm155_vm3, %v9590_v60, 0.0 }
0x1aac   :  { %9593 = vadd.xlane.f32.xlu0 %v9592_v51 }
0x1abc   :  { %9616 = vrot.lane.b32.xlu1 %v13611_v21, %s15198_s20 }
0x1ac0   :  { %10105 = vrot.lane.b32.xlu1 %v16978_v10, %s15195_s17 }
0x1ac2   :  { %9611 = vrot.lane.b32.xlu0 %v13611_v21, %s15194_s18 }
0x1ac4   :  { %10117 = vrot.lane.b32.xlu1 %v16978_v10, %s15196_s1 }
0x1ac6   :  { %10107 = vrot.lane.b32.xlu0 %v16983_v24, %s15195_s17 }
0x1ac8   :  { %10129 = vrot.lane.b32.xlu1 %v16978_v10, %s15197_s19 }
0x1aca   :  { %10119 = vrot.lane.b32.xlu0 %v16983_v24, %s15196_s1 }
0x1acc   :  { %10111 = vrot.lane.b32.xlu1 %v16991_v52, %s15195_s17 }
0x1ace   :  { %10131 = vrot.lane.b32.xlu0 %v16983_v24, %s15197_s19 }
0x1ad2   :  { %10109 = vrot.lane.b32.xlu0 %v17011_v32, %s15195_s17 }
0x1b38   :  { %v9597_v43 = vpop.xlane.xlu1 %9596 }
0x1b39   :  { %v9599_v40 = vmul.f32 0.03125, %v9597_v43  ;;  %v9594_v16 = vpop.xlane.xlu0 %9593 }
0x1b3a   :  { %v9598_v37 = vmul.f32 0.03125, %v9594_v16 }
0x1b3b   :  { %v9601_v39 = vadd.f32 1e-05, %v9599_v40 }
0x1b3c   :  { %v9600_v38 = vadd.f32 1e-05, %v9598_v37  ;;  %v9617_v46 = vpop.permute.xlu1 %9616 }
0x1b3d   :  { %15145 = vrsqrt.f32 %v9601_v39  ;;  %v9612_v3 = vpop.permute.xlu0 %9611 }
0x1b3e   :  { %15147 = vrsqrt.f32 %v9600_v38 }
0x1b40   :  { %v17016_v6 = vpop.permute.xlu1 %10105 }
0x1b41   :  { %v17018_v13 = vpop.permute.xlu0 %10107 }
0x1b44   :  { %v17020_v28 = vpop.permute.xlu1 %10117 }
0x1b45   :  { %v10141_v50 = vcombine.low %v16978_v10, %v17020_v28  ;;  %v17024_v14 = vpop.permute.xlu0 %10119  ;;  %v10142_v19 = vcombine.high %v16978_v10, %v17020_v28 }
0x1b46   :  { %v10209_v26 = vcombine.low %v16983_v24, %v17024_v14  ;;  %v10210_v56 = vcombine.high %v16983_v24, %v17024_v14 }
0x1b47   :  { %v15146_v8 = vpop.eup %15145  ;;  %v10149_v1 = vrot.slane %v10141_v50, %v15458_v61  ;;  %v10156_v20 = vrot.slane %v10142_v19, %v15458_v61 }
0x1b48   :  { %v15148_v44 = vpop.eup %15147  ;;  %v9605_v4 = vmul.f32 %v15146_v8, %v9589_v22  ;;  %v17032_v48 = vpop.permute.xlu1 %10129  ;;  %v10217_v12 = vrot.slane %v10209_v26, %v15458_v61  ;;  %v10224_v17 = vrot.slane %v10210_v56, %v15458_v61 }
0x1b49   :  { %v9604_v29 = vmul.f32 %v15148_v44, %v9588_v49  ;;  %v10157_v57 = vcombine.low %v17016_v6, %v17032_v48  ;;  %v10158_v33 = vcombine.high %v17016_v6, %v17032_v48  ;;  %v17039_v34 = vpop.permute.xlu0 %10131 }
0x1b4a   :  { %v9615_v2 = vmul.f32 %v9612_v3, %v9605_v4  ;;  %v10225_v58 = vcombine.low %v17018_v13, %v17039_v34  ;;  %v10226_v7 = vcombine.high %v17018_v13, %v17039_v34 }
0x1b4b   :  { %v9614_v11 = vmul.f32 %v9612_v3, %v9604_v29  ;;  %v10165_v36 = vrot.slane %v10157_v57, %v15458_v61  ;;  %v10172_v47 = vrot.slane %v10158_v33, %v15458_v61 }
0x1b4c   :  { %v9620_v31 = vadd.f32 %v9617_v46, %v9615_v2  ;;  %v10233_v53 = vrot.slane %v10225_v58, %v15458_v61  ;;  %v10240_v54 = vrot.slane %v10226_v7, %v15458_v61 }
0x1b4d   :  { %v9619_v15 = vadd.f32 %v9617_v46, %v9614_v11  ;;  %v10173_v30 = vcombine.low %v10149_v1, %v10165_v36  ;;  %v10174_v22 = vcombine.high %v10149_v1, %v10165_v36  ;;  %v10189_v49 = vcombine.low %v10156_v20, %v10172_v47 }
0x1b4e   :  { %v10190_v45 = vcombine.high %v10156_v20, %v10172_v47  ;;  %v10241_v60 = vcombine.low %v10217_v12, %v10233_v53  ;;  %v10242_v25 = vcombine.high %v10217_v12, %v10233_v53  ;;  %v10257_v51 = vcombine.low %v10224_v17, %v10240_v54 }
0x1b4f   :  { %v10181_v21 = vrot.slane %v10173_v30, %v15464_v5  ;;  %v10188_v9 = vrot.slane %v10174_v22, %v15464_v5  ;;  %v10197_v59 = vrot.slane %v10189_v49, %v15464_v5  ;;  %v10258_v55 = vcombine.high %v10224_v17, %v10240_v54  ;;  %14486 = vmatprep.mubr.msk.f32.mxu0 %vm155_vm3, %v9619_v15 }
0x1b50   :  { %v10204_v23 = vrot.slane %v10190_v45, %v15464_v5  ;;  %v10249_v42 = vrot.slane %v10241_v60, %v15464_v5  ;;  %v10256_v62 = vrot.slane %v10242_v25, %v15464_v5  ;;  %v10265_v0 = vrot.slane %v10257_v51, %v15464_v5  ;;  %14487 = vmatmul.mubr.msk.f32.vlgmr.msra.gmra.mrb[62].mxu0 %vm155_vm3, %v9620_v31 }
0x1b51   :  { %v10413_v43 = vcombine.low %v10181_v21, %v10188_v9  ;;  %v13634_v40 = vcombine.high %v10181_v21, %v10188_v9  ;;  %v10272_v16 = vrot.slane %v10258_v55, %v15464_v5  ;;  %14507 = vmatprep.mubr.msk.f32.mxu0 %vm15192_vm1, %v15193_v27 }
0x1b52   :  { %v10429_v37 = vcombine.low %v10197_v59, %v10204_v23  ;;  %v13635_v39 = vcombine.high %v10197_v59, %v10204_v23  ;;  %v10481_v38 = vcombine.low %v10249_v42, %v10256_v62  ;;  %v13636_v46 = vcombine.high %v10249_v42, %v10256_v62  ;;  %v13617_v62 = vld [vmem:[%s17659_s7 + $0x7] ss:$0 sm:$0xff] }
0x1b53   :  { %v10420_v3 = vrot.slane %v10413_v43, %v15458_v61  ;;  %v10428_v50 = vrot.slane %v13634_v40, %v15458_v61  ;;  %v10497_v19 = vcombine.low %v10265_v0, %v10272_v16  ;;  %v13637_v8 = vcombine.high %v10265_v0, %v10272_v16 }
0x1b54   :  { %v10436_v26 = vrot.slane %v10429_v37, %v15458_v61  ;;  %v10444_v44 = vrot.slane %v13635_v39, %v15458_v61  ;;  %v10488_v4 = vrot.slane %v10481_v38, %v15458_v61  ;;  %v10496_v56 = vrot.slane %v13636_v46, %v15458_v61  ;;  %v17114_v37 = vpop.permute.xlu1 %10111  ;;  %v17116_v39 = vpop.permute.xlu0 %10109 }
0x1b55   :  { %v10445_v29 = vcombine.low %v10420_v3, %v10428_v50  ;;  %v10446_v1 = vcombine.high %v10420_v3, %v10428_v50  ;;  %v10504_v57 = vrot.slane %v10497_v19, %v15458_v61  ;;  %v10512_v33 = vrot.slane %v13637_v8, %v15458_v61 }
0x1b56   :  { %v10461_v2 = vcombine.low %v10436_v26, %v10444_v44  ;;  %v10462_v20 = vcombine.high %v10436_v26, %v10444_v44  ;;  %v10513_v58 = vcombine.low %v10488_v4, %v10496_v56  ;;  %v10514_v7 = vcombine.high %v10488_v4, %v10496_v56 }
0x1b57   :  { %v10529_v11 = vcombine.low %v10504_v57, %v10512_v33  ;;  %v10530_v12 = vcombine.high %v10504_v57, %v10512_v33  ;;  %v10453_v36 = vrot.slane %v10445_v29, %v15464_v5  ;;  %v10460_v47 = vrot.slane %v10446_v1, %v15464_v5 }
0x1b58   :  { %v10469_v31 = vrot.slane %v10461_v2, %v15464_v5  ;;  %v10521_v17 = vrot.slane %v10513_v58, %v15464_v5  ;;  %v10476_v53 = vrot.slane %v10462_v20, %v15464_v5  ;;  %v10528_v54 = vrot.slane %v10514_v7, %v15464_v5 }
0x1b59   :  { %v10537_v15 = vrot.slane %v10529_v11, %v15464_v5  ;;  %v10544_v30 = vrot.slane %v10530_v12, %v15464_v5 }
0x1b5a   :  { %v10477_v22 = vcombine.low %v10453_v36, %v10469_v31  ;;  %v10478_v49 = vcombine.high %v10453_v36, %v10469_v31  ;;  %v10479_v45 = vcombine.low %v10460_v47, %v10476_v53  ;;  %v10480_v60 = vcombine.high %v10460_v47, %v10476_v53 }
0x1b5b   :  { %v10545_v25 = vcombine.low %v10521_v17, %v10537_v15  ;;  %v10546_v51 = vcombine.high %v10521_v17, %v10537_v15  ;;  %v10547_v21 = vcombine.low %v10528_v54, %v10544_v30  ;;  %v10548_v9 = vcombine.high %v10528_v54, %v10544_v30 }
0x1b5d   :  { %v14866_v59 = vpack.c.bf16 %v10545_v25, %v10477_v22  ;;  %v14870_v55 = vpack.c.bf16 %v10546_v51, %v10478_v49  ;;  %v17080_v23 = vpack.c.bf16 %v10547_v21, %v10479_v45  ;;  %v17082_v42 = vpack.c.bf16 %v10548_v9, %v10480_v60 }
0x1b5f   :  { %14868 = vmatpush3.bf16.xpose.msk.msra.mxu0 %vm15966_vm7, %v14866_v59  ;;  %14872 = vmatpush3.bf16.xpose.msk.msra.mxu1 %vm15966_vm7, %v14870_v55 }
0x1b60   :  { %14873 = vmatprep.subr.bf16.mxu0 %v15191_v18  ;;  %14877 = vmatprep.subr.bf16.mxu1 %v15191_v18 }
0x1c23   :  { %v14488_v0 = vpop.f32.mrb[62].mxu0 }
0x1c24   :  { %v9704_v43 = vpop.f32.mrb[63].mxu0  ;;  %v17102_v16 = vadd.f32 %v14488_v0, %v13617_v62 }
0x1c25   :  { %v9705_v40 = vadd.f32 %v13617_v62, %v9704_v43 }
0x1c27   :  { %9817 = vrot.lane.b32.xlu0 %v9705_v40, %s15196_s1  ;;  %9811 = vrot.lane.b32.xlu1 %v9705_v40, %s15195_s17 }
0x1c2b   :  { %10121 = vrot.lane.b32.xlu0 %v17011_v32, %s15196_s1  ;;  %9823 = vrot.lane.b32.xlu1 %v9705_v40, %s15197_s19 }
0x1c2f   :  { %10133 = vrot.lane.b32.xlu0 %v17011_v32, %s15197_s19  ;;  %10123 = vrot.lane.b32.xlu1 %v16991_v52, %s15196_s1 }
0x1c33   :  { %9813 = vrot.lane.b32.xlu0 %v17102_v16, %s15195_s17  ;;  %10135 = vrot.lane.b32.xlu1 %v16991_v52, %s15197_s19 }
0x1c37   :  { %9825 = vrot.lane.b32.xlu0 %v17102_v16, %s15197_s19  ;;  %9819 = vrot.lane.b32.xlu1 %v17102_v16, %s15196_s1 }
0x1c3b   :  { %10687 = vrot.lane.b32.xlu0 %v16983_v24, %s15194_s18 }
0x1c99   :  { %v9818_v38 = vpop.permute.xlu0 %9817  ;;  %v9812_v46 = vpop.permute.xlu1 %9811 }
0x1c9a   :  { %v9829_v3 = vcombine.low %v9705_v40, %v9818_v38  ;;  %v9830_v50 = vcombine.high %v9705_v40, %v9818_v38 }
0x1c9c   :  { %v9837_v24 = vrot.slane %v9829_v3, %v15458_v61  ;;  %v9844_v29 = vrot.slane %v9830_v50, %v15458_v61 }
0x1c9d   :  { %v17118_v19 = vpop.permute.xlu0 %10121  ;;  %v9824_v8 = vpop.permute.xlu1 %9823 }
0x1c9e   :  { %v9845_v26 = vcombine.low %v9812_v46, %v9824_v8  ;;  %v9846_v44 = vcombine.high %v9812_v46, %v9824_v8  ;;  %v10277_v4 = vcombine.low %v17011_v32, %v17118_v19  ;;  %v10278_v56 = vcombine.high %v17011_v32, %v17118_v19 }
0x1ca0   :  { %v9853_v1 = vrot.slane %v9845_v26, %v15458_v61  ;;  %v9860_v57 = vrot.slane %v9846_v44, %v15458_v61  ;;  %v10285_v12 = vrot.slane %v10277_v4, %v15458_v61  ;;  %v10292_v36 = vrot.slane %v10278_v56, %v15458_v61 }
0x1ca1   :  { %v17128_v33 = vpop.permute.xlu0 %10133  ;;  %v17130_v11 = vpop.permute.xlu1 %10123 }
0x1ca2   :  { %v9861_v2 = vcombine.low %v9837_v24, %v9853_v1  ;;  %v9862_v20 = vcombine.high %v9837_v24, %v9853_v1  ;;  %v9877_v58 = vcombine.low %v9844_v29, %v9860_v57  ;;  %v9878_v7 = vcombine.high %v9844_v29, %v9860_v57 }
0x1ca3   :  { %v10293_v47 = vcombine.low %v17116_v39, %v17128_v33  ;;  %v10294_v31 = vcombine.high %v17116_v39, %v17128_v33  ;;  %v10345_v49 = vcombine.low %v16991_v52, %v17130_v11  ;;  %v10346_v45 = vcombine.high %v16991_v52, %v17130_v11 }
0x1ca4   :  { %v9869_v17 = vrot.slane %v9861_v2, %v15464_v5  ;;  %v9876_v53 = vrot.slane %v9862_v20, %v15464_v5  ;;  %v9885_v54 = vrot.slane %v9877_v58, %v15464_v5  ;;  %v9892_v15 = vrot.slane %v9878_v7, %v15464_v5 }
0x1ca5   :  { %v10301_v30 = vrot.slane %v10293_v47, %v15458_v61  ;;  %v10308_v22 = vrot.slane %v10294_v31, %v15458_v61  ;;  %v9814_v60 = vpop.permute.xlu0 %9813  ;;  %v17160_v3 = vpop.permute.xlu1 %10135  ;;  %v10353_v24 = vrot.slane %v10345_v49, %v15458_v61  ;;  %v10360_v29 = vrot.slane %v10346_v45, %v15458_v61 }
0x1ca6   :  { %v9965_v25 = vcombine.low %v9869_v17, %v9876_v53  ;;  %v13630_v51 = vcombine.high %v9869_v17, %v9876_v53  ;;  %v9981_v21 = vcombine.low %v9885_v54, %v9892_v15  ;;  %v13631_v9 = vcombine.high %v9885_v54, %v9892_v15 }
0x1ca7   :  { %v10309_v59 = vcombine.low %v10285_v12, %v10301_v30  ;;  %v10310_v55 = vcombine.high %v10285_v12, %v10301_v30  ;;  %v10325_v62 = vcombine.low %v10292_v36, %v10308_v22  ;;  %v10326_v0 = vcombine.high %v10292_v36, %v10308_v22 }
0x1ca8   :  { %v17149_v43 = vrot.slane %v9965_v25, %v15458_v61  ;;  %v17152_v40 = vrot.slane %v13630_v51, %v15458_v61  ;;  %v17155_v38 = vrot.slane %v9981_v21, %v15458_v61  ;;  %v17158_v46 = vrot.slane %v13631_v9, %v15458_v61 }
0x1ca9   :  { %v10317_v50 = vrot.slane %v10309_v59, %v15464_v5  ;;  %v10324_v8 = vrot.slane %v10310_v55, %v15464_v5  ;;  %v10333_v26 = vrot.slane %v10325_v62, %v15464_v5  ;;  %v10340_v44 = vrot.slane %v10326_v0, %v15464_v5  ;;  %v9826_v4 = vpop.permute.xlu0 %9825  ;;  %v9820_v49 = vpop.permute.xlu1 %9819 }
0x1caa   :  { %v9997_v56 = vcombine.low %v17149_v43, %v17152_v40  ;;  %v10361_v58 = vcombine.low %v17114_v37, %v17160_v3  ;;  %v10362_v7 = vcombine.high %v17114_v37, %v17160_v3  ;;  %v9913_v12 = vcombine.low %v9814_v60, %v9826_v4 }
0x1cab   :  { %v10549_v1 = vcombine.low %v10317_v50, %v10324_v8  ;;  %v13638_v57 = vcombine.high %v10317_v50, %v10324_v8  ;;  %v10565_v2 = vcombine.low %v10333_v26, %v10340_v44  ;;  %v13639_v20 = vcombine.high %v10333_v26, %v10340_v44 }
0x1cac   :  { %v9914_v36 = vcombine.high %v9814_v60, %v9826_v4  ;;  %v9998_v47 = vcombine.high %v17149_v43, %v17152_v40  ;;  %v10013_v31 = vcombine.low %v17155_v38, %v17158_v46  ;;  %v10014_v54 = vcombine.high %v17155_v38, %v17158_v46 }
0x1cad   :  { %v17179_v17 = vrot.slane %v10549_v1, %v15458_v61  ;;  %v17182_v53 = vrot.slane %v13638_v57, %v15458_v61  ;;  %v17187_v15 = vrot.slane %v10565_v2, %v15458_v61  ;;  %v10369_v30 = vrot.slane %v10361_v58, %v15458_v61 }
0x1cae   :  { %v10376_v22 = vrot.slane %v10362_v7, %v15458_v61  ;;  %v17192_v45 = vrot.slane %v13639_v20, %v15458_v61  ;;  %v9921_v25 = vrot.slane %v9913_v12, %v15458_v61  ;;  %v9928_v51 = vrot.slane %v9914_v36, %v15458_v61 }
0x1caf   :  { %v10581_v60 = vcombine.low %v17179_v17, %v17182_v53  ;;  %v10377_v21 = vcombine.low %v10353_v24, %v10369_v30  ;;  %v10378_v9 = vcombine.high %v10353_v24, %v10369_v30  ;;  %v9897_v62 = vcombine.low %v17102_v16, %v9820_v49 }
0x1cb0   :  { %v10393_v59 = vcombine.low %v10360_v29, %v10376_v22  ;;  %v10394_v55 = vcombine.high %v10360_v29, %v10376_v22  ;;  %v9898_v0 = vcombine.high %v17102_v16, %v9820_v49  ;;  %v10005_v43 = vrot.slane %v9997_v56, %v15464_v5 }
0x1cb1   :  { %v10021_v40 = vrot.slane %v10013_v31, %v15464_v5  ;;  %v10385_v38 = vrot.slane %v10377_v21, %v15464_v5  ;;  %v10392_v46 = vrot.slane %v10378_v9, %v15464_v5  ;;  %v9905_v26 = vrot.slane %v9897_v62, %v15458_v61 }
0x1cb2   :  { %v10401_v50 = vrot.slane %v10393_v59, %v15464_v5  ;;  %v10408_v8 = vrot.slane %v10394_v55, %v15464_v5  ;;  %v9912_v44 = vrot.slane %v9898_v0, %v15458_v61 }
0x1cb3   :  { %v10029_v4 = vcombine.low %v10005_v43, %v10021_v40  ;;  %v10030_v24 = vcombine.high %v10005_v43, %v10021_v40  ;;  %v10617_v29 = vcombine.low %v10385_v38, %v10392_v46  ;;  %v13640_v16 = vcombine.high %v10385_v38, %v10392_v46 }
0x1cb4   :  { %v10633_v1 = vcombine.low %v10401_v50, %v10408_v8  ;;  %v13641_v56 = vcombine.high %v10401_v50, %v10408_v8  ;;  %v9929_v57 = vcombine.low %v9905_v26, %v9921_v25  ;;  %v9930_v2 = vcombine.high %v9905_v26, %v9921_v25 }
0x1cb5   :  { %v9945_v20 = vcombine.low %v9912_v44, %v9928_v51  ;;  %v9946_v58 = vcombine.high %v9912_v44, %v9928_v51  ;;  %14508 = vmatmul.mubr.msk.f32.vlgmr.msra.gmra.mrb[64].mxu0 %vm1456_vm4, %v10029_v4  ;;  %v10624_v7 = vrot.slane %v10617_v29, %v15458_v61  ;;  %v10632_v12 = vrot.slane %v13640_v16, %v15458_v61 }
0x1cb6   :  { %v10640_v36 = vrot.slane %v10633_v1, %v15458_v61  ;;  %v10648_v31 = vrot.slane %v13641_v56, %v15458_v61  ;;  %14515 = vmatmul.mubr.msk.f32.vlgmr.msra.gmra.mrb[72].mxu1 %vm1456_vm4, %v10030_v24  ;;  %v9937_v30 = vrot.slane %v9929_v57, %v15464_v5  ;;  %v9944_v22 = vrot.slane %v9930_v2, %v15464_v5 }
0x1cb7   :  { %v9953_v49 = vrot.slane %v9945_v20, %v15464_v5  ;;  %v9960_v25 = vrot.slane %v9946_v58, %v15464_v5  ;;  %14876 = vmatpush3.bf16.xpose.msk.msra.mxu0 %vm15966_vm7, %v17080_v23  ;;  %v10597_v51 = vcombine.low %v17187_v15, %v17192_v45  ;;  %v10649_v21 = vcombine.low %v10624_v7, %v10632_v12 }
0x1cb8   :  { %14880 = vmatpush3.bf16.xpose.msk.msra.mxu1 %vm15966_vm7, %v17082_v42  ;;  %v10033_v9 = vcombine.low %v9937_v30, %v9944_v22  ;;  %v13632_v59 = vcombine.high %v9937_v30, %v9944_v22  ;;  %14521 = vmatprep.mubr.msk.f32.mxu0 %vm15192_vm1, %v15193_v27  ;;  %v10665_v0 = vcombine.low %v10640_v36, %v10648_v31 }
0x1cb9   :  { %v10049_v55 = vcombine.low %v9953_v49, %v9960_v25  ;;  %v13633_v62 = vcombine.high %v9953_v49, %v9960_v25  ;;  %14528 = vmatprep.mubr.msk.f32.mxu1 %vm15192_vm1, %v15193_v27  ;;  %v10012_v23 = vrot.slane %v9998_v47, %v15464_v5  ;;  %v10028_v43 = vrot.slane %v10014_v54, %v15464_v5 }
0x1cba   :  { %14881 = vmatprep.subr.bf16.mxu0 %v15191_v18  ;;  %14885 = vmatprep.subr.bf16.mxu1 %v15191_v18  ;;  %v10589_v42 = vrot.slane %v10581_v60, %v15464_v5  ;;  %v10040_v40 = vrot.slane %v10033_v9, %v15458_v61  ;;  %v10605_v46 = vrot.slane %v10597_v51, %v15464_v5 }
0x1cbb   :  { %v10031_v38 = vcombine.low %v10012_v23, %v10028_v43  ;;  %v10657_v50 = vrot.slane %v10649_v21, %v15464_v5  ;;  %v10048_v8 = vrot.slane %v13632_v59, %v15458_v61  ;;  %v10056_v26 = vrot.slane %v10049_v55, %v15458_v61 }
0x1cbc   :  { %v10064_v47 = vrot.slane %v13633_v62, %v15458_v61  ;;  %v10032_v54 = vcombine.high %v10012_v23, %v10028_v43  ;;  %v10650_v44 = vcombine.high %v10624_v7, %v10632_v12  ;;  %v10666_v4 = vcombine.high %v10640_v36, %v10648_v31 }
0x1cbd   :  { %v10673_v60 = vrot.slane %v10665_v0, %v15464_v5  ;;  %v10582_v24 = vcombine.high %v17179_v17, %v17182_v53  ;;  %v10598_v29 = vcombine.high %v17187_v15, %v17192_v45  ;;  %v10613_v16 = vcombine.low %v10589_v42, %v10605_v46 }
0x1cbe   :  { %14522 = vmatmul.mubr.msk.f32.vlgmr.msra.gmra.mrb[66].mxu0 %vm1456_vm4, %v10031_v38  ;;  %v10614_v56 = vcombine.high %v10589_v42, %v10605_v46  ;;  %v10065_v2 = vcombine.low %v10040_v40, %v10048_v8  ;;  %v10081_v20 = vcombine.low %v10056_v26, %v10064_v47  ;;  %v10664_v17 = vrot.slane %v10650_v44, %v15464_v5 }
0x1cbf   :  { %14529 = vmatmul.mubr.msk.f32.vlgmr.msra.gmra.mrb[74].mxu1 %vm1456_vm4, %v10032_v54  ;;  %14535 = vmatprep.mubr.msk.f32.mxu0 %vm15192_vm1, %v15193_v27  ;;  %v10681_v1 = vcombine.low %v10657_v50, %v10673_v60  ;;  %v10682_v57 = vcombine.high %v10657_v50, %v10673_v60  ;;  %v10680_v53 = vrot.slane %v10666_v4, %v15464_v5 }
0x1cc0   :  { %14542 = vmatprep.mubr.msk.f32.mxu1 %vm15192_vm1, %v15193_v27  ;;  %v10596_v15 = vrot.slane %v10582_v24, %v15464_v5  ;;  %v10612_v45 = vrot.slane %v10598_v29, %v15464_v5  ;;  %v10073_v12 = vrot.slane %v10065_v2, %v15464_v5  ;;  %v10089_v36 = vrot.slane %v10081_v20, %v15464_v5 }
0x1cc1   :  { %v14882_v58 = vpack.c.bf16 %v10681_v1, %v10613_v16  ;;  %v14886_v7 = vpack.c.bf16 %v10682_v57, %v10614_v56  ;;  %v10683_v31 = vcombine.low %v10664_v17, %v10680_v53  ;;  %v10684_v30 = vcombine.high %v10664_v17, %v10680_v53 }
0x1cc2   :  { %v10615_v22 = vcombine.low %v10596_v15, %v10612_v45  ;;  %v10616_v49 = vcombine.high %v10596_v15, %v10612_v45  ;;  %v10066_v25 = vcombine.high %v10040_v40, %v10048_v8  ;;  %v10082_v51 = vcombine.high %v10056_v26, %v10064_v47 }
0x1cc3   :  { %14884 = vmatpush3.bf16.xpose.msk.msra.mxu0 %vm15966_vm7, %v14882_v58  ;;  %14888 = vmatpush3.bf16.xpose.msk.msra.mxu1 %vm15966_vm7, %v14886_v7  ;;  %v10097_v21 = vcombine.low %v10073_v12, %v10089_v36  ;;  %v10098_v9 = vcombine.high %v10073_v12, %v10089_v36 }
0x1cc4   :  { %14889 = vmatprep.subr.bf16.mxu0 %v15191_v18  ;;  %14893 = vmatprep.subr.bf16.mxu1 %v15191_v18  ;;  %v14890_v59 = vpack.c.bf16 %v10683_v31, %v10615_v22  ;;  %v14894_v55 = vpack.c.bf16 %v10684_v30, %v10616_v49  ;;  %v10080_v62 = vrot.slane %v10066_v25, %v15464_v5 }
0x1cc5   :  { %v10096_v0 = vrot.slane %v10082_v51, %v15464_v5 }
0x1cc7   :  { %v10099_v23 = vcombine.low %v10080_v62, %v10096_v0  ;;  %v10100_v43 = vcombine.high %v10080_v62, %v10096_v0 }
0x1cca   :  { %14536 = vmatmul.mubr.msk.f32.vlgmr.msra.gmra.mrb[68].mxu0 %vm1456_vm4, %v10097_v21  ;;  %14543 = vmatmul.mubr.msk.f32.vlgmr.msra.gmra.mrb[76].mxu1 %vm1456_vm4, %v10098_v9 }
0x1ccb   :  { %14892 = vmatpush3.bf16.xpose.msk.msra.mxu0 %vm15966_vm7, %v14890_v59  ;;  %14896 = vmatpush3.bf16.xpose.msk.msra.mxu1 %vm15966_vm7, %v14894_v55 }
0x1ccc   :  { %14549 = vmatprep.mubr.msk.f32.mxu0 %vm15192_vm1, %v15193_v27  ;;  %14556 = vmatprep.mubr.msk.f32.mxu1 %vm15192_vm1, %v15193_v27 }
0x1ccd   :  { %14897 = vmatprep.subr.bf16.mxu0 %v15191_v18  ;;  %14903 = vmatprep.subr.bf16.mxu1 %v15191_v18 }
0x1cd2   :  { %14550 = vmatmul.mubr.msk.f32.vlgmr.msra.gmra.mrb[70].mxu0 %vm1456_vm4, %v10099_v23  ;;  %14557 = vmatmul.mubr.msk.f32.vlgmr.msra.gmra.mrb[78].mxu1 %vm1456_vm4, %v10100_v43 }
0x1cd3   :  { %14563 = vmatprep.mubr.msk.f32.mxu0 %vm15192_vm1, %v15193_v27  ;;  %14577 = vmatprep.mubr.msk.f32.mxu1 %vm15192_vm1, %v15193_v27 }
0x1d88   :  { %v11352_v41 = vpop.f32.mrb[64].mxu0 }
0x1d89   :  { %v11431_v42 = vpop.f32.mrb[72].mxu1  ;;  %v14509_v40 = vpop.f32.mrb[65].mxu0  ;;  %v11909_v38 = vsel %vm3035_vm5, %v11352_v41, -inf }
0x1d8a   :  { %v14516_v46 = vpop.f32.mrb[73].mxu1  ;;  %v11912_v50 = vsel %vm3035_vm5, %v11431_v42, -inf  ;;  %11910 = vmax.xlane.f32.xlu1 %v11909_v38 }
0x1d8b   :  { %11913 = vmax.xlane.f32.xlu0 %v11912_v50 }
0x1d91   :  { %v11510_v8 = vpop.f32.mrb[66].mxu0 }
0x1d92   :  { %v17286_v26 = vpop.f32.mrb[74].mxu1  ;;  %v14523_v47 = vpop.f32.mrb[67].mxu0  ;;  %v11915_v54 = vsel %vm3035_vm5, %v11510_v8, -inf }
0x1d93   :  { %v14530_v44 = vpop.f32.mrb[75].mxu1  ;;  %11916 = vmax.xlane.f32.xlu0 %v11915_v54 }
0x1d9b   :  { %10685 = vrot.lane.b32.xlu1 %v16978_v10, %s15194_s18  ;;  %v11918_v10 = vsel %vm3035_vm5, %v17286_v26, -inf }
0x1d9d   :  { %v11668_v4 = vpop.f32.mrb[68].mxu0  ;;  %v17291_v60 = vpop.f32.mrb[76].mxu1 }
0x1d9e   :  { %v14537_v24 = vpop.f32.mrb[69].mxu0  ;;  %v14544_v29 = vpop.f32.mrb[77].mxu1  ;;  %v11921_v16 = vsel %vm3035_vm5, %v11668_v4, -inf  ;;  %v11924_v58 = vsel %vm3035_vm5, %v17291_v60, -inf }
0x1d9f   :  { %11922 = vmax.xlane.f32.xlu0 %v11921_v16 }
0x1da5   :  { %v11826_v1 = vpop.f32.mrb[70].mxu0  ;;  %v17294_v56 = vpop.f32.mrb[78].mxu1 }
0x1da6   :  { %v14551_v57 = vpop.f32.mrb[71].mxu0  ;;  %v14558_v2 = vpop.f32.mrb[79].mxu1  ;;  %v11927_v20 = vsel %vm3035_vm5, %v11826_v1, -inf  ;;  %v11930_v7 = vsel %vm3035_vm5, %v17294_v56, -inf }
0x1da7   :  { %11928 = vmax.xlane.f32.xlu0 %v11927_v20 }
0x1dbd   :  { %10701 = vrot.lane.b32.xlu0 %v17020_v28, %s15194_s18 }
0x1dbf   :  { %11919 = vmax.xlane.f32.xlu1 %v11918_v10 }
0x1dc1   :  { %10709 = vrot.lane.b32.xlu0 %v17032_v48, %s15194_s18 }
0x1dc3   :  { %11925 = vmax.xlane.f32.xlu1 %v11924_v58 }
0x1dc5   :  { %10689 = vrot.lane.b32.xlu0 %v17011_v32, %s15194_s18  ;;  %v17331_v32 = vpop.permute.xlu0 %10687 }
0x1dc7   :  { %11931 = vmax.xlane.f32.xlu1 %v11930_v7 }
0x1dc9   :  { %10699 = vrot.lane.b32.xlu0 %v17114_v37, %s15194_s18 }
0x1dcd   :  { %10707 = vrot.lane.b32.xlu0 %v17130_v11, %s15194_s18 }
0x1dd1   :  { %10715 = vrot.lane.b32.xlu0 %v17160_v3, %s15194_s18 }
0x1dd8   :  { %10693 = vrot.lane.b32.xlu1 %v17016_v6, %s15194_s18 }
0x1ddc   :  { %10695 = vrot.lane.b32.xlu1 %v17018_v13, %s15194_s18 }
0x1de0   :  { %10703 = vrot.lane.b32.xlu1 %v17024_v14, %s15194_s18 }
0x1de4   :  { %10711 = vrot.lane.b32.xlu1 %v17039_v34, %s15194_s18 }
0x1de8   :  { %10691 = vrot.lane.b32.xlu1 %v16991_v52, %s15194_s18 }
0x1dec   :  { %10697 = vrot.lane.b32.xlu1 %v17116_v39, %s15194_s18 }
0x1df0   :  { %10705 = vrot.lane.b32.xlu1 %v17118_v19, %s15194_s18 }
0x1df4   :  { %10713 = vrot.lane.b32.xlu1 %v17128_v33, %s15194_s18 }
0x1e17   :  { %v11911_v6 = vpop.xlane.xlu1 %11910 }
0x1e18   :  { %v11914_v13 = vpop.xlane.xlu0 %11913  ;;  %v11933_v28 = vsub.f32 %v11352_v41, %v11911_v6 }
0x1e19   :  { %v11934_v14 = vsub.f32 %v11431_v42, %v11914_v13 }
0x1e1a   :  { %v11941_v48 = vmul.f32 1.442695, %v11933_v28 }
0x1e1b   :  { %v11943_v34 = vmul.f32 1.442695, %v11934_v14  ;;  %v10686_v15 = vpop.permute.xlu1 %10685 }
0x1e1c   :  { %15149 = vpow2.f32 %v11941_v48 }
0x1e1d   :  { %15151 = vpow2.f32 %v11943_v34 }
0x1e20   :  { %v11917_v52 = vpop.xlane.xlu0 %11916 }
0x1e21   :  { %v11935_v37 = vsub.f32 %v11510_v8, %v11917_v52 }
0x1e23   :  { %v11945_v11 = vmul.f32 1.442695, %v11935_v37 }
0x1e25   :  { %15153 = vpow2.f32 %v11945_v11 }
0x1e26   :  { %v17333_v39 = vpop.eup %15149 }
0x1e27   :  { %v11957_v19 = vsel %vm3035_vm5, %v17333_v39, 0.0  ;;  %v17337_v33 = vpop.eup %15151 }
0x1e28   :  { %11958 = vadd.xlane.f32.xlu0 %v11957_v19  ;;  %v11960_v3 = vsel %vm3035_vm5, %v17337_v33, 0.0 }
0x1e2c   :  { %11961 = vadd.xlane.f32.xlu0 %v11960_v3  ;;  %v11923_v45 = vpop.xlane.xlu0 %11922 }
0x1e2d   :  { %v11937_v12 = vsub.f32 %v11668_v4, %v11923_v45 }
0x1e2f   :  { %v17341_v17 = vpop.eup %15153  ;;  %v11949_v22 = vmul.f32 1.442695, %v11937_v12 }
0x1e30   :  { %v11963_v53 = vsel %vm3035_vm5, %v17341_v17, 0.0 }
0x1e31   :  { %11964 = vadd.xlane.f32.xlu1 %v11963_v53 }
0x1e34   :  { %v11929_v36 = vpop.xlane.xlu0 %11928 }
0x1e35   :  { %v11939_v49 = vsub.f32 %v11826_v1, %v11929_v36 }
0x1e37   :  { %v11953_v59 = vmul.f32 1.442695, %v11939_v49 }
0x1e38   :  { %v10702_v9 = vpop.permute.xlu0 %10701 }
0x1e39   :  { %v10733_v23 = vcombine.low %v10686_v15, %v10702_v9  ;;  %v10734_v43 = vcombine.high %v10686_v15, %v10702_v9 }
0x1e3b   :  { %v10741_v8 = vrot.slane %v10733_v23, %v15458_v61 }
0x1e3c   :  { %v10710_v42 = vpop.permute.xlu0 %10709 }
0x1e4c   :  { %v11920_v31 = vpop.xlane.xlu1 %11919 }
0x1e4d   :  { %v11936_v30 = vsub.f32 %v17286_v26, %v11920_v31  ;;  %v10748_v26 = vrot.slane %v10734_v43, %v15458_v61 }
0x1e4f   :  { %v11947_v25 = vmul.f32 1.442695, %v11936_v30 }
0x1e50   :  { %v11926_v51 = vpop.xlane.xlu1 %11925 }
0x1e51   :  { %15155 = vpow2.f32 %v11947_v25  ;;  %v11938_v21 = vsub.f32 %v17291_v60, %v11926_v51 }
0x1e52   :  { %15157 = vpow2.f32 %v11949_v22 }
0x1e53   :  { %v11951_v55 = vmul.f32 1.442695, %v11938_v21 }
0x1e54   :  { %v11932_v62 = vpop.xlane.xlu1 %11931 }
0x1e55   :  { %15159 = vpow2.f32 %v11951_v55  ;;  %v11940_v0 = vsub.f32 %v17294_v56, %v11932_v62 }
0x1e56   :  { %15161 = vpow2.f32 %v11953_v59 }
0x1e57   :  { %v11955_v41 = vmul.f32 1.442695, %v11940_v0 }
0x1e58   :  { %v10694_v40 = vpop.permute.xlu1 %10693 }
0x1e59   :  { %15163 = vpow2.f32 %v11955_v41  ;;  %v10749_v38 = vcombine.low %v10694_v40, %v10710_v42  ;;  %v10750_v46 = vcombine.high %v10694_v40, %v10710_v42 }
0x1e5b   :  { %v17348_v50 = vpop.eup %15155  ;;  %v10757_v47 = vrot.slane %v10749_v38, %v15458_v61  ;;  %v10764_v54 = vrot.slane %v10750_v46, %v15458_v61 }
0x1e5c   :  { %v10696_v44 = vpop.permute.xlu1 %10695  ;;  %v11966_v4 = vsel %vm3035_vm5, %v17348_v50, 0.0  ;;  %v17356_v60 = vpop.eup %15157 }
0x1e5d   :  { %v10765_v24 = vcombine.low %v10741_v8, %v10757_v47  ;;  %v10766_v29 = vcombine.high %v10741_v8, %v10757_v47  ;;  %v10781_v16 = vcombine.low %v10748_v26, %v10764_v54  ;;  %v10782_v1 = vcombine.high %v10748_v26, %v10764_v54  ;;  %11967 = vadd.xlane.f32.xlu0 %v11966_v4 }
0x1e5e   :  { %v11969_v7 = vsel %vm3035_vm5, %v17356_v60, 0.0 }
0x1e5f   :  { %v17358_v56 = vpop.eup %15159  ;;  %v10773_v57 = vrot.slane %v10765_v24, %v15464_v5  ;;  %v10780_v2 = vrot.slane %v10766_v29, %v15464_v5  ;;  %v10789_v20 = vrot.slane %v10781_v16, %v15464_v5  ;;  %v10796_v10 = vrot.slane %v10782_v1, %v15464_v5 }
0x1e60   :  { %v10704_v58 = vpop.permute.xlu1 %10703  ;;  %v11972_v6 = vsel %vm3035_vm5, %v17358_v56, 0.0  ;;  %v17368_v13 = vpop.eup %15161 }
0x1e61   :  { %v11005_v28 = vcombine.low %v10773_v57, %v10780_v2  ;;  %v13642_v14 = vcombine.high %v10773_v57, %v10780_v2  ;;  %v11021_v48 = vcombine.low %v10789_v20, %v10796_v10  ;;  %v13643_v34 = vcombine.high %v10789_v20, %v10796_v10  ;;  %11970 = vadd.xlane.f32.xlu0 %v11969_v7 }
0x1e62   :  { %v10801_v52 = vcombine.low %v17331_v32, %v10704_v58  ;;  %v10802_v37 = vcombine.high %v17331_v32, %v10704_v58  ;;  %11973 = vadd.xlane.f32.xlu1 %v11972_v6  ;;  %v11975_v12 = vsel %vm3035_vm5, %v17368_v13, 0.0 }
0x1e63   :  { %v17372_v11 = vpop.eup %15163  ;;  %v11012_v19 = vrot.slane %v11005_v28, %v15458_v61  ;;  %v11020_v3 = vrot.slane %v13642_v14, %v15458_v61  ;;  %v11028_v53 = vrot.slane %v11021_v48, %v15458_v61  ;;  %v11036_v15 = vrot.slane %v13643_v34, %v15458_v61 }
0x1e64   :  { %v10712_v45 = vpop.permute.xlu1 %10711  ;;  %v11978_v36 = vsel %vm3035_vm5, %v17372_v11, 0.0  ;;  %v10809_v51 = vrot.slane %v10801_v52, %v15458_v61  ;;  %v10816_v21 = vrot.slane %v10802_v37, %v15458_v61 }
0x1e65   :  { %v10817_v31 = vcombine.low %v10696_v44, %v10712_v45  ;;  %v10818_v32 = vcombine.high %v10696_v44, %v10712_v45  ;;  %11979 = vadd.xlane.f32.xlu0 %v11978_v36  ;;  %v11037_v30 = vcombine.low %v11012_v19, %v11020_v3  ;;  %v11053_v22 = vcombine.low %v11028_v53, %v11036_v15 }
0x1e66   :  { %11976 = vadd.xlane.f32.xlu1 %v11975_v12  ;;  %v11038_v49 = vcombine.high %v11012_v19, %v11020_v3  ;;  %v11054_v25 = vcombine.high %v11028_v53, %v11036_v15 }
0x1e67   :  { %v10825_v9 = vrot.slane %v10817_v31, %v15458_v61  ;;  %v10832_v59 = vrot.slane %v10818_v32, %v15458_v61  ;;  %v11045_v55 = vrot.slane %v11037_v30, %v15464_v5  ;;  %v11061_v62 = vrot.slane %v11053_v22, %v15464_v5  ;;  %v10690_v32 = vpop.permute.xlu0 %10689 }
0x1e68   :  { %v11052_v0 = vrot.slane %v11038_v49, %v15464_v5  ;;  %v11068_v23 = vrot.slane %v11054_v25, %v15464_v5  ;;  %v10692_v31 = vpop.permute.xlu1 %10691 }
0x1e69   :  { %v10833_v43 = vcombine.low %v10809_v51, %v10825_v9  ;;  %v10834_v41 = vcombine.high %v10809_v51, %v10825_v9  ;;  %v10849_v42 = vcombine.low %v10816_v21, %v10832_v59  ;;  %v10850_v40 = vcombine.high %v10816_v21, %v10832_v59 }
0x1e6a   :  { %v11070_v47 = vcombine.high %v11045_v55, %v11061_v62  ;;  %v11072_v54 = vcombine.high %v11052_v0, %v11068_v23  ;;  %v11069_v6 = vcombine.low %v11045_v55, %v11061_v62  ;;  %v11071_v53 = vcombine.low %v11052_v0, %v11068_v23 }
0x1e6b   :  { %v10841_v38 = vrot.slane %v10833_v43, %v15464_v5  ;;  %v10848_v46 = vrot.slane %v10834_v41, %v15464_v5  ;;  %v10857_v8 = vrot.slane %v10849_v42, %v15464_v5  ;;  %v10864_v26 = vrot.slane %v10850_v40, %v15464_v5  ;;  %v10700_v22 = vpop.permute.xlu0 %10699 }
0x1e6c   :  { %v10698_v30 = vpop.permute.xlu1 %10697 }
0x1e6d   :  { %v11073_v44 = vcombine.low %v10841_v38, %v10848_v46  ;;  %v13644_v4 = vcombine.high %v10841_v38, %v10848_v46  ;;  %v11089_v24 = vcombine.low %v10857_v8, %v10864_v26  ;;  %v13645_v29 = vcombine.high %v10857_v8, %v10864_v26 }
0x1e6f   :  { %v11080_v16 = vrot.slane %v11073_v44, %v15458_v61  ;;  %v11088_v1 = vrot.slane %v13644_v4, %v15458_v61  ;;  %v11096_v57 = vrot.slane %v11089_v24, %v15458_v61  ;;  %v11104_v2 = vrot.slane %v13645_v29, %v15458_v61  ;;  %v10708_v25 = vpop.permute.xlu0 %10707 }
0x1e70   :  { %v10706_v49 = vpop.permute.xlu1 %10705  ;;  %v10937_v55 = vcombine.low %v10692_v31, %v10708_v25  ;;  %v10938_v62 = vcombine.high %v10692_v31, %v10708_v25 }
0x1e71   :  { %v11105_v20 = vcombine.low %v11080_v16, %v11088_v1  ;;  %v11121_v10 = vcombine.low %v11096_v57, %v11104_v2  ;;  %v11106_v14 = vcombine.high %v11080_v16, %v11088_v1  ;;  %v11122_v48 = vcombine.high %v11096_v57, %v11104_v2 }
0x1e72   :  { %v10869_v0 = vcombine.low %v10690_v32, %v10706_v49  ;;  %v10870_v23 = vcombine.high %v10690_v32, %v10706_v49  ;;  %v10945_v38 = vrot.slane %v10937_v55, %v15458_v61  ;;  %v10952_v46 = vrot.slane %v10938_v62, %v15458_v61 }
0x1e73   :  { %v11113_v58 = vrot.slane %v11105_v20, %v15464_v5  ;;  %v11129_v7 = vrot.slane %v11121_v10, %v15464_v5  ;;  %v11120_v37 = vrot.slane %v11106_v14, %v15464_v5  ;;  %v11136_v19 = vrot.slane %v11122_v48, %v15464_v5  ;;  %v10716_v21 = vpop.permute.xlu0 %10715 }
0x1e74   :  { %v10714_v51 = vpop.permute.xlu1 %10713  ;;  %v10953_v43 = vcombine.low %v10700_v22, %v10716_v21  ;;  %v10954_v41 = vcombine.high %v10700_v22, %v10716_v21  ;;  %v10877_v8 = vrot.slane %v10869_v0, %v15458_v61  ;;  %v10884_v26 = vrot.slane %v10870_v23, %v15458_v61 }
0x1e75   :  { %v11137_v28 = vcombine.low %v11113_v58, %v11129_v7  ;;  %v11138_v34 = vcombine.high %v11113_v58, %v11129_v7  ;;  %v11139_v15 = vcombine.low %v11120_v37, %v11136_v19  ;;  %v11140_v45 = vcombine.high %v11120_v37, %v11136_v19 }
0x1e76   :  { %v10885_v9 = vcombine.low %v10698_v30, %v10714_v51  ;;  %v10886_v59 = vcombine.high %v10698_v30, %v10714_v51 }
0x1e77   :  { %v14898_v52 = vpack.c.bf16 %v11137_v28, %v11069_v6  ;;  %v17402_v3 = vpack.c.bf16 %v11138_v34, %v11070_v47  ;;  %v14904_v12 = vpack.c.bf16 %v11139_v15, %v11071_v53  ;;  %v17405_v36 = vpack.c.bf16 %v11140_v45, %v11072_v54 }
0x1e78   :  { %v10893_v42 = vrot.slane %v10885_v9, %v15458_v61  ;;  %v10900_v40 = vrot.slane %v10886_v59, %v15458_v61  ;;  %v10961_v47 = vrot.slane %v10953_v43, %v15458_v61  ;;  %v10968_v54 = vrot.slane %v10954_v41, %v15458_v61 }
0x1e79   :  { %14899 = vmatpush3.bf16.msra.mxu0 %v14898_v52  ;;  %14905 = vmatpush3.bf16.msra.mxu1 %v14904_v12 }
0x1e7a   :  { %14900 = vmatprep.subr.bf16.mxu0 %v15191_v18  ;;  %14909 = vmatprep.subr.bf16.mxu1 %v15191_v18  ;;  %v10901_v44 = vcombine.low %v10877_v8, %v10893_v42  ;;  %v10902_v4 = vcombine.high %v10877_v8, %v10893_v42  ;;  %v10917_v24 = vcombine.low %v10884_v26, %v10900_v40 }
0x1e7b   :  { %v10918_v29 = vcombine.high %v10884_v26, %v10900_v40  ;;  %v10969_v16 = vcombine.low %v10945_v38, %v10961_v47  ;;  %v10970_v1 = vcombine.high %v10945_v38, %v10961_v47  ;;  %v10985_v57 = vcombine.low %v10952_v46, %v10968_v54 }
0x1e7c   :  { %v10986_v2 = vcombine.high %v10952_v46, %v10968_v54  ;;  %v10909_v20 = vrot.slane %v10901_v44, %v15464_v5  ;;  %v10916_v10 = vrot.slane %v10902_v4, %v15464_v5  ;;  %v10925_v58 = vrot.slane %v10917_v24, %v15464_v5 }
0x1e7d   :  { %v10932_v7 = vrot.slane %v10918_v29, %v15464_v5  ;;  %v10977_v6 = vrot.slane %v10969_v16, %v15464_v5  ;;  %v10984_v28 = vrot.slane %v10970_v1, %v15464_v5  ;;  %v10993_v14 = vrot.slane %v10985_v57, %v15464_v5 }
0x1e7e   :  { %v11000_v48 = vrot.slane %v10986_v2, %v15464_v5  ;;  %v11141_v52 = vcombine.low %v10909_v20, %v10916_v10  ;;  %v13646_v37 = vcombine.high %v10909_v20, %v10916_v10 }
0x1e7f   :  { %v11157_v19 = vcombine.low %v10925_v58, %v10932_v7  ;;  %v13647_v53 = vcombine.high %v10925_v58, %v10932_v7  ;;  %v11209_v15 = vcombine.low %v10977_v6, %v10984_v28  ;;  %v13648_v45 = vcombine.high %v10977_v6, %v10984_v28 }
0x1e80   :  { %v11225_v12 = vcombine.low %v10993_v14, %v11000_v48  ;;  %v13649_v31 = vcombine.high %v10993_v14, %v11000_v48  ;;  %v11148_v30 = vrot.slane %v11141_v52, %v15458_v61  ;;  %v11156_v22 = vrot.slane %v13646_v37, %v15458_v61 }
0x1e81   :  { %v11164_v49 = vrot.slane %v11157_v19, %v15458_v61  ;;  %v11172_v25 = vrot.slane %v13647_v53, %v15458_v61  ;;  %v11216_v51 = vrot.slane %v11209_v15, %v15458_v61  ;;  %v11224_v21 = vrot.slane %v13648_v45, %v15458_v61 }
0x1e82   :  { %v11232_v9 = vrot.slane %v11225_v12, %v15458_v61  ;;  %v11240_v59 = vrot.slane %v13649_v31, %v15458_v61  ;;  %v11173_v62 = vcombine.low %v11148_v30, %v11156_v22  ;;  %v11174_v24 = vcombine.high %v11148_v30, %v11156_v22 }
0x1e83   :  { %v11189_v0 = vcombine.low %v11164_v49, %v11172_v25  ;;  %v11241_v41 = vcombine.low %v11216_v51, %v11224_v21  ;;  %v11190_v16 = vcombine.high %v11164_v49, %v11172_v25 }
0x1e84   :  { %v11257_v42 = vcombine.low %v11232_v9, %v11240_v59  ;;  %v11181_v40 = vrot.slane %v11173_v62, %v15464_v5  ;;  %v11258_v57 = vcombine.high %v11232_v9, %v11240_v59  ;;  %v11188_v10 = vrot.slane %v11174_v24, %v15464_v5 }
0x1e85   :  { %v11197_v38 = vrot.slane %v11189_v0, %v15464_v5  ;;  %v11204_v28 = vrot.slane %v11190_v16, %v15464_v5 }
0x1e86   :  { %v11265_v26 = vrot.slane %v11257_v42, %v15464_v5  ;;  %v11272_v37 = vrot.slane %v11258_v57, %v15464_v5 }
0x1e87   :  { %v11205_v47 = vcombine.low %v11181_v40, %v11197_v38  ;;  %v11206_v6 = vcombine.high %v11181_v40, %v11197_v38  ;;  %v11207_v45 = vcombine.low %v11188_v10, %v11204_v28  ;;  %v11208_v31 = vcombine.high %v11188_v10, %v11204_v28 }
0x1eb5   :  { %v11959_v34 = vpop.xlane.xlu0 %11958 }
0x1eb6   :  { %15165 = vrcp.f32 %v11959_v34 }
0x1eb9   :  { %v11962_v32 = vpop.xlane.xlu0 %11961 }
0x1eba   :  { %15167 = vrcp.f32 %v11962_v32 }
0x1ebe   :  { %v11965_v55 = vpop.xlane.xlu1 %11964 }
0x1ebf   :  { %15169 = vrcp.f32 %v11965_v55 }
0x1ec0   :  { %v15166_v23 = vpop.eup %15165 }
0x1ec1   :  { %v11982_v43 = vmul.f32 %v15166_v23, %v17333_v39  ;;  %v11249_v39 = vrot.slane %v11241_v41, %v15464_v5 }
0x1ec3   :  { %14564 = vmatmul.mubr.msk.f32.vlgmr.msra.gmra.mrb[72].mxu0 %vm3035_vm5, %v11982_v43  ;;  %v11273_v54 = vcombine.low %v11249_v39, %v11265_v26  ;;  %v12995_v2 = vsel %vm3035_vm5, %v11982_v43, 0.0  ;;  %v11274_v34 = vcombine.high %v11249_v39, %v11265_v26  ;;  %v13687_v26 = vld [vmem:[%s17660_s5 + $0x88] sm:$0xff] }
0x1ec4   :  { %v15168_v46 = vpop.eup %15167  ;;  %14902 = vmatpush3.bf16.msra.mxu0 %v17402_v3  ;;  %14570 = vmatprep.mubr.msk.f32.mxu0 %vm15192_vm1, %v15193_v27 }
0x1ec5   :  { %v11984_v8 = vmul.f32 %v15168_v46, %v17337_v33  ;;  %14906 = vmatprep.subr.bf16.mxu0 %v15191_v18  ;;  %v14910_v44 = vpack.c.bf16 %v11273_v54, %v11205_v47  ;;  %v14913_v15 = vpack.c.bf16 %v11274_v34, %v11206_v6 }
0x1ec7   :  { %14571 = vmatmul.mubr.msk.f32.vlgmr.msra.gmra.mrb[74].mxu0 %vm3035_vm5, %v11984_v8  ;;  %v12996_v1 = vsel %vm3035_vm5, %v11984_v8, 0.0  ;;  %v13686_v8 = vld [vmem:[%s17660_s5 + $0x70] sm:$0xff] }
0x1ec8   :  { %14908 = vmatpush3.bf16.msra.mxu0 %v17405_v36  ;;  %14584 = vmatprep.mubr.msk.f32.mxu0 %vm15192_vm1, %v15193_v27  ;;  %v12997_v58 = vadd.f32 %v12996_v1, %v12995_v2  ;;  %v15015_v47 = vpack.i.bf16 %v13687_v26, %v13686_v8 }
0x1ec9   :  { %v15170_v3 = vpop.eup %15169  ;;  %14912 = vmatprep.subr.bf16.mxu0 %v15191_v18 }
0x1eca   :  { %v11986_v33 = vmul.f32 %v15170_v3, %v17341_v17  ;;  %v11242_v17 = vcombine.high %v11216_v51, %v11224_v21  ;;  %15016 = vrot.lane.b32.xlu0 %v15015_v47, %s15194_s18 }
0x1ecc   :  { %14578 = vmatmul.mubr.msk.f32.vlgmr.msra.gmra.mrb[80].mxu1 %vm3035_vm5, %v11986_v33  ;;  %v12998_v14 = vsel %vm3035_vm5, %v11986_v33, 0.0  ;;  %v11256_v52 = vrot.slane %v11242_v17, %v15464_v5 }
0x1ecd   :  { %14911 = vmatpush3.bf16.msra.mxu1 %v14910_v44  ;;  %14591 = vmatprep.mubr.msk.f32.mxu1 %vm15192_vm1, %v15193_v27  ;;  %v12999_v53 = vadd.f32 %v12998_v14, %v12997_v58 }
0x1ece   :  { %14915 = vmatprep.subr.bf16.mxu1 %v15191_v18  ;;  %v11275_v22 = vcombine.low %v11256_v52, %v11272_v37 }
0x1ed0   :  { %v14916_v9 = vpack.c.bf16 %v11275_v22, %v11207_v45 }
0x1eea   :  { %v11968_v4 = vpop.xlane.xlu0 %11967 }
0x1eeb   :  { %15171 = vrcp.f32 %v11968_v4 }
0x1eee   :  { %v11971_v36 = vpop.xlane.xlu0 %11970 }
0x1eef   :  { %15173 = vrcp.f32 %v11971_v36  ;;  %v11974_v29 = vpop.xlane.xlu1 %11973 }
0x1ef0   :  { %15175 = vrcp.f32 %v11974_v29 }
0x1ef2   :  { %v11980_v20 = vpop.xlane.xlu0 %11979 }
0x1ef3   :  { %15177 = vrcp.f32 %v11980_v20  ;;  %v11977_v7 = vpop.xlane.xlu1 %11976 }
0x1ef4   :  { %15179 = vrcp.f32 %v11977_v7 }
0x1ef5   :  { %v15172_v48 = vpop.eup %15171 }
0x1ef6   :  { %v11988_v19 = vmul.f32 %v15172_v48, %v17348_v50  ;;  %v11276_v50 = vcombine.high %v11256_v52, %v11272_v37 }
0x1ef8   :  { %v13000_v12 = vsel %vm3035_vm5, %v11988_v19, 0.0  ;;  %14585 = vmatmul.mubr.msk.f32.vlgmr.msra.gmra.mrb[76].mxu0 %vm3035_vm5, %v11988_v19  ;;  %v14919_v59 = vpack.c.bf16 %v11276_v50, %v11208_v31 }
0x1ef9   :  { %v15174_v32 = vpop.eup %15173  ;;  %v13001_v30 = vadd.f32 %v13000_v12, %v12999_v53  ;;  %14914 = vmatpush3.bf16.msra.mxu0 %v14913_v15  ;;  %14598 = vmatprep.mubr.msk.f32.mxu0 %vm15192_vm1, %v15193_v27 }
0x1efa   :  { %v15176_v49 = vpop.eup %15175  ;;  %v11990_v25 = vmul.f32 %v15174_v32, %v17356_v60  ;;  %14918 = vmatprep.subr.bf16.mxu0 %v15191_v18 }
0x1efb   :  { %v13009_v51 = vmul.f32 0.25, %v13001_v30  ;;  %v11992_v21 = vmul.f32 %v15176_v49, %v17358_v56 }
0x1efc   :  { %14592 = vmatmul.mubr.msk.f32.vlgmr.msra.gmra.mrb[82].mxu1 %vm3035_vm5, %v11990_v25  ;;  %v13002_v0 = vsel %vm3035_vm5, %v11990_v25, 0.0 }
0x1efd   :  { %v15178_v55 = vpop.eup %15177  ;;  %v13011_v62 = vsel %vm3035_vm5, %v13009_v51, 0.0  ;;  %v13003_v23 = vsel %vm3035_vm5, %v11992_v21, 0.0  ;;  %14599 = vmatmul.mubr.msk.f32.vlgmr.msra.gmra.mrb[78].mxu0 %vm3035_vm5, %v11992_v21  ;;  %14917 = vmatpush3.bf16.msra.mxu1 %v14916_v9 }
0x1efe   :  { %v15180_v60 = vpop.eup %15179  ;;  %v11996_v18 = vmul.f32 %v15178_v55, %v17372_v11  ;;  %14920 = vmatpush3.bf16.msra.mxu0 %v14919_v59  ;;  %14605 = vmatprep.mubr.msk.f32.mxu1 %vm15192_vm1, %v15193_v27  ;;  %13013 = vst [vmem:[%s17661_s8 + $0x8] sm:$0xff] %v13011_v62  ;;  %v13004_v43 = vadd.f32 %v13003_v23, %v13002_v0 }
0x1eff   :  { %v11994_v56 = vmul.f32 %v15180_v60, %v17368_v13  ;;  %14612 = vmatprep.mubr.msk.f32.mxu0 %vm15192_vm1, %v15193_v27  ;;  %v13688_v27 = vld [vmem:[%s17660_s5 + $0xa0] sm:$0xff]  ;;  %v13689_v13 = vld [vmem:[%s17660_s5 + $0xb8] sm:$0xff] }
0x1f00   :  { %v13007_v42 = vsel %vm3035_vm5, %v11996_v18, 0.0  ;;  %v15020_v39 = vpack.i.bf16 %v13689_v13, %v13688_v27 }
0x1f01   :  { %v13005_v41 = vsel %vm3035_vm5, %v11994_v56, 0.0  ;;  %14606 = vmatmul.mubr.msk.f32.vlgmr.msra.gmra.mrb[84].mxu1 %vm3035_vm5, %v11994_v56  ;;  %14613 = vmatmul.mubr.msk.f32.vlgmr.msra.gmra.mrb[80].mxu0 %vm3035_vm5, %v11996_v18 }
0x1f02   :  { %v13006_v11 = vadd.f32 %v13005_v41, %v13004_v43  ;;  %15021 = vrot.lane.b32.xlu1 %v15020_v39, %s15194_s18 }
0x1f04   :  { %v13008_v40 = vadd.f32 %v13007_v42, %v13006_v11 }
0x1f06   :  { %v13010_v38 = vmul.f32 0.25, %v13008_v40 }
0x1f08   :  { %v13012_v46 = vsel %vm3035_vm5, %v13010_v38, 0.0 }
0x1f09   :  { %13014 = vst [vmem:[%s17661_s8 + $0x20] sm:$0xff] %v13012_v46 }
0x1f96   :  { %v12066_v3 = vpop.f32.mrb[72].mxu0 }
0x1f97   :  { %v14565_v54 = vpop.f32.mrb[73].mxu0 }
0x1f9a   :  { %v12139_v33 = vpop.f32.mrb[74].mxu0 }
0x1f9b   :  { %v14572_v44 = vpop.f32.mrb[75].mxu0 }
0x1f9f   :  { %v12212_v4 = vpop.f32.mrb[80].mxu1 }
0x1fa0   :  { %v12581_v36 = vcombine.low %v12066_v3, %v12212_v4  ;;  %v12582_v24 = vcombine.high %v12066_v3, %v12212_v4  ;;  %v14579_v29 = vpop.f32.mrb[81].mxu1  ;;  %v15022_v4 = vpop.permute.xlu1 %15021 }
0x1fa2   :  { %v12589_v2 = vrot.slane %v12581_v36, %v15458_v61  ;;  %v12596_v20 = vrot.slane %v12582_v24, %v15458_v61  ;;  %v15017_v36 = vpop.permute.xlu0 %15016 }
0x1fcb   :  { %v12285_v16 = vpop.f32.mrb[76].mxu0 }
0x1fcc   :  { %v12597_v1 = vcombine.low %v12139_v33, %v12285_v16  ;;  %v12598_v17 = vcombine.high %v12139_v33, %v12285_v16  ;;  %v14586_v57 = vpop.f32.mrb[77].mxu0 }
0x1fce   :  { %v12605_v10 = vrot.slane %v12597_v1, %v15458_v61  ;;  %v12612_v58 = vrot.slane %v12598_v17, %v15458_v61  ;;  %v15024_v1 = vunpack.i.h.bf16 %v15022_v4 }
0x1fcf   :  { %v12358_v7 = vpop.f32.mrb[82].mxu1 }
0x1fd0   :  { %v12613_v6 = vcombine.low %v12589_v2, %v12605_v10  ;;  %v12614_v28 = vcombine.high %v12589_v2, %v12605_v10  ;;  %v12629_v14 = vcombine.low %v12596_v20, %v12612_v58  ;;  %v12630_v48 = vcombine.high %v12596_v20, %v12612_v58  ;;  %v12431_v34 = vpop.f32.mrb[78].mxu0  ;;  %v14593_v52 = vpop.f32.mrb[83].mxu1 }
0x1fd1   :  { %v14600_v37 = vpop.f32.mrb[79].mxu0  ;;  %v15023_v10 = vunpack.i.l.bf16 %v15022_v4 }
0x1fd2   :  { %v12621_v19 = vrot.slane %v12613_v6, %v15464_v5  ;;  %v12628_v53 = vrot.slane %v12614_v28, %v15464_v5  ;;  %v12637_v15 = vrot.slane %v12629_v14, %v15464_v5  ;;  %v12644_v45 = vrot.slane %v12630_v48, %v15464_v5 }
0x1fd3   :  { %v15018_v6 = vunpack.i.l.bf16 %v15017_v36  ;;  %v14925_v52 = vpack.c.bf16 %v15024_v1, %v15023_v10  ;;  %v13701_v1 = vld [vmem:[%s17660_s5 + $0xb0] sm:$0xff] }
0x1fd4   :  { %v12717_v12 = vcombine.low %v12621_v19, %v12628_v53  ;;  %v13682_v31 = vcombine.high %v12621_v19, %v12628_v53  ;;  %v12733_v32 = vcombine.low %v12637_v15, %v12644_v45  ;;  %v13683_v30 = vcombine.high %v12637_v15, %v12644_v45  ;;  %v12504_v22 = vpop.f32.mrb[84].mxu1  ;;  %v12577_v49 = vpop.f32.mrb[80].mxu0 }
0x1fd5   :  { %v12649_v25 = vcombine.low %v12358_v7, %v12504_v22  ;;  %v12650_v50 = vcombine.high %v12358_v7, %v12504_v22  ;;  %v12665_v51 = vcombine.low %v12431_v34, %v12577_v49  ;;  %v12666_v21 = vcombine.high %v12431_v34, %v12577_v49  ;;  %v14607_v9 = vpop.f32.mrb[85].mxu1  ;;  %v14614_v59 = vpop.f32.mrb[81].mxu0 }
0x1fd6   :  { %v12724_v55 = vrot.slane %v12717_v12, %v15458_v61  ;;  %v12732_v62 = vrot.slane %v13682_v31, %v15458_v61  ;;  %v12740_v0 = vrot.slane %v12733_v32, %v15458_v61  ;;  %v12748_v23 = vrot.slane %v13683_v30, %v15458_v61 }
0x1fd7   :  { %v12657_v60 = vrot.slane %v12649_v25, %v15458_v61  ;;  %v12664_v18 = vrot.slane %v12650_v50, %v15458_v61  ;;  %v12673_v56 = vrot.slane %v12665_v51, %v15458_v61  ;;  %v12680_v43 = vrot.slane %v12666_v21, %v15458_v61  ;;  %v13691_v50 = vld [vmem:[%s17659_s7 + $0x7] ss:$0 sm:$0xff] }
0x1fd8   :  { %v12749_v41 = vcombine.low %v12724_v55, %v12732_v62  ;;  %v12765_v11 = vcombine.low %v12740_v0, %v12748_v23  ;;  %v12750_v42 = vcombine.high %v12724_v55, %v12732_v62  ;;  %v12766_v40 = vcombine.high %v12740_v0, %v12748_v23 }
0x1fd9   :  { %v12681_v38 = vcombine.low %v12657_v60, %v12673_v56  ;;  %v12682_v46 = vcombine.high %v12657_v60, %v12673_v56  ;;  %v12697_v27 = vcombine.low %v12664_v18, %v12680_v43  ;;  %v12698_v13 = vcombine.high %v12664_v18, %v12680_v43 }
0x1fda   :  { %v12757_v8 = vrot.slane %v12749_v41, %v15464_v5  ;;  %v12773_v39 = vrot.slane %v12765_v11, %v15464_v5  ;;  %v12764_v26 = vrot.slane %v12750_v42, %v15464_v5  ;;  %v12780_v47 = vrot.slane %v12766_v40, %v15464_v5 }
0x1fdb   :  { %v12689_v3 = vrot.slane %v12681_v38, %v15464_v5  ;;  %v12696_v54 = vrot.slane %v12682_v46, %v15464_v5  ;;  %v12705_v33 = vrot.slane %v12697_v27, %v15464_v5  ;;  %v12712_v44 = vrot.slane %v12698_v13, %v15464_v5 }
0x1fdc   :  { %v12782_v24 = vcombine.high %v12757_v8, %v12773_v39  ;;  %v12783_v29 = vcombine.low %v12764_v26, %v12780_v47  ;;  %v12784_v16 = vcombine.high %v12764_v26, %v12780_v47  ;;  %v12781_v58 = vcombine.low %v12757_v8, %v12773_v39  ;;  %v13698_v8 = vld [vmem:[%s17660_s5 + $0x68] sm:$0xff] }
0x1fdd   :  { %v12785_v17 = vcombine.low %v12689_v3, %v12696_v54  ;;  %v13684_v57 = vcombine.high %v12689_v3, %v12696_v54  ;;  %v12801_v2 = vcombine.low %v12705_v33, %v12712_v44  ;;  %v13685_v20 = vcombine.high %v12705_v33, %v12712_v44 }
0x1fde   :  { %12855 = vrot.lane.b32.xlu1 %v12782_v24, %s15201_s25  ;;  %v15019_v7 = vunpack.i.h.bf16 %v15017_v36 }
0x1fdf   :  { %v12792_v28 = vrot.slane %v12785_v17, %v15458_v61  ;;  %v12800_v14 = vrot.slane %v13684_v57, %v15458_v61  ;;  %v12808_v48 = vrot.slane %v12801_v2, %v15458_v61  ;;  %v12816_v34 = vrot.slane %v13685_v20, %v15458_v61 }
0x1fe0   :  { %v14921_v37 = vpack.c.bf16 %v15019_v7, %v15018_v6  ;;  %v13706_v7 = vld [vmem:[%s17662_s6 + $0x40] sm:$0xff]  ;;  %v13707_v6 = vld [vmem:[%s17662_s6 + $0x48] sm:$0xff] }
0x1fe1   :  { %v12817_v19 = vcombine.low %v12792_v28, %v12800_v14  ;;  %v12833_v53 = vcombine.low %v12808_v48, %v12816_v34  ;;  %v12818_v15 = vcombine.high %v12792_v28, %v12800_v14  ;;  %v12834_v45 = vcombine.high %v12808_v48, %v12816_v34  ;;  %v13708_v14 = vld [vmem:[%s17662_s6 + $0x50] sm:$0xff]  ;;  %v13709_v48 = vld [vmem:[%s17662_s6 + $0x58] sm:$0xff] }
0x1fe2   :  { %12863 = vrot.lane.b32.xlu1 %v12783_v29, %s15202_s26  ;;  %14922 = vmatprep.subr.bf16.mxu1 %v14921_v37  ;;  %v14937_v28 = vpack.c.bf16 %v13707_v6, %v13706_v7  ;;  %v14941_v34 = vpack.c.bf16 %v13709_v48, %v13708_v14 }
0x1fe3   :  { %v12825_v12 = vrot.slane %v12817_v19, %v15464_v5  ;;  %v12841_v31 = vrot.slane %v12833_v53, %v15464_v5  ;;  %v12832_v32 = vrot.slane %v12818_v15, %v15464_v5  ;;  %v12848_v30 = vrot.slane %v12834_v45, %v15464_v5  ;;  %14924 = vmatpush3.bf16.msra.mxu1 %v14921_v37  ;;  %v13711_v37 = vld [vmem:[%s17662_s6 + $0x68] sm:$0xff] }
0x1fe4   :  { %14926 = vmatprep.subr.bf16.mxu1 %v14925_v52 }
0x1fe5   :  { %v12850_v61 = vcombine.high %v12825_v12, %v12841_v31  ;;  %v12851_v22 = vcombine.low %v12832_v32, %v12848_v30  ;;  %v12852_v49 = vcombine.high %v12832_v32, %v12848_v30  ;;  %v12849_v25 = vcombine.low %v12825_v12, %v12841_v31 }
0x1fe6   :  { %12871 = vrot.lane.b32.xlu1 %v12784_v16, %s15203_s27  ;;  %v13700_v16 = vld [vmem:[%s17660_s5 + $0x98] sm:$0xff] }
0x1fe7   :  { %12857 = vrot.lane.b32.xlu0 %v12850_v61, %s15201_s25  ;;  %14928 = vmatpush3.bf16.msra.mxu1 %v14925_v52  ;;  %v15030_v17 = vpack.i.bf16 %v13701_v1, %v13700_v16  ;;  %v13710_v52 = vld [vmem:[%s17662_s6 + $0x60] sm:$0xff] }
0x1fe8   :  { %14938 = vmatprep.subr.bf16.mxu1 %v14937_v28  ;;  %v14945_v19 = vpack.c.bf16 %v13711_v37, %v13710_v52 }
0x1fea   :  { %12909 = vrot.lane.b32.xlu1 %v13691_v50, %s15194_s18 }
0x1feb   :  { %12865 = vrot.lane.b32.xlu0 %v12851_v22, %s15202_s26 }
0x1fef   :  { %12873 = vrot.lane.b32.xlu0 %v12852_v49, %s15203_s27 }
0x2050   :  { %v12856_v5 = vpop.permute.xlu1 %12855 }
0x2051   :  { %v12877_v21 = vsel %vm1456_vm4, %v12781_v58, %v12856_v5  ;;  %v13703_v58 = vld [vmem:[%s17659_s7 + $0x6] ss:$0 sm:$0xff] }
0x2054   :  { %v12864_v51 = vpop.permute.xlu1 %12863 }
0x2055   :  { %v12879_v9 = vsel %vm3035_vm5, %v12877_v21, %v12864_v51 }
0x2058   :  { %v12872_v59 = vpop.permute.xlu1 %12871 }
0x2059   :  { %v12858_v55 = vpop.permute.xlu0 %12857  ;;  %v12881_v62 = vsel %vm3038_vm6, %v12879_v9, %v12872_v59  ;;  %v13697_v59 = vld [vmem:[%s17659_s7 + $0x9] ss:$0 sm:$0xff] }
0x205a   :  { %14623 = vmatprep.mubr.msk.f32.mxu1 %vm155_vm3, %v12881_v62  ;;  %v12878_v23 = vsel %vm1456_vm4, %v12849_v25, %v12858_v55 }
0x205c   :  { %v12910_v43 = vpop.permute.xlu1 %12909 }
0x205d   :  { %v12866_v0 = vpop.permute.xlu0 %12865 }
0x205e   :  { %v12880_v60 = vsel %vm3035_vm5, %v12878_v23, %v12866_v0  ;;  %v13712_v23 = vld [vmem:[%s17662_s6 + $0x70] sm:$0xff] }
0x2061   :  { %v12874_v18 = vpop.permute.xlu0 %12873 }
0x2062   :  { %v12882_v56 = vsel %vm3038_vm6, %v12880_v60, %v12874_v18  ;;  %v13713_v60 = vld [vmem:[%s17662_s6 + $0x78] sm:$0xff] }
0x2063   :  { %14624 = vmatmul.mubr.msk.f32.vlgmr.msra.gmra.mrb[86].mxu1 %vm155_vm3, %v12882_v56  ;;  %v14949_v18 = vpack.c.bf16 %v13713_v60, %v13712_v23 }
0x2064   :  { %14940 = vmatpush3.bf16.msra.mxu1 %v14937_v28 }
0x2065   :  { %14942 = vmatprep.subr.bf16.mxu1 %v14941_v34 }
0x2068   :  { %14944 = vmatpush3.bf16.msra.mxu1 %v14941_v34 }
0x2069   :  { %14946 = vmatprep.subr.bf16.mxu1 %v14945_v19 }
0x206c   :  { %14948 = vmatpush3.bf16.msra.mxu1 %v14945_v19 }
0x206d   :  { %14950 = vmatprep.subr.bf16.mxu1 %v14949_v18 }
0x2070   :  { %14952 = vmatpush3.bf16.msra.mxu1 %v14949_v18 }
0x2136   :  { %v14625_v41 = vpop.f32.mrb[86].mxu1 }
0x2137   :  { %v12990_v11 = vadd.f32 %v14625_v41, %v12910_v43  ;;  %v12984_v42 = vpop.f32.mrb[87].mxu1 }
0x2138   :  { %v12985_v40 = vadd.f32 %v12984_v42, %v12910_v43 }
0x2139   :  { %v17555_v38 = vadd.f32 %v12990_v11, %v16958_v35  ;;  %v13699_v35 = vld [vmem:[%s17660_s5 + $0x80] sm:$0xff] }
0x213a   :  { %v17558_v46 = vadd.f32 %v12985_v40, %v16961_v63  ;;  %v15025_v39 = vpack.i.bf16 %v13699_v35, %v13698_v8  ;;  %v13696_v63 = vld [vmem:[%s17659_s7 + $0x8] ss:$0 sm:$0xff] }
0x213b   :  { %v13020_v27 = vsel %vm155_vm3, %v17555_v38, 0.0 }
0x213c   :  { %13021 = vadd.xlane.f32.xlu1 %v13020_v27  ;;  %v13017_v13 = vsel %vm155_vm3, %v17558_v46, 0.0 }
0x213d   :  { %13018 = vadd.xlane.f32.xlu0 %v13017_v13 }
0x214d   :  { %15026 = vrot.lane.b32.xlu1 %v15025_v39, %s15198_s20 }
0x2151   :  { %13048 = vrot.lane.b32.xlu1 %v13696_v63, %s15190_s21 }
0x2155   :  { %13087 = vrot.lane.b32.xlu1 %v13703_v58, %s15198_s20  ;;  %v13317_v58 = vld [vmem:[%s17663_s4 + $0x18] sm:$0xff] }
0x21c9   :  { %v13022_v26 = vpop.xlane.xlu1 %13021 }
0x21ca   :  { %v13024_v47 = vmul.f32 0.03125, %v13022_v26  ;;  %v13019_v3 = vpop.xlane.xlu0 %13018 }
0x21cb   :  { %v13023_v54 = vmul.f32 0.03125, %v13019_v3 }
0x21cc   :  { %v13026_v33 = vsub.f32 %v17555_v38, %v13024_v47 }
0x21cd   :  { %v13025_v44 = vsub.f32 %v17558_v46, %v13023_v54  ;;  %v15027_v57 = vpop.permute.xlu1 %15026 }
0x21ce   :  { %v13028_v4 = vmul.f32 %v13026_v33, %v13026_v33  ;;  %v15029_v2 = vunpack.i.h.bf16 %v15027_v57  ;;  %v15028_v20 = vunpack.i.l.bf16 %v15027_v57  ;;  %v13314_v57 = vld [vmem:[%s17663_s4] sm:$0xff] }
0x21cf   :  { %v13027_v24 = vmul.f32 %v13025_v44, %v13025_v44 }
0x21d0   :  { %v13032_v36 = vsel %vm155_vm3, %v13028_v4, 0.0  ;;  %v14929_v10 = vpack.c.bf16 %v15029_v2, %v15028_v20  ;;  %v13315_v2 = vld [vmem:[%s17663_s4 + $0x8] sm:$0xff] }
0x21d1   :  { %13033 = vadd.xlane.f32.xlu0 %v13032_v36  ;;  %v13029_v29 = vsel %vm155_vm3, %v13027_v24, 0.0  ;;  %v13049_v5 = vpop.permute.xlu1 %13048  ;;  %v14953_v20 = vpack.c.bf16 %v13315_v2, %v13314_v57 }
0x21d2   :  { %14930 = vmatprep.subr.bf16.mxu0 %v14929_v10 }
0x21d3   :  { %14932 = vmatpush3.bf16.msra.mxu0 %v14929_v10  ;;  %v13316_v10 = vld [vmem:[%s17663_s4 + $0x10] sm:$0xff] }
0x21d4   :  { %v14957_v7 = vpack.c.bf16 %v13317_v58, %v13316_v10 }
0x21d5   :  { %13030 = vadd.xlane.f32.xlu0 %v13029_v29  ;;  %v13088_v56 = vpop.permute.xlu1 %13087 }
0x21eb   :  { %15031 = vrot.lane.b32.xlu0 %v15030_v17, %s15198_s20 }
0x21ef   :  { %13188 = vrot.lane.b32.xlu0 %v13691_v50, %s15198_s20 }
0x225e   :  { %v13034_v53 = vpop.xlane.xlu0 %13033 }
0x225f   :  { %v13036_v15 = vmul.f32 0.03125, %v13034_v53 }
0x2261   :  { %v13038_v45 = vadd.f32 1e-05, %v13036_v15 }
0x2262   :  { %v13031_v12 = vpop.xlane.xlu0 %13030 }
0x2263   :  { %15181 = vrsqrt.f32 %v13038_v45  ;;  %v13035_v31 = vmul.f32 0.03125, %v13031_v12 }
0x2265   :  { %v13037_v32 = vadd.f32 1e-05, %v13035_v31 }
0x2266   :  { %v15032_v30 = vpop.permute.xlu0 %15031 }
0x2267   :  { %15183 = vrsqrt.f32 %v13037_v32  ;;  %v15034_v61 = vunpack.i.h.bf16 %v15032_v30  ;;  %v15033_v22 = vunpack.i.l.bf16 %v15032_v30 }
0x2269   :  { %v14933_v49 = vpack.c.bf16 %v15034_v61, %v15033_v22  ;;  %v13719_v61 = vld [vmem:[%s17657_s3] ss:$0 sm:$0xff] }
0x226a   :  { %v13189_v13 = vpop.permute.xlu0 %13188 }
0x226b   :  { %14934 = vmatprep.subr.bf16.mxu0 %v14933_v49 }
0x226c   :  { %14936 = vmatpush3.bf16.msra.mxu0 %v14933_v49 }
0x226d   :  { %v15182_v25 = vpop.eup %15181  ;;  %14954 = vmatprep.subr.bf16.mxu0 %v14953_v20 }
0x226e   :  { %v13042_v50 = vmul.f32 %v15182_v25, %v13026_v33 }
0x2270   :  { %v13052_v9 = vmul.f32 %v13049_v5, %v13042_v50 }
0x2271   :  { %v15184_v51 = vpop.eup %15183 }
0x2272   :  { %v13041_v21 = vmul.f32 %v15184_v51, %v13025_v44  ;;  %v13060_v0 = vadd.f32 %v13697_v59, %v13052_v9 }
0x2274   :  { %v13051_v55 = vmul.f32 %v13049_v5, %v13041_v21 }
0x2276   :  { %v13059_v62 = vadd.f32 %v13697_v59, %v13051_v55 }
0x2278   :  { %14634 = vmatprep.mubr.msk.f32.mxu0 %vm155_vm3, %v13059_v62 }
0x2279   :  { %14635 = vmatmul.mubr.msk.f32.vlgmr.msra.gmra.mrb[82].mxu0 %vm155_vm3, %v13060_v0 }
0x227a   :  { %14956 = vmatpush3.bf16.msra.mxu0 %v14953_v20 }
0x227b   :  { %14958 = vmatprep.subr.bf16.mxu0 %v14957_v7 }
0x227e   :  { %14960 = vmatpush3.bf16.msra.mxu0 %v14957_v7 }
0x234c   :  { %v14636_v43 = vpop.f32.mrb[82].mxu0 }
0x234d   :  { %v13168_v41 = vadd.f32 %v14636_v43, %v13088_v56  ;;  %v13162_v11 = vpop.f32.mrb[83].mxu0 }
0x234e   :  { %v13163_v42 = vadd.f32 %v13162_v11, %v13088_v56 }
0x234f   :  { %v13172_v27 = vmax.f32 %v13168_v41, 0.0 }
0x2350   :  { %v13171_v40 = vmax.f32 %v13163_v42, 0.0 }
0x2352   :  { %14653 = vmatprep.mubr.msk.f32.mxu1 %vm6777_vm8, %v13171_v40 }
0x2353   :  { %14654 = vmatmul.mubr.msk.f32.vlgmr.msra.gmra.mrb[88].mxu1 %vm6777_vm8, %v13172_v27 }
0x2426   :  { %v14655_v8 = vpop.f32.mrb[88].mxu1 }
0x2427   :  { %v13269_v35 = vadd.f32 %v14655_v8, %v13189_v13  ;;  %v13263_v39 = vpop.f32.mrb[89].mxu1 }
0x2428   :  { %v13264_v63 = vadd.f32 %v13263_v39, %v13189_v13 }
0x2429   :  { %v13273_v26 = vadd.f32 %v13269_v35, %v17555_v38 }
0x242a   :  { %v13272_v47 = vadd.f32 %v13264_v63, %v17558_v46  ;;  %v13718_v46 = vld [vmem:[%s17657_s3 + $0x2] ss:$0 sm:$0xff] }
0x242b   :  { %v13278_v3 = vsel %vm155_vm3, %v13273_v26, 0.0 }
0x242c   :  { %13279 = vadd.xlane.f32.xlu0 %v13278_v3  ;;  %v13275_v54 = vsel %vm155_vm3, %v13272_v47, 0.0 }
0x242d   :  { %13276 = vadd.xlane.f32.xlu1 %v13275_v54 }
0x24b9   :  { %v13280_v33 = vpop.xlane.xlu0 %13279 }
0x24ba   :  { %v13282_v44 = vmul.f32 0.03125, %v13280_v33  ;;  %v13277_v4 = vpop.xlane.xlu1 %13276 }
0x24bb   :  { %v13281_v36 = vmul.f32 0.03125, %v13277_v4 }
0x24bc   :  { %v13284_v24 = vsub.f32 %v13273_v26, %v13282_v44 }
0x24bd   :  { %v13283_v29 = vsub.f32 %v13272_v47, %v13281_v36 }
0x24be   :  { %v13286_v16 = vmul.f32 %v13284_v24, %v13284_v24 }
0x24bf   :  { %v13285_v1 = vmul.f32 %v13283_v29, %v13283_v29 }
0x24c0   :  { %v13290_v17 = vsel %vm155_vm3, %v13286_v16, 0.0 }
0x24c1   :  { %13291 = vadd.xlane.f32.xlu1 %v13290_v17  ;;  %v13287_v38 = vsel %vm155_vm3, %v13285_v1, 0.0 }
0x24c2   :  { %13288 = vadd.xlane.f32.xlu0 %v13287_v38 }
0x24d8   :  { %13309 = vrot.lane.b32.xlu0 %v13718_v46, %s15194_s18 }
0x254e   :  { %v13292_v6 = vpop.xlane.xlu1 %13291 }
0x254f   :  { %v13294_v28 = vmul.f32 0.03125, %v13292_v6  ;;  %v13289_v14 = vpop.xlane.xlu0 %13288 }
0x2550   :  { %v13293_v48 = vmul.f32 0.03125, %v13289_v14 }
0x2551   :  { %v13296_v34 = vadd.f32 1e-05, %v13294_v28 }
0x2552   :  { %v13295_v52 = vadd.f32 1e-05, %v13293_v48 }
0x2553   :  { %15185 = vrsqrt.f32 %v13296_v34  ;;  %v13310_v45 = vpop.permute.xlu0 %13309 }
0x2554   :  { %15187 = vrsqrt.f32 %v13295_v52 }
0x255d   :  { %v15186_v37 = vpop.eup %15185 }
0x255e   :  { %v15188_v19 = vpop.eup %15187  ;;  %v13300_v53 = vmul.f32 %v15186_v37, %v13284_v24 }
0x255f   :  { %v13299_v15 = vmul.f32 %v15188_v19, %v13283_v29 }
0x2560   :  { %v13308_v12 = vmul.f32 %v13718_v46, %v13300_v53 }
0x2561   :  { %v13307_v31 = vmul.f32 %v13718_v46, %v13299_v15 }
0x2562   :  { %v13313_v30 = vadd.f32 %v13310_v45, %v13308_v12 }
0x2563   :  { %v13312_v32 = vadd.f32 %v13310_v45, %v13307_v31 }
0x2565   :  { %14664 = vmatprep.mubr.msk.f32.mxu0 %vm155_vm3, %v13312_v32 }
0x2566   :  { %14665 = vmatmul.mubr.msk.f32.vlgmr.msra.gmra.mrb[84].mxu0 %vm155_vm3, %v13313_v30 }
0x2639   :  { %v14666_v22 = vpop.f32.mrb[84].mxu0 }
0x263a   :  { %v13403_v49 = vadd.f32 %v14666_v22, %v13719_v61  ;;  %v13397_v25 = vpop.f32.mrb[85].mxu0 }
0x263b   :  { %v13398_v50 = vadd.f32 %v13719_v61, %v13397_v25 }
0x263c   :  { %13407 = vst [vmem:[%s17661_s8 + $0x28] sm:$0xff] %v13403_v49 }
0x263d   :  { %13406 = vst [vmem:[%s17661_s8 + $0x10] sm:$0xff] %v13398_v50 }

</bundles_post_ra>
